<compile_context>
chip_gen: v7x
topology: tpu7x:2x2x1
jax: 0.10.0
libtpu: 0.0.40
codegen_flags: <defaults>
</compile_context>

<pallas_src>
import jax
import jax.numpy as jnp
from jax import lax
from jax.experimental import pallas as pl
from jax.experimental.pallas import tpu as pltpu

NEG_SLOPE = 0.1      # LeakyReLU negative slope used by QuantizationLayer
OUT_HW = 416         # F.interpolate target size
HIDDEN = 100         # mlp_layers = [1, 100, 100, 1]
HPAD = 128           # lane/sublane-aligned padding of the hidden dim (zero pad: exact)


def _leaky(x):
    # max(x, a*x) == LeakyReLU(x) for 0 < a < 1; 2 VPU ops instead of cmp+mul+select.
    return jnp.maximum(x, NEG_SLOPE * x)


def _round_up(a, b):
    return ((a + b - 1) // b) * b


# ------------------- fused ValueLayer MLP + voxel scatter kernel -------------------
# Grid: (B, NT) with NT = ceil(N / tm); samples lane-dense (tm on lanes), hidden on
# sublanes (HPAD = 128).  Output block (1, C, H*W) is resident across the sample axis
# and accumulated in VMEM; the scatter is a one-hot MXU matmul shared across bins.
def _make_mlp_scatter_kernel(C, HW):
    def kernel(tn_ref, idx_ref, w1_ref, b1_ref, w2_ref, b2_ref, w3_ref, b3_ref,
               o_ref, vals_sc):
        @pl.when(pl.program_id(1) == 0)
        def _():
            o_ref[...] = jnp.zeros_like(o_ref)

        tn = tn_ref[0, 0]                       # (1, tm)   normalized times
        idx = idx_ref[0, 0]                     # (tm, 1)   spatial index x + W*y (int32)
        w1 = w1_ref[...]                        # (HPAD, 1) f32
        b1 = b1_ref[...]                        # (HPAD, 1) f32
        w2b = w2_ref[...]                       # (HPAD, HPAD) bf16 (MXU operand)
        b2 = b2_ref[...]                        # (HPAD, 1) f32
        w3c = w3_ref[...]                       # (HPAD, 1) f32 (W3 stored as a column)
        b3 = b3_ref[...]                        # (1, 1)    f32

        # Shared layer-1 affine: W1 * tn + b1 (outer broadcast on the VPU).  The
        # per-bin input shift tn - c/(C-1) becomes a cheap (HPAD,1)-column subtract.
        a0 = w1 * tn + b1                       # (HPAD, tm)

        for c in range(C):                      # static unroll over the temporal bins
            h = _leaky(a0 - (float(c) / (C - 1)) * w1)                      # (HPAD, tm)
            # Linear(100 -> 100): bf16 operands, f32 accumulation on the MXU.
            h = _leaky(jnp.dot(w2b, h.astype(jnp.bfloat16),
                               preferred_element_type=jnp.float32) + b2)    # (HPAD, tm)
            # Linear(100 -> 1): VPU multiply + sublane (XLU) reduce; no M=1 matmul.
            v = jnp.sum(w3c * h, axis=0, keepdims=True)                     # (1, tm)
            # values = t * value_layer(t - c/(C-1)); padded samples have tn == 0.
            vals_sc[c:c + 1, :] = tn * (v + b3)

        # One-hot scatter-add on the MXU (exact in f32: products are value * 1.0/0.0).
        # OOB / padded idx (e.g. -1) never matches the iota -> silently dropped.
        tm = idx.shape[0]
        onehot = (idx == lax.broadcasted_iota(jnp.int32, (tm, HW), 1)
                  ).astype(jnp.float32)                                     # (tm, HW)
        o_ref[...] = o_ref[...] + jnp.dot(
            vals_sc[...], onehot, preferred_element_type=jnp.float32)[None]
    return kernel


def fused_mlp_scatter(tn_tiles, idx_tiles, mlp_params, C, HW):
    """tn_tiles: (B, NT, 1, tm) f32; idx_tiles: (B, NT, tm, 1) i32.
    Returns per-batch voxel grids (B, C, HW) f32 (no cross-batch accumulation)."""
    w1, b1, w2b, b2, w3c, b3 = mlp_params
    B, NT, _, tm = tn_tiles.shape

    def full(shape):
        return pl.BlockSpec(shape, lambda b, nt: (0, 0))

    return pl.pallas_call(
        _make_mlp_scatter_kernel(C, HW),
        out_shape=jax.ShapeDtypeStruct((B, C, HW), jnp.float32),
        grid_spec=pltpu.PrefetchScalarGridSpec(
            num_scalar_prefetch=0,
            grid=(B, NT),
            in_specs=[pl.BlockSpec((1, 1, 1, tm), lambda b, nt: (b, nt, 0, 0)),
                      pl.BlockSpec((1, 1, tm, 1), lambda b, nt: (b, nt, 0, 0)),
                      full((HPAD, 1)), full((HPAD, 1)),
                      full((HPAD, HPAD)), full((HPAD, 1)),
                      full((HPAD, 1)), full((1, 1))],
            out_specs=pl.BlockSpec((1, C, HW), lambda b, nt: (b, 0, 0)),
            scratch_shapes=[pltpu.VMEM((C, tm), jnp.float32)]),
        compiler_params=pltpu.CompilerParams(
            dimension_semantics=("parallel", "arbitrary"),
            vmem_limit_bytes=48 * 1024 * 1024),
    )(tn_tiles, idx_tiles, w1, b1, w2b, b2, w3c, b3)


# ------------------- fused 1x1 conv + nearest-upsample kernel ----------------------
# A 1x1 conv commutes exactly with nearest interpolation.  The conv weights are
# folded into the row selector: erw[c] (416, Cin*H) with erw[c, o, k*H+h] =
# conv_w[c,k]*Er[o,h], so per (batch, out-channel):  out = (erw[c] @ vox_flat) @ Ec.
def _conv_up_kernel(x_ref, erw_ref, ec_ref, o_ref):
    t = jnp.dot(erw_ref[0], x_ref[0], preferred_element_type=jnp.float32)   # (416, W)
    o_ref[0, 0] = jnp.dot(t, ec_ref[...], preferred_element_type=jnp.float32)


def conv_upsample(vox_flat, erw, ec):
    """vox_flat: (B, Cin*H, W); erw: (Cout, 416, Cin*H); ec: (W, 416)."""
    B, CinH, W = vox_flat.shape
    Cout = erw.shape[0]
    # NOTE: this kernel is HBM-write-bound (~2 MB out vs ~9 KB in per block); output
    # stays f32 to match the reference module's dtype (bf16 would halve writeback).
    return pl.pallas_call(
        _conv_up_kernel,
        out_shape=jax.ShapeDtypeStruct((B, Cout, OUT_HW, OUT_HW), jnp.float32),
        grid_spec=pltpu.PrefetchScalarGridSpec(
            num_scalar_prefetch=0,
            grid=(B, Cout),
            in_specs=[pl.BlockSpec((1, CinH, W), lambda b, c: (b, 0, 0)),
                      pl.BlockSpec((1, OUT_HW, CinH), lambda b, c: (c, 0, 0)),
                      pl.BlockSpec((W, OUT_HW), lambda b, c: (0, 0))],
            out_specs=pl.BlockSpec((1, 1, OUT_HW, OUT_HW),
                                   lambda b, c: (b, c, 0, 0))),
        compiler_params=pltpu.CompilerParams(
            dimension_semantics=("parallel", "parallel")),
    )(vox_flat, erw, ec)


# -------------------------------- parameter init -----------------------------------
def init_params(key, cin=9, cout=3):
    # TODO(synk): the reference loads trained MLP weights (trilinear_init.pth /
    # init_kernel training loop); here weights use PyTorch-Linear-style random init.
    ks = jax.random.split(key, 4)

    def linear(k, fin, fout):
        kw, kb = jax.random.split(k)
        bound = 1.0 / (fin ** 0.5)
        w = jax.random.uniform(kw, (fout, fin), jnp.float32, -bound, bound)
        b = jax.random.uniform(kb, (fout,), jnp.float32, -bound, bound)
        return w, b

    w1, b1 = linear(ks[0], 1, HIDDEN)          # (100, 1), (100,)
    w2, b2 = linear(ks[1], HIDDEN, HIDDEN)     # (100, 100), (100,)
    w3, b3 = linear(ks[2], HIDDEN, 1)          # (1, 100), (1,)
    # Zero-pad hidden 100 -> 128: exact because LeakyReLU(0) = 0 and padded
    # rows/cols contribute nothing.
    w1p = jnp.zeros((HPAD, 1), jnp.float32).at[:HIDDEN, :].set(w1)
    b1p = jnp.zeros((HPAD, 1), jnp.float32).at[:HIDDEN, 0].set(b1)
    # W2 is stored bf16 (MXU-native on v6e/v7x); accumulation stays f32 in-kernel.
    w2p = (jnp.zeros((HPAD, HPAD), jnp.float32)
           .at[:HIDDEN, :HIDDEN].set(w2).astype(jnp.bfloat16))
    b2p = jnp.zeros((HPAD, 1), jnp.float32).at[:HIDDEN, 0].set(b2)
    w3c = jnp.zeros((HPAD, 1), jnp.float32).at[:HIDDEN, 0].set(w3[0])   # column form
    b3p = b3.reshape(1, 1)

    bound = 1.0 / (cin ** 0.5)                 # Conv2d(9, 3, 1, bias=False) init range
    conv_w = jax.random.uniform(ks[3], (cout, cin), jnp.float32, -bound, bound)
    return (w1p, b1p, w2p, b2p, w3c, b3p), conv_w


# --------------------------------- forward pass ------------------------------------
def quantization_layer_forward(events, mlp_params, conv_w, dim):
    C, H, W = dim
    HW = H * W
    B, N, _ = events.shape
    Cout = conv_w.shape[0]
    assert conv_w.shape[1] == C

    xs = events[:, :, 0]
    ys = events[:, :, 1]
    ts = events[:, :, 2]
    # Reference: t = (t - t.min()) / t.max()   (max of the *un-shifted* t), per batch.
    # NOTE: matches the reference exactly; degenerate t.max() == 0 would inf/NaN there too.
    tn = (ts - ts.min(axis=1, keepdims=True)) / ts.max(axis=1, keepdims=True)

    # Spatial flat index x + W*y (the bin offset W*H*i is applied in-kernel via the
    # output row).  torch .long() truncates; astype(int32) does too.
    idx_sp = (xs + W * ys).astype(jnp.int32)

    # Tile the sample axis lane-dense; pad with tn=0 (value contribution 0) and
    # idx=-1 (one-hot row of zeros).  Out-of-range x/y are likewise dropped by the
    # in-kernel one-hot (the torch reference would error on such indices).
    tm = min(4096, _round_up(max(N, 1), 128))
    NT = -(-N // tm)
    Mp = NT * tm
    tn_tiles = (jnp.zeros((B, Mp), jnp.float32).at[:, :N].set(tn)
                .reshape(B, NT, 1, tm))
    idx_tiles = (jnp.full((B, Mp), -1, jnp.int32).at[:, :N].set(idx_sp)
                 .reshape(B, NT, tm, 1))

    # One fused Pallas call: per-bin MLP + one-hot scatter-add into (B, C, H*W).
    per_batch = fused_mlp_scatter(tn_tiles, idx_tiles, mlp_params, C, HW)

    # The reference never resets `vox` between batches, so batch b's grid contains all
    # previous batches' events -> prefix-sum over the batch axis (tiny, done in XLA).
    all_vox = jnp.cumsum(per_batch, axis=0)                       # (B, C, HW)

    # Nearest-neighbor selectors (PyTorch mode='nearest': src = floor(dst*in/out)).
    src_r = (jnp.arange(OUT_HW) * H) // OUT_HW
    er = (src_r[:, None] == jnp.arange(H)[None, :]).astype(jnp.float32)       # (416, H)
    src_c = (jnp.arange(OUT_HW) * W) // OUT_HW
    ec = (jnp.arange(W)[:, None] == src_c[None, :]).astype(jnp.float32)       # (W, 416)
    # Fold the 1x1 conv weights into the row selector: erw[c,o,k*H+h] = w[c,k]*er[o,h].
    erw = (conv_w[:, :, None, None] * er[None, None, :, :])      # (Cout, Cin, 416, H)
    erw = jnp.transpose(erw, (0, 2, 1, 3)).reshape(Cout, OUT_HW, C * H)

    vox_flat = all_vox.reshape(B, C * H, W)                       # (B, Cin*H, W)
    return conv_upsample(vox_flat, erw, ec)                       # (B, 3, 416, 416)


if __name__ == "__main__":
    key = jax.random.PRNGKey(0)
    dim = (9, 16, 16)            # (C, H, W); C = 9 to match Conv2d(9, 3, 1)
    B, N = 2, 128
    C, H, W = dim

    kx, ky, kt, kp, kparam = jax.random.split(key, 5)
    ex = jax.random.randint(kx, (B, N), 0, W).astype(jnp.float32)
    ey = jax.random.randint(ky, (B, N), 0, H).astype(jnp.float32)
    et = jax.random.uniform(kt, (B, N), jnp.float32, 0.1, 1.0)
    ep = jnp.where(jax.random.bernoulli(kp, 0.5, (B, N)), 1.0, -1.0)
    events = jnp.stack([ex, ey, et, ep], axis=-1)                 # (B, N, 4) [x,y,t,p]

    mlp_params, conv_w = init_params(kparam)
    fwd = jax.jit(quantization_layer_forward, static_argnums=(3,))
    out = fwd(events, mlp_params, conv_w, dim)
    out = jax.block_until_ready(out)
    assert out.shape == (B, 3, OUT_HW, OUT_HW) and out.dtype == jnp.float32
    assert bool(jnp.all(jnp.isfinite(out)))
    print("KERNEL_OK")
</pallas_src>

<mosaic_0001>
module attributes {stable_mosaic.version = 11 : i64} {
  func.func @kernel(%arg0: i32, %arg1: i32, %arg2: memref<1x1x1x128xf32, #tpu.memory_space<vmem>>, %arg3: memref<1x1x128x1xi32, #tpu.memory_space<vmem>>, %arg4: memref<128x1xf32, #tpu.memory_space<vmem>>, %arg5: memref<128x1xf32, #tpu.memory_space<vmem>>, %arg6: memref<128x128xbf16, #tpu.memory_space<vmem>>, %arg7: memref<128x1xf32, #tpu.memory_space<vmem>>, %arg8: memref<128x1xf32, #tpu.memory_space<vmem>>, %arg9: memref<1x1xf32, #tpu.memory_space<vmem>>, %arg10: memref<1x9x256xf32, #tpu.memory_space<vmem>>, %arg11: memref<9x128xf32, #tpu.memory_space<vmem>>) attributes {dimension_semantics = [#tpu.dimension_semantics<parallel>, #tpu.dimension_semantics<arbitrary>], iteration_bounds = array<i64: 2, 1>, scalar_prefetch = 0 : i64, scratch_operands = 1 : i64, tpu.core_type = #tpu.core_type<tc>, window_params = [{transform_indices = @transform_0, window_bounds = array<i64: 1, 1, 1, 128>}, {transform_indices = @transform_1, window_bounds = array<i64: 1, 1, 128, 1>}, {pipeline_mode = #tpu.pipeline_mode<synchronous>, transform_indices = @transform_2, window_bounds = array<i64: 128, 1>}, {pipeline_mode = #tpu.pipeline_mode<synchronous>, transform_indices = @transform_3, window_bounds = array<i64: 128, 1>}, {pipeline_mode = #tpu.pipeline_mode<synchronous>, transform_indices = @transform_4, window_bounds = array<i64: 128, 128>}, {pipeline_mode = #tpu.pipeline_mode<synchronous>, transform_indices = @transform_5, window_bounds = array<i64: 128, 1>}, {pipeline_mode = #tpu.pipeline_mode<synchronous>, transform_indices = @transform_6, window_bounds = array<i64: 128, 1>}, {pipeline_mode = #tpu.pipeline_mode<synchronous>, transform_indices = @transform_7, window_bounds = array<i64: 1, 1>}, {transform_indices = @transform_8, window_bounds = array<i64: 1, 9, 256>}]} {
    %c0_i32 = arith.constant 0 : i32
    %0 = arith.cmpi eq, %arg1, %c0_i32 : i32
    %1 = arith.extui %0 : i1 to i32
    %c0_i32_0 = arith.constant 0 : i32
    %2 = arith.cmpi ne, %1, %c0_i32_0 : i32
    scf.if %2 {
      %cst_83 = arith.constant 0.000000e+00 : f32
      %227 = vector.broadcast %cst_83 : f32 to vector<1x9x256xf32>
      %c0_84 = arith.constant 0 : index
      %c0_85 = arith.constant 0 : index
      %c0_86 = arith.constant 0 : index
      %228 = vector.load %arg10[%c0_84, %c0_85, %c0_86] : memref<1x9x256xf32, #tpu.memory_space<vmem>>, vector<1x9x256xf32>
      tpu.vector_store %arg10[%c0_84, %c0_85, %c0_86], %227 {strides = array<i32>} : memref<1x9x256xf32, #tpu.memory_space<vmem>>, vector<1x9x256xf32>,
    } else {
    }
    %c0 = arith.constant 0 : index
    %c0_1 = arith.constant 0 : index
    %c0_2 = arith.constant 0 : index
    %c0_3 = arith.constant 0 : index
    %3 = vector.load %arg2[%c0, %c0_1, %c0_2, %c0_3] : memref<1x1x1x128xf32, #tpu.memory_space<vmem>>, vector<1x1x1x128xf32>
    %4 = vector.shape_cast %3 : vector<1x1x1x128xf32> to vector<1x128xf32>
    %c0_4 = arith.constant 0 : index
    %c0_5 = arith.constant 0 : index
    %c0_6 = arith.constant 0 : index
    %c0_7 = arith.constant 0 : index
    %5 = vector.load %arg3[%c0_4, %c0_5, %c0_6, %c0_7] : memref<1x1x128x1xi32, #tpu.memory_space<vmem>>, vector<1x1x128x1xi32>
    %6 = vector.shape_cast %5 : vector<1x1x128x1xi32> to vector<128x1xi32>
    %c0_8 = arith.constant 0 : index
    %c0_9 = arith.constant 0 : index
    %7 = vector.load %arg4[%c0_8, %c0_9] : memref<128x1xf32, #tpu.memory_space<vmem>>, vector<128x1xf32>
    %c0_10 = arith.constant 0 : index
    %c0_11 = arith.constant 0 : index
    %8 = vector.load %arg5[%c0_10, %c0_11] : memref<128x1xf32, #tpu.memory_space<vmem>>, vector<128x1xf32>
    %c0_12 = arith.constant 0 : index
    %c0_13 = arith.constant 0 : index
    %9 = vector.load %arg6[%c0_12, %c0_13] : memref<128x128xbf16, #tpu.memory_space<vmem>>, vector<128x128xbf16>
    %c0_14 = arith.constant 0 : index
    %c0_15 = arith.constant 0 : index
    %10 = vector.load %arg7[%c0_14, %c0_15] : memref<128x1xf32, #tpu.memory_space<vmem>>, vector<128x1xf32>
    %c0_16 = arith.constant 0 : index
    %c0_17 = arith.constant 0 : index
    %11 = vector.load %arg8[%c0_16, %c0_17] : memref<128x1xf32, #tpu.memory_space<vmem>>, vector<128x1xf32>
    %c0_18 = arith.constant 0 : index
    %c0_19 = arith.constant 0 : index
    %12 = vector.load %arg9[%c0_18, %c0_19] : memref<1x1xf32, #tpu.memory_space<vmem>>, vector<1x1xf32>
    %13 = vector.broadcast %7 : vector<128x1xf32> to vector<128x128xf32>
    %14 = vector.broadcast %4 : vector<1x128xf32> to vector<128x128xf32>
    %15 = arith.mulf %13, %14 : vector<128x128xf32>
    %16 = vector.broadcast %8 : vector<128x1xf32> to vector<128x128xf32>
    %17 = arith.addf %15, %16 : vector<128x128xf32>
    %cst = arith.constant 0.000000e+00 : f32
    %18 = vector.broadcast %cst : f32 to vector<128x1xf32>
    %19 = arith.mulf %18, %7 : vector<128x1xf32>
    %20 = vector.broadcast %19 : vector<128x1xf32> to vector<128x128xf32>
    %21 = arith.subf %17, %20 : vector<128x128xf32>
    %cst_20 = arith.constant 1.000000e-01 : f32
    %22 = vector.broadcast %cst_20 : f32 to vector<128x128xf32>
    %23 = arith.mulf %22, %21 : vector<128x128xf32>
    %24 = arith.maximumf %21, %23 : vector<128x128xf32>
    %25 = arith.truncf %24 : vector<128x128xf32> to vector<128x128xbf16>
    %cst_21 = arith.constant dense<0.000000e+00> : vector<128x128xf32>
    %26 = tpu.matmul %9, %25, %cst_21 {dimension_numbers = #tpu.dot_dimension_numbers<[1], [0], [0], [1], [0, 0, 1, 1], [], []>} : vector<128x128xbf16>, vector<128x128xbf16>, vector<128x128xf32> -> vector<128x128xf32>
    %27 = vector.broadcast %10 : vector<128x1xf32> to vector<128x128xf32>
    %28 = arith.addf %26, %27 : vector<128x128xf32>
    %cst_22 = arith.constant 1.000000e-01 : f32
    %29 = vector.broadcast %cst_22 : f32 to vector<128x128xf32>
    %30 = arith.mulf %29, %28 : vector<128x128xf32>
    %31 = arith.maximumf %28, %30 : vector<128x128xf32>
    %32 = vector.broadcast %11 : vector<128x1xf32> to vector<128x128xf32>
    %33 = arith.mulf %32, %31 : vector<128x128xf32>
    %cst_23 = arith.constant dense<0.000000e+00> : vector<128xf32>
    %34 = vector.multi_reduction <add>, %33, %cst_23 [0] : vector<128x128xf32> to vector<128xf32>
    %35 = vector.shape_cast %34 : vector<128xf32> to vector<1x128xf32>
    %36 = vector.broadcast %12 : vector<1x1xf32> to vector<1x128xf32>
    %37 = arith.addf %35, %36 : vector<1x128xf32>
    %38 = arith.mulf %4, %37 : vector<1x128xf32>
    %c0_24 = arith.constant 0 : index
    %c0_25 = arith.constant 0 : index
    %39 = vector.load %arg11[%c0_24, %c0_25] : memref<9x128xf32, #tpu.memory_space<vmem>>, vector<1x128xf32>
    tpu.vector_store %arg11[%c0_24, %c0_25], %38 {strides = array<i32>} : memref<9x128xf32, #tpu.memory_space<vmem>>, vector<1x128xf32>,
    %cst_26 = arith.constant 1.250000e-01 : f32
    %40 = vector.broadcast %cst_26 : f32 to vector<128x1xf32>
    %41 = arith.mulf %40, %7 : vector<128x1xf32>
    %42 = vector.broadcast %41 : vector<128x1xf32> to vector<128x128xf32>
    %43 = arith.subf %17, %42 : vector<128x128xf32>
    %cst_27 = arith.constant 1.000000e-01 : f32
    %44 = vector.broadcast %cst_27 : f32 to vector<128x128xf32>
    %45 = arith.mulf %44, %43 : vector<128x128xf32>
    %46 = arith.maximumf %43, %45 : vector<128x128xf32>
    %47 = arith.truncf %46 : vector<128x128xf32> to vector<128x128xbf16>
    %cst_28 = arith.constant dense<0.000000e+00> : vector<128x128xf32>
    %48 = tpu.matmul %9, %47, %cst_28 {dimension_numbers = #tpu.dot_dimension_numbers<[1], [0], [0], [1], [0, 0, 1, 1], [], []>} : vector<128x128xbf16>, vector<128x128xbf16>, vector<128x128xf32> -> vector<128x128xf32>
    %49 = vector.broadcast %10 : vector<128x1xf32> to vector<128x128xf32>
    %50 = arith.addf %48, %49 : vector<128x128xf32>
    %cst_29 = arith.constant 1.000000e-01 : f32
    %51 = vector.broadcast %cst_29 : f32 to vector<128x128xf32>
    %52 = arith.mulf %51, %50 : vector<128x128xf32>
    %53 = arith.maximumf %50, %52 : vector<128x128xf32>
    %54 = vector.broadcast %11 : vector<128x1xf32> to vector<128x128xf32>
    %55 = arith.mulf %54, %53 : vector<128x128xf32>
    %cst_30 = arith.constant dense<0.000000e+00> : vector<128xf32>
    %56 = vector.multi_reduction <add>, %55, %cst_30 [0] : vector<128x128xf32> to vector<128xf32>
    %57 = vector.shape_cast %56 : vector<128xf32> to vector<1x128xf32>
    %58 = vector.broadcast %12 : vector<1x1xf32> to vector<1x128xf32>
    %59 = arith.addf %57, %58 : vector<1x128xf32>
    %60 = arith.mulf %4, %59 : vector<1x128xf32>
    %c1 = arith.constant 1 : index
    %c0_31 = arith.constant 0 : index
    %61 = vector.load %arg11[%c1, %c0_31] : memref<9x128xf32, #tpu.memory_space<vmem>>, vector<1x128xf32>
    tpu.vector_store %arg11[%c1, %c0_31], %60 {strides = array<i32>} : memref<9x128xf32, #tpu.memory_space<vmem>>, vector<1x128xf32>,
    %cst_32 = arith.constant 2.500000e-01 : f32
    %62 = vector.broadcast %cst_32 : f32 to vector<128x1xf32>
    %63 = arith.mulf %62, %7 : vector<128x1xf32>
    %64 = vector.broadcast %63 : vector<128x1xf32> to vector<128x128xf32>
    %65 = arith.subf %17, %64 : vector<128x128xf32>
    %cst_33 = arith.constant 1.000000e-01 : f32
    %66 = vector.broadcast %cst_33 : f32 to vector<128x128xf32>
    %67 = arith.mulf %66, %65 : vector<128x128xf32>
    %68 = arith.maximumf %65, %67 : vector<128x128xf32>
    %69 = arith.truncf %68 : vector<128x128xf32> to vector<128x128xbf16>
    %cst_34 = arith.constant dense<0.000000e+00> : vector<128x128xf32>
    %70 = tpu.matmul %9, %69, %cst_34 {dimension_numbers = #tpu.dot_dimension_numbers<[1], [0], [0], [1], [0, 0, 1, 1], [], []>} : vector<128x128xbf16>, vector<128x128xbf16>, vector<128x128xf32> -> vector<128x128xf32>
    %71 = vector.broadcast %10 : vector<128x1xf32> to vector<128x128xf32>
    %72 = arith.addf %70, %71 : vector<128x128xf32>
    %cst_35 = arith.constant 1.000000e-01 : f32
    %73 = vector.broadcast %cst_35 : f32 to vector<128x128xf32>
    %74 = arith.mulf %73, %72 : vector<128x128xf32>
    %75 = arith.maximumf %72, %74 : vector<128x128xf32>
    %76 = vector.broadcast %11 : vector<128x1xf32> to vector<128x128xf32>
    %77 = arith.mulf %76, %75 : vector<128x128xf32>
    %cst_36 = arith.constant dense<0.000000e+00> : vector<128xf32>
    %78 = vector.multi_reduction <add>, %77, %cst_36 [0] : vector<128x128xf32> to vector<128xf32>
    %79 = vector.shape_cast %78 : vector<128xf32> to vector<1x128xf32>
    %80 = vector.broadcast %12 : vector<1x1xf32> to vector<1x128xf32>
    %81 = arith.addf %79, %80 : vector<1x128xf32>
    %82 = arith.mulf %4, %81 : vector<1x128xf32>
    %c2 = arith.constant 2 : index
    %c0_37 = arith.constant 0 : index
    %83 = vector.load %arg11[%c2, %c0_37] : memref<9x128xf32, #tpu.memory_space<vmem>>, vector<1x128xf32>
    tpu.vector_store %arg11[%c2, %c0_37], %82 {strides = array<i32>} : memref<9x128xf32, #tpu.memory_space<vmem>>, vector<1x128xf32>,
    %cst_38 = arith.constant 3.750000e-01 : f32
    %84 = vector.broadcast %cst_38 : f32 to vector<128x1xf32>
    %85 = arith.mulf %84, %7 : vector<128x1xf32>
    %86 = vector.broadcast %85 : vector<128x1xf32> to vector<128x128xf32>
    %87 = arith.subf %17, %86 : vector<128x128xf32>
    %cst_39 = arith.constant 1.000000e-01 : f32
    %88 = vector.broadcast %cst_39 : f32 to vector<128x128xf32>
    %89 = arith.mulf %88, %87 : vector<128x128xf32>
    %90 = arith.maximumf %87, %89 : vector<128x128xf32>
    %91 = arith.truncf %90 : vector<128x128xf32> to vector<128x128xbf16>
    %cst_40 = arith.constant dense<0.000000e+00> : vector<128x128xf32>
    %92 = tpu.matmul %9, %91, %cst_40 {dimension_numbers = #tpu.dot_dimension_numbers<[1], [0], [0], [1], [0, 0, 1, 1], [], []>} : vector<128x128xbf16>, vector<128x128xbf16>, vector<128x128xf32> -> vector<128x128xf32>
    %93 = vector.broadcast %10 : vector<128x1xf32> to vector<128x128xf32>
    %94 = arith.addf %92, %93 : vector<128x128xf32>
    %cst_41 = arith.constant 1.000000e-01 : f32
    %95 = vector.broadcast %cst_41 : f32 to vector<128x128xf32>
    %96 = arith.mulf %95, %94 : vector<128x128xf32>
    %97 = arith.maximumf %94, %96 : vector<128x128xf32>
    %98 = vector.broadcast %11 : vector<128x1xf32> to vector<128x128xf32>
    %99 = arith.mulf %98, %97 : vector<128x128xf32>
    %cst_42 = arith.constant dense<0.000000e+00> : vector<128xf32>
    %100 = vector.multi_reduction <add>, %99, %cst_42 [0] : vector<128x128xf32> to vector<128xf32>
    %101 = vector.shape_cast %100 : vector<128xf32> to vector<1x128xf32>
    %102 = vector.broadcast %12 : vector<1x1xf32> to vector<1x128xf32>
    %103 = arith.addf %101, %102 : vector<1x128xf32>
    %104 = arith.mulf %4, %103 : vector<1x128xf32>
    %c3 = arith.constant 3 : index
    %c0_43 = arith.constant 0 : index
    %105 = vector.load %arg11[%c3, %c0_43] : memref<9x128xf32, #tpu.memory_space<vmem>>, vector<1x128xf32>
    tpu.vector_store %arg11[%c3, %c0_43], %104 {strides = array<i32>} : memref<9x128xf32, #tpu.memory_space<vmem>>, vector<1x128xf32>,
    %cst_44 = arith.constant 5.000000e-01 : f32
    %106 = vector.broadcast %cst_44 : f32 to vector<128x1xf32>
    %107 = arith.mulf %106, %7 : vector<128x1xf32>
    %108 = vector.broadcast %107 : vector<128x1xf32> to vector<128x128xf32>
    %109 = arith.subf %17, %108 : vector<128x128xf32>
    %cst_45 = arith.constant 1.000000e-01 : f32
    %110 = vector.broadcast %cst_45 : f32 to vector<128x128xf32>
    %111 = arith.mulf %110, %109 : vector<128x128xf32>
    %112 = arith.maximumf %109, %111 : vector<128x128xf32>
    %113 = arith.truncf %112 : vector<128x128xf32> to vector<128x128xbf16>
    %cst_46 = arith.constant dense<0.000000e+00> : vector<128x128xf32>
    %114 = tpu.matmul %9, %113, %cst_46 {dimension_numbers = #tpu.dot_dimension_numbers<[1], [0], [0], [1], [0, 0, 1, 1], [], []>} : vector<128x128xbf16>, vector<128x128xbf16>, vector<128x128xf32> -> vector<128x128xf32>
    %115 = vector.broadcast %10 : vector<128x1xf32> to vector<128x128xf32>
    %116 = arith.addf %114, %115 : vector<128x128xf32>
    %cst_47 = arith.constant 1.000000e-01 : f32
    %117 = vector.broadcast %cst_47 : f32 to vector<128x128xf32>
    %118 = arith.mulf %117, %116 : vector<128x128xf32>
    %119 = arith.maximumf %116, %118 : vector<128x128xf32>
    %120 = vector.broadcast %11 : vector<128x1xf32> to vector<128x128xf32>
    %121 = arith.mulf %120, %119 : vector<128x128xf32>
    %cst_48 = arith.constant dense<0.000000e+00> : vector<128xf32>
    %122 = vector.multi_reduction <add>, %121, %cst_48 [0] : vector<128x128xf32> to vector<128xf32>
    %123 = vector.shape_cast %122 : vector<128xf32> to vector<1x128xf32>
    %124 = vector.broadcast %12 : vector<1x1xf32> to vector<1x128xf32>
    %125 = arith.addf %123, %124 : vector<1x128xf32>
    %126 = arith.mulf %4, %125 : vector<1x128xf32>
    %c4 = arith.constant 4 : index
    %c0_49 = arith.constant 0 : index
    %127 = vector.load %arg11[%c4, %c0_49] : memref<9x128xf32, #tpu.memory_space<vmem>>, vector<1x128xf32>
    tpu.vector_store %arg11[%c4, %c0_49], %126 {strides = array<i32>} : memref<9x128xf32, #tpu.memory_space<vmem>>, vector<1x128xf32>,
    %cst_50 = arith.constant 6.250000e-01 : f32
    %128 = vector.broadcast %cst_50 : f32 to vector<128x1xf32>
    %129 = arith.mulf %128, %7 : vector<128x1xf32>
    %130 = vector.broadcast %129 : vector<128x1xf32> to vector<128x128xf32>
    %131 = arith.subf %17, %130 : vector<128x128xf32>
    %cst_51 = arith.constant 1.000000e-01 : f32
    %132 = vector.broadcast %cst_51 : f32 to vector<128x128xf32>
    %133 = arith.mulf %132, %131 : vector<128x128xf32>
    %134 = arith.maximumf %131, %133 : vector<128x128xf32>
    %135 = arith.truncf %134 : vector<128x128xf32> to vector<128x128xbf16>
    %cst_52 = arith.constant dense<0.000000e+00> : vector<128x128xf32>
    %136 = tpu.matmul %9, %135, %cst_52 {dimension_numbers = #tpu.dot_dimension_numbers<[1], [0], [0], [1], [0, 0, 1, 1], [], []>} : vector<128x128xbf16>, vector<128x128xbf16>, vector<128x128xf32> -> vector<128x128xf32>
    %137 = vector.broadcast %10 : vector<128x1xf32> to vector<128x128xf32>
    %138 = arith.addf %136, %137 : vector<128x128xf32>
    %cst_53 = arith.constant 1.000000e-01 : f32
    %139 = vector.broadcast %cst_53 : f32 to vector<128x128xf32>
    %140 = arith.mulf %139, %138 : vector<128x128xf32>
    %141 = arith.maximumf %138, %140 : vector<128x128xf32>
    %142 = vector.broadcast %11 : vector<128x1xf32> to vector<128x128xf32>
    %143 = arith.mulf %142, %141 : vector<128x128xf32>
    %cst_54 = arith.constant dense<0.000000e+00> : vector<128xf32>
    %144 = vector.multi_reduction <add>, %143, %cst_54 [0] : vector<128x128xf32> to vector<128xf32>
    %145 = vector.shape_cast %144 : vector<128xf32> to vector<1x128xf32>
    %146 = vector.broadcast %12 : vector<1x1xf32> to vector<1x128xf32>
    %147 = arith.addf %145, %146 : vector<1x128xf32>
    %148 = arith.mulf %4, %147 : vector<1x128xf32>
    %c5 = arith.constant 5 : index
    %c0_55 = arith.constant 0 : index
    %149 = vector.load %arg11[%c5, %c0_55] : memref<9x128xf32, #tpu.memory_space<vmem>>, vector<1x128xf32>
    tpu.vector_store %arg11[%c5, %c0_55], %148 {strides = array<i32>} : memref<9x128xf32, #tpu.memory_space<vmem>>, vector<1x128xf32>,
    %cst_56 = arith.constant 7.500000e-01 : f32
    %150 = vector.broadcast %cst_56 : f32 to vector<128x1xf32>
    %151 = arith.mulf %150, %7 : vector<128x1xf32>
    %152 = vector.broadcast %151 : vector<128x1xf32> to vector<128x128xf32>
    %153 = arith.subf %17, %152 : vector<128x128xf32>
    %cst_57 = arith.constant 1.000000e-01 : f32
    %154 = vector.broadcast %cst_57 : f32 to vector<128x128xf32>
    %155 = arith.mulf %154, %153 : vector<128x128xf32>
    %156 = arith.maximumf %153, %155 : vector<128x128xf32>
    %157 = arith.truncf %156 : vector<128x128xf32> to vector<128x128xbf16>
    %cst_58 = arith.constant dense<0.000000e+00> : vector<128x128xf32>
    %158 = tpu.matmul %9, %157, %cst_58 {dimension_numbers = #tpu.dot_dimension_numbers<[1], [0], [0], [1], [0, 0, 1, 1], [], []>} : vector<128x128xbf16>, vector<128x128xbf16>, vector<128x128xf32> -> vector<128x128xf32>
    %159 = vector.broadcast %10 : vector<128x1xf32> to vector<128x128xf32>
    %160 = arith.addf %158, %159 : vector<128x128xf32>
    %cst_59 = arith.constant 1.000000e-01 : f32
    %161 = vector.broadcast %cst_59 : f32 to vector<128x128xf32>
    %162 = arith.mulf %161, %160 : vector<128x128xf32>
    %163 = arith.maximumf %160, %162 : vector<128x128xf32>
    %164 = vector.broadcast %11 : vector<128x1xf32> to vector<128x128xf32>
    %165 = arith.mulf %164, %163 : vector<128x128xf32>
    %cst_60 = arith.constant dense<0.000000e+00> : vector<128xf32>
    %166 = vector.multi_reduction <add>, %165, %cst_60 [0] : vector<128x128xf32> to vector<128xf32>
    %167 = vector.shape_cast %166 : vector<128xf32> to vector<1x128xf32>
    %168 = vector.broadcast %12 : vector<1x1xf32> to vector<1x128xf32>
    %169 = arith.addf %167, %168 : vector<1x128xf32>
    %170 = arith.mulf %4, %169 : vector<1x128xf32>
    %c6 = arith.constant 6 : index
    %c0_61 = arith.constant 0 : index
    %171 = vector.load %arg11[%c6, %c0_61] : memref<9x128xf32, #tpu.memory_space<vmem>>, vector<1x128xf32>
    tpu.vector_store %arg11[%c6, %c0_61], %170 {strides = array<i32>} : memref<9x128xf32, #tpu.memory_space<vmem>>, vector<1x128xf32>,
    %cst_62 = arith.constant 8.750000e-01 : f32
    %172 = vector.broadcast %cst_62 : f32 to vector<128x1xf32>
    %173 = arith.mulf %172, %7 : vector<128x1xf32>
    %174 = vector.broadcast %173 : vector<128x1xf32> to vector<128x128xf32>
    %175 = arith.subf %17, %174 : vector<128x128xf32>
    %cst_63 = arith.constant 1.000000e-01 : f32
    %176 = vector.broadcast %cst_63 : f32 to vector<128x128xf32>
    %177 = arith.mulf %176, %175 : vector<128x128xf32>
    %178 = arith.maximumf %175, %177 : vector<128x128xf32>
    %179 = arith.truncf %178 : vector<128x128xf32> to vector<128x128xbf16>
    %cst_64 = arith.constant dense<0.000000e+00> : vector<128x128xf32>
    %180 = tpu.matmul %9, %179, %cst_64 {dimension_numbers = #tpu.dot_dimension_numbers<[1], [0], [0], [1], [0, 0, 1, 1], [], []>} : vector<128x128xbf16>, vector<128x128xbf16>, vector<128x128xf32> -> vector<128x128xf32>
    %181 = vector.broadcast %10 : vector<128x1xf32> to vector<128x128xf32>
    %182 = arith.addf %180, %181 : vector<128x128xf32>
    %cst_65 = arith.constant 1.000000e-01 : f32
    %183 = vector.broadcast %cst_65 : f32 to vector<128x128xf32>
    %184 = arith.mulf %183, %182 : vector<128x128xf32>
    %185 = arith.maximumf %182, %184 : vector<128x128xf32>
    %186 = vector.broadcast %11 : vector<128x1xf32> to vector<128x128xf32>
    %187 = arith.mulf %186, %185 : vector<128x128xf32>
    %cst_66 = arith.constant dense<0.000000e+00> : vector<128xf32>
    %188 = vector.multi_reduction <add>, %187, %cst_66 [0] : vector<128x128xf32> to vector<128xf32>
    %189 = vector.shape_cast %188 : vector<128xf32> to vector<1x128xf32>
    %190 = vector.broadcast %12 : vector<1x1xf32> to vector<1x128xf32>
    %191 = arith.addf %189, %190 : vector<1x128xf32>
    %192 = arith.mulf %4, %191 : vector<1x128xf32>
    %c7 = arith.constant 7 : index
    %c0_67 = arith.constant 0 : index
    %193 = vector.load %arg11[%c7, %c0_67] : memref<9x128xf32, #tpu.memory_space<vmem>>, vector<1x128xf32>
    tpu.vector_store %arg11[%c7, %c0_67], %192 {strides = array<i32>} : memref<9x128xf32, #tpu.memory_space<vmem>>, vector<1x128xf32>,
    %cst_68 = arith.constant 1.000000e+00 : f32
    %194 = vector.broadcast %cst_68 : f32 to vector<128x1xf32>
    %195 = arith.mulf %194, %7 : vector<128x1xf32>
    %196 = vector.broadcast %195 : vector<128x1xf32> to vector<128x128xf32>
    %197 = arith.subf %17, %196 : vector<128x128xf32>
    %cst_69 = arith.constant 1.000000e-01 : f32
    %198 = vector.broadcast %cst_69 : f32 to vector<128x128xf32>
    %199 = arith.mulf %198, %197 : vector<128x128xf32>
    %200 = arith.maximumf %197, %199 : vector<128x128xf32>
    %201 = arith.truncf %200 : vector<128x128xf32> to vector<128x128xbf16>
    %cst_70 = arith.constant dense<0.000000e+00> : vector<128x128xf32>
    %202 = tpu.matmul %9, %201, %cst_70 {dimension_numbers = #tpu.dot_dimension_numbers<[1], [0], [0], [1], [0, 0, 1, 1], [], []>} : vector<128x128xbf16>, vector<128x128xbf16>, vector<128x128xf32> -> vector<128x128xf32>
    %203 = vector.broadcast %10 : vector<128x1xf32> to vector<128x128xf32>
    %204 = arith.addf %202, %203 : vector<128x128xf32>
    %cst_71 = arith.constant 1.000000e-01 : f32
    %205 = vector.broadcast %cst_71 : f32 to vector<128x128xf32>
    %206 = arith.mulf %205, %204 : vector<128x128xf32>
    %207 = arith.maximumf %204, %206 : vector<128x128xf32>
    %208 = vector.broadcast %11 : vector<128x1xf32> to vector<128x128xf32>
    %209 = arith.mulf %208, %207 : vector<128x128xf32>
    %cst_72 = arith.constant dense<0.000000e+00> : vector<128xf32>
    %210 = vector.multi_reduction <add>, %209, %cst_72 [0] : vector<128x128xf32> to vector<128xf32>
    %211 = vector.shape_cast %210 : vector<128xf32> to vector<1x128xf32>
    %212 = vector.broadcast %12 : vector<1x1xf32> to vector<1x128xf32>
    %213 = arith.addf %211, %212 : vector<1x128xf32>
    %214 = arith.mulf %4, %213 : vector<1x128xf32>
    %c8 = arith.constant 8 : index
    %c0_73 = arith.constant 0 : index
    %215 = vector.load %arg11[%c8, %c0_73] : memref<9x128xf32, #tpu.memory_space<vmem>>, vector<1x128xf32>
    tpu.vector_store %arg11[%c8, %c0_73], %214 {strides = array<i32>} : memref<9x128xf32, #tpu.memory_space<vmem>>, vector<1x128xf32>,
    %216 = tpu.iota {dimensions = array<i32: 1>} : vector<128x256xi32>
    %217 = vector.broadcast %6 : vector<128x1xi32> to vector<128x256xi32>
    %218 = arith.cmpi eq, %217, %216 : vector<128x256xi32>
    %219 = arith.extui %218 : vector<128x256xi1> to vector<128x256xi32>
    %220 = arith.sitofp %219 : vector<128x256xi32> to vector<128x256xf32>
    %c0_74 = arith.constant 0 : index
    %c0_75 = arith.constant 0 : index
    %c0_76 = arith.constant 0 : index
    %221 = vector.load %arg10[%c0_74, %c0_75, %c0_76] : memref<1x9x256xf32, #tpu.memory_space<vmem>>, vector<1x9x256xf32>
    %c0_77 = arith.constant 0 : index
    %c0_78 = arith.constant 0 : index
    %222 = vector.load %arg11[%c0_77, %c0_78] : memref<9x128xf32, #tpu.memory_space<vmem>>, vector<9x128xf32>
    %cst_79 = arith.constant dense<0.000000e+00> : vector<9x256xf32>
    %223 = tpu.matmul %222, %220, %cst_79 {dimension_numbers = #tpu.dot_dimension_numbers<[1], [0], [0], [1], [0, 0, 1, 1], [], []>} : vector<9x128xf32>, vector<128x256xf32>, vector<9x256xf32> -> vector<9x256xf32>
    %224 = vector.shape_cast %223 : vector<9x256xf32> to vector<1x9x256xf32>
    %225 = arith.addf %221, %224 : vector<1x9x256xf32>
    %c0_80 = arith.constant 0 : index
    %c0_81 = arith.constant 0 : index
    %c0_82 = arith.constant 0 : index
    %226 = vector.load %arg10[%c0_80, %c0_81, %c0_82] : memref<1x9x256xf32, #tpu.memory_space<vmem>>, vector<1x9x256xf32>
    tpu.vector_store %arg10[%c0_80, %c0_81, %c0_82], %225 {strides = array<i32>} : memref<1x9x256xf32, #tpu.memory_space<vmem>>, vector<1x9x256xf32>,
    return
  }
  func.func @transform_0(%arg0: i32, %arg1: i32) -> (i32, i32, i32, i32) {
    %c0_i32 = arith.constant 0 : i32
    %c0_i32_0 = arith.constant 0 : i32
    %c0_i32_1 = arith.constant 0 : i32
    return %arg0, %arg1, %c0_i32, %c0_i32_0 : i32, i32, i32, i32
  }
  func.func @transform_1(%arg0: i32, %arg1: i32) -> (i32, i32, i32, i32) {
    %c0_i32 = arith.constant 0 : i32
    %c0_i32_0 = arith.constant 0 : i32
    %c0_i32_1 = arith.constant 0 : i32
    return %arg0, %arg1, %c0_i32, %c0_i32_0 : i32, i32, i32, i32
  }
  func.func @transform_2(%arg0: i32, %arg1: i32) -> (i32, i32) {
    %c0_i32 = arith.constant 0 : i32
    %c0_i32_0 = arith.constant 0 : i32
    %c0_i32_1 = arith.constant 0 : i32
    return %c0_i32, %c0_i32_0 : i32, i32
  }
  func.func @transform_3(%arg0: i32, %arg1: i32) -> (i32, i32) {
    %c0_i32 = arith.constant 0 : i32
    %c0_i32_0 = arith.constant 0 : i32
    %c0_i32_1 = arith.constant 0 : i32
    return %c0_i32, %c0_i32_0 : i32, i32
  }
  func.func @transform_4(%arg0: i32, %arg1: i32) -> (i32, i32) {
    %c0_i32 = arith.constant 0 : i32
    %c0_i32_0 = arith.constant 0 : i32
    %c0_i32_1 = arith.constant 0 : i32
    return %c0_i32, %c0_i32_0 : i32, i32
  }
  func.func @transform_5(%arg0: i32, %arg1: i32) -> (i32, i32) {
    %c0_i32 = arith.constant 0 : i32
    %c0_i32_0 = arith.constant 0 : i32
    %c0_i32_1 = arith.constant 0 : i32
    return %c0_i32, %c0_i32_0 : i32, i32
  }
  func.func @transform_6(%arg0: i32, %arg1: i32) -> (i32, i32) {
    %c0_i32 = arith.constant 0 : i32
    %c0_i32_0 = arith.constant 0 : i32
    %c0_i32_1 = arith.constant 0 : i32
    return %c0_i32, %c0_i32_0 : i32, i32
  }
  func.func @transform_7(%arg0: i32, %arg1: i32) -> (i32, i32) {
    %c0_i32 = arith.constant 0 : i32
    %c0_i32_0 = arith.constant 0 : i32
    %c0_i32_1 = arith.constant 0 : i32
    return %c0_i32, %c0_i32_0 : i32, i32
  }
  func.func @transform_8(%arg0: i32, %arg1: i32) -> (i32, i32, i32) {
    %c0_i32 = arith.constant 0 : i32
    %c0_i32_0 = arith.constant 0 : i32
    %c0_i32_1 = arith.constant 0 : i32
    return %arg0, %c0_i32, %c0_i32_0 : i32, i32, i32
  }
}

module attributes {stable_mosaic.version = 11 : i64} {
  func.func @_conv_up_kernel(%arg0: i32, %arg1: i32, %arg2: memref<1x144x16xf32, #tpu.memory_space<vmem>>, %arg3: memref<1x416x144xf32, #tpu.memory_space<vmem>>, %arg4: memref<16x416xf32, #tpu.memory_space<vmem>>, %arg5: memref<1x1x416x416xf32, #tpu.memory_space<vmem>>) attributes {dimension_semantics = [#tpu.dimension_semantics<parallel>, #tpu.dimension_semantics<parallel>], iteration_bounds = array<i64: 2, 3>, scalar_prefetch = 0 : i64, scratch_operands = 0 : i64, tpu.core_type = #tpu.core_type<tc>, window_params = [{transform_indices = @transform_0, window_bounds = array<i64: 1, 144, 16>}, {transform_indices = @transform_1, window_bounds = array<i64: 1, 416, 144>}, {pipeline_mode = #tpu.pipeline_mode<synchronous>, transform_indices = @transform_2, window_bounds = array<i64: 16, 416>}, {transform_indices = @transform_3, window_bounds = array<i64: 1, 1, 416, 416>}]} {
    %c0 = arith.constant 0 : index
    %c0_0 = arith.constant 0 : index
    %c0_1 = arith.constant 0 : index
    %0 = vector.load %arg3[%c0, %c0_0, %c0_1] : memref<1x416x144xf32, #tpu.memory_space<vmem>>, vector<1x416x144xf32>
    %1 = vector.shape_cast %0 : vector<1x416x144xf32> to vector<416x144xf32>
    %c0_2 = arith.constant 0 : index
    %c0_3 = arith.constant 0 : index
    %c0_4 = arith.constant 0 : index
    %2 = vector.load %arg2[%c0_2, %c0_3, %c0_4] : memref<1x144x16xf32, #tpu.memory_space<vmem>>, vector<1x144x16xf32>
    %3 = vector.shape_cast %2 : vector<1x144x16xf32> to vector<144x16xf32>
    %cst = arith.constant dense<0.000000e+00> : vector<416x16xf32>
    %4 = tpu.matmul %1, %3, %cst {dimension_numbers = #tpu.dot_dimension_numbers<[1], [0], [0], [1], [0, 0, 1, 1], [], []>} : vector<416x144xf32>, vector<144x16xf32>, vector<416x16xf32> -> vector<416x16xf32>
    %c0_5 = arith.constant 0 : index
    %c0_6 = arith.constant 0 : index
    %5 = vector.load %arg4[%c0_5, %c0_6] : memref<16x416xf32, #tpu.memory_space<vmem>>, vector<16x416xf32>
    %cst_7 = arith.constant dense<0.000000e+00> : vector<416x416xf32>
    %6 = tpu.matmul %4, %5, %cst_7 {dimension_numbers = #tpu.dot_dimension_numbers<[1], [0], [0], [1], [0, 0, 1, 1], [], []>} : vector<416x16xf32>, vector<16x416xf32>, vector<416x416xf32> -> vector<416x416xf32>
    %c0_8 = arith.constant 0 : index
    %c0_9 = arith.constant 0 : index
    %c0_10 = arith.constant 0 : index
    %c0_11 = arith.constant 0 : index
    %7 = vector.load %arg5[%c0_8, %c0_9, %c0_10, %c0_11] : memref<1x1x416x416xf32, #tpu.memory_space<vmem>>, vector<1x1x416x416xf32>
    %8 = vector.shape_cast %7 : vector<1x1x416x416xf32> to vector<416x416xf32>
    %9 = vector.shape_cast %6 : vector<416x416xf32> to vector<1x1x416x416xf32>
    tpu.vector_store %arg5[%c0_8, %c0_9, %c0_10, %c0_11], %9 {strides = array<i32>} : memref<1x1x416x416xf32, #tpu.memory_space<vmem>>, vector<1x1x416x416xf32>,
    return
  }
  func.func @transform_0(%arg0: i32, %arg1: i32) -> (i32, i32, i32) {
    %c0_i32 = arith.constant 0 : i32
    %c0_i32_0 = arith.constant 0 : i32
    %c0_i32_1 = arith.constant 0 : i32
    return %arg0, %c0_i32, %c0_i32_0 : i32, i32, i32
  }
  func.func @transform_1(%arg0: i32, %arg1: i32) -> (i32, i32, i32) {
    %c0_i32 = arith.constant 0 : i32
    %c0_i32_0 = arith.constant 0 : i32
    %c0_i32_1 = arith.constant 0 : i32
    return %arg1, %c0_i32, %c0_i32_0 : i32, i32, i32
  }
  func.func @transform_2(%arg0: i32, %arg1: i32) -> (i32, i32) {
    %c0_i32 = arith.constant 0 : i32
    %c0_i32_0 = arith.constant 0 : i32
    %c0_i32_1 = arith.constant 0 : i32
    return %c0_i32, %c0_i32_0 : i32, i32
  }
  func.func @transform_3(%arg0: i32, %arg1: i32) -> (i32, i32, i32, i32) {
    %c0_i32 = arith.constant 0 : i32
    %c0_i32_0 = arith.constant 0 : i32
    %c0_i32_1 = arith.constant 0 : i32
    return %arg0, %arg1, %c0_i32, %c0_i32_0 : i32, i32, i32, i32
  }
}

</mosaic_0001>

<bundles_post_ra>
// kernel: quantization_layer_forward.3
= control target key start
LH: loop header
LB: loop body
LE: loop exit
PB: predicated region body
PF: predicated region fallthrough
CT: control target
= control target key end

     0   :  { %8 = vsyncpa [#allocation3], 0  ;;  %s3470_s0 = inlined_call_operand.vmem [shape: f32[2,144,16], index: 0, kind: input, shape index: {}]   ;;  %s3471_s1 = inlined_call_operand.vmem [shape: f32[3,416,144], index: 1, kind: input, shape index: {}]   ;;  %s3472_s2 = inlined_call_operand.vmem [shape: f32[16,416], index: 2, kind: input, shape index: {}]   ;;  %s3473_s3 = inlined_call_operand.hbm [shape: f32[2,3,416,416], index: 3, kind: output, shape index: {}]  }
   0x1   :  { %10 = vsyncpa [#allocation3 + $0x1], 0  ;;  %s2442_s12 = smov 0   ;;  %s2444_s13 = smov 0  }
   0x2   :  { %s2446_s14 = smov 0   ;;  %s2448_s15 = smov 0  }
   0x3   :  { %s2450_s16 = smov 0   ;;  %s2452_s17 = smov 0  }
   0x4   :  { %s2454_s18 = smov 0   ;;  %s2456_s19 = smov 0  }
   0x5 LB: > { %s2038_s20 = sadd.s32 4294967295, %s2415_s19   ;;  %s2039_s21 = sadd.s32 4294967294, %s2415_s19   ;;  %s2415_s19 = sphi %s2456_s19, %s16_s19   ;;  %s2411_s18 = sphi %s2454_s18, %s3482_s18   ;;  %s2407_s17 = sphi %s2452_s17, %s3481_s17   ;;  %s2403_s16 = sphi %s2450_s16, %s3480_s16   ;;  %s2399_s15 = sphi %s2448_s15, %s3479_s15   ;;  %s2395_s14 = sphi %s2446_s14, %s3478_s14   ;;  %s2391_s13 = sphi %s2444_s13, %s3477_s13   ;;  %s2387_s12 = sphi %s2442_s12, %s3476_s12  }
   0x6   : > { %s25_s22 = sadd.s32 1, %s2407_s17  ;;  %s28_s23 = sadd.s32 1, %s2411_s18 }
   0x7   : > { %p26_p0 = scmp.ge.s32.totalorder %s25_s22, 3  ;;  %p120_p1 = scmp.ne.s32.totalorder %s2395_s14, %s2391_s13 }
   0x8   : > { %p121_p2 = scmp.eq.s32.totalorder %s2038_s20, 5  ;;  %p126_p5 = scmp.ne.s32.totalorder %s2391_s13, %s2387_s12 }
   0x9   : > { %s3484_s22 = smov (%p26_p0, %s25_s22), 0  ;;  %s3486_s23 = smov (!%p26_p0, %s28_s23), %s2411_s18 }
   0xa   : > { %s106_s24 = ssub.s32 %s2407_s17, %s3484_s22  ;;  %p2493_p3 = por %p121_p2, %p120_p1 }
   0xb   : > { %p30_p4 = scmp.ge.s32.totalorder %s3486_s23, 2  ;;  %p127_p6 = scmp.eq.s32.totalorder %s2039_s21, 5 }
   0xc   : > { %p2042_p7 = scmp.ge.s32.totalorder %s2415_s19, 1  ;;  %p164_p9 = scmp.lt.s32.totalorder %s2415_s19, 7 }
   0xd   : > { %s3488_s23 = smov (%p30_p4, %s3486_s23), 0  ;;  %p2502_p8 = por %p127_p6, %p126_p5 }
   0xe   : > { %s105_s27 = ssub.s32 %s2411_s18, %s3488_s23  ;;  %s110_s28 = sadd.s32 1, %s2395_s14 }
   0xf   : > { %s107_s29 = sor.u32 %s106_s24, %s105_s27  ;;  %p165_p10 = pnand %p2042_p7, %p164_p9 }
  0x10   : > { %p108_p11 = scmp.eq.s32.totalorder %s107_s29, 0  ;;  %p193_p12 = scmp.lt.s32.totalorder (!%p165_p10), %s2403_s16, 1  ;;  %v2417_v0 = vmov (!%p165_p10), 0.0|0.0   ;;  %vm325_vm0 = vcmask (!%p165_p10), 130048   ;;  %vm1728_vm1 = vcmask (!%p165_p10), 261120  }
  0x11   : > { %168 = sbr.rel (%p165_p10) target bundleno = 919 (0x397), region = 32  ;;  %p198_p13 = scmp.lt.s32.totalorder (!%p165_p10), %s2399_s15, 2  ;;  %2204 = vmatprep.subr.bf16.mxu0 (!%p165_p10), %v2417_v0 }
  0x12   : > { %s2511_s30 = scalar_select %p108_p11, %s2395_s14, %s110_s28  }
  0x13   : > { %s190_s28 = sand.u32 (!%p165_p10), 1, %s2391_s13  }
  0x14   : > { %s2241_s29 = smul.u32 (!%p165_p10), 1664, %s190_s28  ;;  %s3418_s11 = scalar_lea.sflag (!%p165_p10), [#allocation3], %s190_s28 }
  0x18   : > { %s194_s4 = scalar_select %p193_p12, %s2403_s16, 1 }
  0x19   : > { %s199_s5 = scalar_select %p198_p13, %s2399_s15, 2 }
  0x1a   : > { %s2242_s6 = smul.u32 144, %s194_s4  ;;  %s2992_s4 = scalar_lea.vmem [#allocation2], %s2241_s29 }
  0x1b   : > { %s2243_s10 = smul.u32 832, %s199_s5 }
  0x1c   : > { %s2520_s9 = scalar_lea.vmem %s3470_s0, %s2242_s6  ;;  %s2244_s5 = smul.u32 208, %s2399_s15 }
  0x1d   : > { %v307_v1 = vld [vmem:[%s2520_s9] sm:$0xff]  ;;  %v308_v2 = vld [vmem:[%s2520_s9 + $0x8] sm:$0xff]  ;;  %v309_v3 = vld [vmem:[%s2520_s9 + $0x10] sm:$0xff]  ;;  %s2529_s21 = scalar_lea.vmem %s3471_s1, %s2243_s10  ;;  %s2245_s6 = smul.u32 624, %s2403_s16 }
  0x1e   : > { %v2205_v4 = vpack.c.bf16 %v308_v2, %v307_v1  ;;  %v310_v5 = vld [vmem:[%s2520_s9 + $0x18] sm:$0xff]  ;;  %v311_v7 = vld [vmem:[%s2520_s9 + $0x20] sm:$0xff]  ;;  %v312_v8 = vld [vmem:[%s2520_s9 + $0x28] sm:$0xff] }
  0x1f   : > { %v2208_v6 = vpack.c.bf16 %v310_v5, %v309_v3  ;;  %v204_v9 = vld [vmem:[%s2529_s21 + $0x8] sm:$0xff]  ;;  %v2211_v10 = vpack.c.bf16 %v312_v8, %v311_v7  ;;  %v313_v11 = vld [vmem:[%s2520_s9 + $0x30] sm:$0xff]  ;;  %v314_v12 = vld [vmem:[%s2520_s9 + $0x38] sm:$0xff]  ;;  %s1947_s7 = sadd.s32 %s2245_s6, %s2244_s5 }
  0x20   : > { %2206 = vmatpush1.bf16.msra.mxu0 %v2205_v4  ;;  %2045 = vmatprep.mubr.msk.f32.mxu0 %vm325_vm0, %v204_v9  ;;  %v2214_v13 = vpack.c.bf16 %v314_v12, %v313_v11  ;;  %v315_v14 = vld [vmem:[%s2520_s9 + $0x40] sm:$0xff]  ;;  %v316_v15 = vld [vmem:[%s2520_s9 + $0x48] sm:$0xff]  ;;  %v317_v17 = vld [vmem:[%s2520_s9 + $0x50] sm:$0xff]  ;;  %s2201_s8 = sshll.u32 %s1947_s7, 7 }
  0x21   : > { %2207 = vmatprep.subr.bf16.mxu0 %v2417_v0  ;;  %v2217_v16 = vpack.c.bf16 %v316_v15, %v315_v14  ;;  %v318_v18 = vld [vmem:[%s2520_s9 + $0x58] sm:$0xff]  ;;  %v319_v20 = vld [vmem:[%s2520_s9 + $0x60] sm:$0xff]  ;;  %v320_v21 = vld [vmem:[%s2520_s9 + $0x68] sm:$0xff]  ;;  %v2418_v15 = vmov 0.0   ;;  %s3409_s10 = scalar_lea.hbm %s3473_s3, %s2201_s8 }
  0x22   : > { %v2220_v19 = vpack.c.bf16 %v318_v18, %v317_v17  ;;  %v2223_v22 = vpack.c.bf16 %v320_v21, %v319_v20  ;;  %v321_v23 = vld [vmem:[%s2520_s9 + $0x70] sm:$0xff]  ;;  %v322_v24 = vld [vmem:[%s2520_s9 + $0x78] sm:$0xff]  ;;  %v323_v26 = vld [vmem:[%s2520_s9 + $0x80] sm:$0xff]  ;;  %1167 = vmatprep.mubr.f32.mxu1 %v2418_v15 }
  0x23   : > { %v2226_v25 = vpack.c.bf16 %v322_v24, %v321_v23  ;;  %v324_v27 = vld [vmem:[%s2520_s9 + $0x88] sm:$0xff]  ;;  %v203_v29 = vld [vmem:[%s2529_s21] sm:$0xff]  ;;  %v206_v30 = vld [vmem:[%s2529_s21 + $0x18] sm:$0xff]  ;;  %s1950_s9 = sshll.u32 %s2992_s4, 4  ;;  %s3411_s9 = int_to_ptr.vmem [resolvable:$true] %s1950_s9 }
  0x24   : > { %2209 = vmatpush1.bf16.msra.mxu0 %v2208_v6  ;;  %v2229_v28 = vpack.c.bf16 %v324_v27, %v323_v26  ;;  %v205_v31 = vld [vmem:[%s2529_s21 + $0x10] sm:$0xff]  ;;  %v208_v32 = vld [vmem:[%s2529_s21 + $0x28] sm:$0xff]  ;;  %v207_v33 = vld [vmem:[%s2529_s21 + $0x20] sm:$0xff]  ;;  %s2321_s20 = scalar_lea.vmem %s3411_s9, 26624 }
  0x25   : > { %2210 = vmatprep.subr.bf16.mxu0 %v2417_v0  ;;  %v210_v34 = vld [vmem:[%s2529_s21 + $0x38] sm:$0xff]  ;;  %v209_v35 = vld [vmem:[%s2529_s21 + $0x30] sm:$0xff]  ;;  %v212_v36 = vld [vmem:[%s2529_s21 + $0x48] sm:$0xff]  ;;  %p2322_p0 = scmp.ne.s32.totalorder %s3411_s9, %s2321_s20 }
  0x26   : > { %v211_v37 = vld [vmem:[%s2529_s21 + $0x40] sm:$0xff]  ;;  %v214_v38 = vld [vmem:[%s2529_s21 + $0x58] sm:$0xff]  ;;  %v213_v39 = vld [vmem:[%s2529_s21 + $0x50] sm:$0xff] }
  0x27   : > { %v216_v40 = vld [vmem:[%s2529_s21 + $0x68] sm:$0xff]  ;;  %v215_v41 = vld [vmem:[%s2529_s21 + $0x60] sm:$0xff]  ;;  %v218_v42 = vld [vmem:[%s2529_s21 + $0x78] sm:$0xff]  ;;  %p2323_p1 = pnand %p2322_p0, %p2493_p3 }
  0x28   : > { %2212 = vmatpush1.bf16.msra.mxu0 %v2211_v10  ;;  %v217_v43 = vld [vmem:[%s2529_s21 + $0x70] sm:$0xff]  ;;  %v220_v44 = vld [vmem:[%s2529_s21 + $0x88] sm:$0xff]  ;;  %v219_v45 = vld [vmem:[%s2529_s21 + $0x80] sm:$0xff] }
  0x29   : > { %2213 = vmatprep.subr.bf16.mxu0 %v2417_v0  ;;  %v222_v46 = vld [vmem:[%s2529_s21 + $0x98] sm:$0xff]  ;;  %v221_v47 = vld [vmem:[%s2529_s21 + $0x90] sm:$0xff]  ;;  %v224_v48 = vld [vmem:[%s2529_s21 + $0xa8] sm:$0xff]  ;;  %p2324_p2 = pneg %p2323_p1 }
  0x2a   : > { %v223_v49 = vld [vmem:[%s2529_s21 + $0xa0] sm:$0xff]  ;;  %v226_v50 = vld [vmem:[%s2529_s21 + $0xb8] sm:$0xff]  ;;  %v225_v51 = vld [vmem:[%s2529_s21 + $0xb0] sm:$0xff] }
  0x2b   : > { %v228_v52 = vld [vmem:[%s2529_s21 + $0xc8] sm:$0xff]  ;;  %v227_v53 = vld [vmem:[%s2529_s21 + $0xc0] sm:$0xff]  ;;  %v230_v54 = vld [vmem:[%s2529_s21 + $0xd8] sm:$0xff] }
  0x2c   : > { %2215 = vmatpush1.bf16.msra.mxu0 %v2214_v13  ;;  %v229_v55 = vld [vmem:[%s2529_s21 + $0xd0] sm:$0xff]  ;;  %v232_v56 = vld [vmem:[%s2529_s21 + $0xe8] sm:$0xff]  ;;  %v231_v57 = vld [vmem:[%s2529_s21 + $0xe0] sm:$0xff] }
  0x2d   : > { %2216 = vmatprep.subr.bf16.mxu0 %v2417_v0  ;;  %v234_v58 = vld [vmem:[%s2529_s21 + $0xf8] sm:$0xff]  ;;  %v233_v59 = vld [vmem:[%s2529_s21 + $0xf0] sm:$0xff]  ;;  %v236_v60 = vld [vmem:[%s2529_s21 + $0x108] sm:$0xff] }
  0x2e   : > { %v235_v61 = vld [vmem:[%s2529_s21 + $0x100] sm:$0xff]  ;;  %v238_v62 = vld [vmem:[%s2529_s21 + $0x118] sm:$0xff]  ;;  %v237_v63 = vld [vmem:[%s2529_s21 + $0x110] sm:$0xff] }
  0x2f   : > { %v239_v1 = vld [vmem:[%s2529_s21 + $0x120] sm:$0xff]  ;;  %v242_v2 = vld [vmem:[%s2529_s21 + $0x138] sm:$0xff]  ;;  %v241_v3 = vld [vmem:[%s2529_s21 + $0x130] sm:$0xff] }
  0x30   : > { %2218 = vmatpush1.bf16.msra.mxu0 %v2217_v16  ;;  %v244_v4 = vld [vmem:[%s2529_s21 + $0x148] sm:$0xff]  ;;  %v807_v7 = vld [vmem:[%s3472_s2] sm:$0xff]  ;;  %v246_v11 = vld [vmem:[%s2529_s21 + $0x158] sm:$0xff] }
  0x31   : > { %2219 = vmatprep.subr.bf16.mxu0 %v2417_v0  ;;  %v808_v5 = vld [vmem:[%s3472_s2 + $0x8] sm:$0xff]  ;;  %v243_v8 = vld [vmem:[%s2529_s21 + $0x140] sm:$0xff]  ;;  %v245_v13 = vld [vmem:[%s2529_s21 + $0x150] sm:$0xff] }
  0x32   : > { %v812_v6 = vld [vmem:[%s3472_s2 + $0x28] sm:$0xff]  ;;  %v811_v10 = vld [vmem:[%s3472_s2 + $0x20] sm:$0xff]  ;;  %v250_v17 = vld [vmem:[%s2529_s21 + $0x178] sm:$0xff] }
  0x33   : > { %v2231_v9 = vpack.c.bf16 %v812_v6, %v808_v5  ;;  %v2233_v12 = vpack.c.bf16 %v811_v10, %v807_v7  ;;  %v248_v14 = vld [vmem:[%s2529_s21 + $0x168] sm:$0xff]  ;;  %v247_v16 = vld [vmem:[%s2529_s21 + $0x160] sm:$0xff]  ;;  %v249_v18 = vld [vmem:[%s2529_s21 + $0x170] sm:$0xff] }
  0x34   : > { %2221 = vmatpush1.bf16.msra.mxu0 %v2220_v19  ;;  %v252_v19 = vld [vmem:[%s2529_s21 + $0x188] sm:$0xff]  ;;  %v251_v20 = vld [vmem:[%s2529_s21 + $0x180] sm:$0xff]  ;;  %v254_v21 = vld [vmem:[%s2529_s21 + $0x198] sm:$0xff] }
  0x35   : > { %2222 = vmatprep.subr.bf16.mxu0 %v2417_v0  ;;  %2239 = vmatprep.subr.bf16.mxu1 %v2231_v9  ;;  %v256_v23 = vld [vmem:[%s2529_s21 + $0x1a8] sm:$0xff]  ;;  %v255_v24 = vld [vmem:[%s2529_s21 + $0x1a0] sm:$0xff]  ;;  %v257_v26 = vld [vmem:[%s2529_s21 + $0x1b0] sm:$0xff] }
  0x36   : > { %2240 = vmatpush1.bf16.msra.mxu1 %v2233_v12  ;;  %v260_v27 = vld [vmem:[%s2529_s21 + $0x1c8] sm:$0xff]  ;;  %v297_v5 = vld [vmem:[%s2529_s21 + $0x2f0] sm:$0xff]  ;;  %v299_v7 = vld [vmem:[%s2529_s21 + $0x300] sm:$0xff] }
  0x37   : > { %v300_v6 = vld [vmem:[%s2529_s21 + $0x308] sm:$0xff] }
  0x38   : > { %2224 = vmatpush1.bf16.msra.mxu0 %v2223_v22  ;;  %v253_v22 = vld [vmem:[%s2529_s21 + $0x190] sm:$0xff]  ;;  %v304_v10 = vld [vmem:[%s2529_s21 + $0x328] sm:$0xff] }
  0x39   : > { %2225 = vmatprep.subr.bf16.mxu0 %v2417_v0 }
  0x3c   : > { %2227 = vmatpush1.bf16.msra.mxu0 %v2226_v25  ;;  %v258_v25 = vld [vmem:[%s2529_s21 + $0x1b8] sm:$0xff] }
  0x3d   : > { %2228 = vmatprep.subr.bf16.mxu0 %v2417_v0  ;;  %v240_v0 = vld [vmem:[%s2529_s21 + $0x128] sm:$0xff] }
  0x40   : > { %2230 = vmatpush1.bf16.msra.mxu0 %v2229_v28  ;;  %v259_v28 = vld [vmem:[%s2529_s21 + $0x1c0] sm:$0xff] }
  0x41   : > { %2232 = vmatprep.subr.bf16.mxu0 %v2231_v9  ;;  %v301_v9 = vld [vmem:[%s2529_s21 + $0x310] sm:$0xff] }
  0x43   : > { %547 = vmatmul.mubr.f32.vlgmr.msra.gmra.mrb[0].mxu0 %v203_v29  ;;  %v262_v29 = vld [vmem:[%s2529_s21 + $0x1d8] sm:$0xff] }
  0x44   : > { %2046 = vmatprep.mubr.msk.f32.mxu0 %vm325_vm0, %v206_v30  ;;  %2234 = vmatpush1.bf16.msra.mxu0 %v2233_v12  ;;  %v261_v30 = vld [vmem:[%s2529_s21 + $0x1d0] sm:$0xff]  ;;  %v306_v12 = vld [vmem:[%s2529_s21 + $0x338] sm:$0xff] }
  0x47   : > { %552 = vmatmul.mubr.f32.gmra.mrb[2].mxu0 %v205_v31  ;;  %v264_v31 = vld [vmem:[%s2529_s21 + $0x1e8] sm:$0xff] }
  0x48   : > { %2047 = vmatprep.mubr.msk.f32.mxu0 %vm325_vm0, %v208_v32  ;;  %v263_v32 = vld [vmem:[%s2529_s21 + $0x1e0] sm:$0xff] }
  0x4b   : > { %557 = vmatmul.mubr.f32.gmra.mrb[4].mxu0 %v207_v33  ;;  %v266_v33 = vld [vmem:[%s2529_s21 + $0x1f8] sm:$0xff] }
  0x4c   : > { %2048 = vmatprep.mubr.msk.f32.mxu0 %vm325_vm0, %v210_v34  ;;  %v265_v34 = vld [vmem:[%s2529_s21 + $0x1f0] sm:$0xff] }
  0x4f   : > { %562 = vmatmul.mubr.f32.gmra.mrb[6].mxu0 %v209_v35  ;;  %v268_v35 = vld [vmem:[%s2529_s21 + $0x208] sm:$0xff] }
  0x50   : > { %2049 = vmatprep.mubr.msk.f32.mxu0 %vm325_vm0, %v212_v36  ;;  %v267_v36 = vld [vmem:[%s2529_s21 + $0x200] sm:$0xff] }
  0x53   : > { %567 = vmatmul.mubr.f32.gmra.mrb[8].mxu0 %v211_v37  ;;  %v270_v37 = vld [vmem:[%s2529_s21 + $0x218] sm:$0xff] }
  0x54   : > { %2050 = vmatprep.mubr.msk.f32.mxu0 %vm325_vm0, %v214_v38  ;;  %v269_v38 = vld [vmem:[%s2529_s21 + $0x210] sm:$0xff] }
  0x57   : > { %572 = vmatmul.mubr.f32.gmra.mrb[10].mxu0 %v213_v39  ;;  %v272_v39 = vld [vmem:[%s2529_s21 + $0x228] sm:$0xff] }
  0x58   : > { %2051 = vmatprep.mubr.msk.f32.mxu0 %vm325_vm0, %v216_v40  ;;  %v271_v40 = vld [vmem:[%s2529_s21 + $0x220] sm:$0xff] }
  0x5b   : > { %577 = vmatmul.mubr.f32.gmra.mrb[12].mxu0 %v215_v41  ;;  %v274_v41 = vld [vmem:[%s2529_s21 + $0x238] sm:$0xff] }
  0x5c   : > { %2052 = vmatprep.mubr.msk.f32.mxu0 %vm325_vm0, %v218_v42  ;;  %v273_v42 = vld [vmem:[%s2529_s21 + $0x230] sm:$0xff] }
  0x5f   : > { %582 = vmatmul.mubr.f32.gmra.mrb[14].mxu0 %v217_v43  ;;  %v276_v43 = vld [vmem:[%s2529_s21 + $0x248] sm:$0xff] }
  0x60   : > { %2053 = vmatprep.mubr.msk.f32.mxu0 %vm325_vm0, %v220_v44  ;;  %v275_v44 = vld [vmem:[%s2529_s21 + $0x240] sm:$0xff] }
  0x63   : > { %587 = vmatmul.mubr.f32.gmra.mrb[16].mxu0 %v219_v45  ;;  %v278_v45 = vld [vmem:[%s2529_s21 + $0x258] sm:$0xff] }
  0x64   : > { %2054 = vmatprep.mubr.msk.f32.mxu0 %vm325_vm0, %v222_v46  ;;  %v277_v46 = vld [vmem:[%s2529_s21 + $0x250] sm:$0xff] }
  0x67   : > { %592 = vmatmul.mubr.f32.gmra.mrb[18].mxu0 %v221_v47  ;;  %v280_v47 = vld [vmem:[%s2529_s21 + $0x268] sm:$0xff] }
  0x68   : > { %2055 = vmatprep.mubr.msk.f32.mxu0 %vm325_vm0, %v224_v48  ;;  %v279_v48 = vld [vmem:[%s2529_s21 + $0x260] sm:$0xff] }
  0x6b   : > { %597 = vmatmul.mubr.f32.gmra.mrb[20].mxu0 %v223_v49  ;;  %v282_v49 = vld [vmem:[%s2529_s21 + $0x278] sm:$0xff] }
  0x6c   : > { %2056 = vmatprep.mubr.msk.f32.mxu0 %vm325_vm0, %v226_v50  ;;  %v281_v50 = vld [vmem:[%s2529_s21 + $0x270] sm:$0xff] }
  0x6f   : > { %602 = vmatmul.mubr.f32.gmra.mrb[22].mxu0 %v225_v51  ;;  %v284_v51 = vld [vmem:[%s2529_s21 + $0x288] sm:$0xff] }
  0x70   : > { %2057 = vmatprep.mubr.msk.f32.mxu0 %vm325_vm0, %v228_v52  ;;  %v283_v52 = vld [vmem:[%s2529_s21 + $0x280] sm:$0xff] }
  0x73   : > { %607 = vmatmul.mubr.f32.gmra.mrb[24].mxu0 %v227_v53  ;;  %v286_v53 = vld [vmem:[%s2529_s21 + $0x298] sm:$0xff] }
  0x74   : > { %2058 = vmatprep.mubr.msk.f32.mxu0 %vm325_vm0, %v230_v54  ;;  %v285_v54 = vld [vmem:[%s2529_s21 + $0x290] sm:$0xff] }
  0x77   : > { %612 = vmatmul.mubr.f32.gmra.mrb[26].mxu0 %v229_v55  ;;  %v288_v55 = vld [vmem:[%s2529_s21 + $0x2a8] sm:$0xff] }
  0x78   : > { %2059 = vmatprep.mubr.msk.f32.mxu0 %vm325_vm0, %v232_v56  ;;  %v287_v56 = vld [vmem:[%s2529_s21 + $0x2a0] sm:$0xff] }
  0x7b   : > { %617 = vmatmul.mubr.f32.gmra.mrb[28].mxu0 %v231_v57  ;;  %v290_v57 = vld [vmem:[%s2529_s21 + $0x2b8] sm:$0xff] }
  0x7c   : > { %2060 = vmatprep.mubr.msk.f32.mxu0 %vm325_vm0, %v234_v58  ;;  %v289_v58 = vld [vmem:[%s2529_s21 + $0x2b0] sm:$0xff] }
  0x7f   : > { %622 = vmatmul.mubr.f32.gmra.mrb[30].mxu0 %v233_v59  ;;  %v292_v59 = vld [vmem:[%s2529_s21 + $0x2c8] sm:$0xff] }
  0x80   : > { %2061 = vmatprep.mubr.msk.f32.mxu0 %vm325_vm0, %v236_v60  ;;  %v810_v60 = vld [vmem:[%s3472_s2 + $0x18] sm:$0xff] }
  0x83   : > { %627 = vmatmul.mubr.f32.gmra.mrb[32].mxu0 %v235_v61  ;;  %v814_v61 = vld [vmem:[%s3472_s2 + $0x38] sm:$0xff] }
  0x84   : > { %2062 = vmatprep.mubr.msk.f32.mxu0 %vm325_vm0, %v238_v62  ;;  %v2235_v62 = vpack.c.bf16 %v814_v61, %v810_v60 }
  0x86   : > { %2236 = vmatprep.subr.bf16.mxu1 %v2235_v62 }
  0x87   : > { %632 = vmatmul.mubr.f32.gmra.mrb[34].mxu0 %v237_v63  ;;  %v291_v63 = vld [vmem:[%s2529_s21 + $0x2c0] sm:$0xff] }
  0x88   : > { %2063 = vmatprep.mubr.msk.f32.mxu0 %vm325_vm0, %v240_v0  ;;  %v294_v0 = vld [vmem:[%s2529_s21 + $0x2d8] sm:$0xff] }
  0x8b   : > { %637 = vmatmul.mubr.f32.gmra.mrb[36].mxu0 %v239_v1  ;;  %v293_v1 = vld [vmem:[%s2529_s21 + $0x2d0] sm:$0xff] }
  0x8c   : > { %2064 = vmatprep.mubr.msk.f32.mxu0 %vm325_vm0, %v242_v2  ;;  %v296_v2 = vld [vmem:[%s2529_s21 + $0x2e8] sm:$0xff] }
  0x8f   : > { %642 = vmatmul.mubr.f32.gmra.mrb[38].mxu0 %v241_v3  ;;  %v295_v3 = vld [vmem:[%s2529_s21 + $0x2e0] sm:$0xff] }
  0x90   : > { %2065 = vmatprep.mubr.msk.f32.mxu0 %vm325_vm0, %v244_v4  ;;  %v298_v4 = vld [vmem:[%s2529_s21 + $0x2f8] sm:$0xff] }
  0x93   : > { %647 = vmatmul.mubr.f32.gmra.mrb[40].mxu0 %v243_v8  ;;  %v302_v8 = vld [vmem:[%s2529_s21 + $0x318] sm:$0xff] }
  0x94   : > { %2066 = vmatprep.mubr.msk.f32.mxu0 %vm325_vm0, %v246_v11  ;;  %v303_v11 = vld [vmem:[%s2529_s21 + $0x320] sm:$0xff] }
  0x97   : > { %652 = vmatmul.mubr.f32.gmra.mrb[42].mxu0 %v245_v13  ;;  %v305_v13 = vld [vmem:[%s2529_s21 + $0x330] sm:$0xff]  ;;  %s2419_s21 = smov [#allocation2]  }
  0x98   : > { %2067 = vmatprep.mubr.msk.f32.mxu0 %vm325_vm0, %v248_v14  ;;  %s2325_s24 = sshll.u32 %s2419_s21, 4  ;;  %s2326_s24 = int_to_ptr.vmem [resolvable:$false] %s2325_s24 }
  0x99   : > { %s2327_s27 = scalar_lea.vmem %s2326_s24, 53248  ;;  %p2328_p4 = scmp.lt.s32.totalorder %s3411_s9, %s2326_s24 }
  0x9a   : > { %p2329_p5 = scmp.lt.s32.totalorder %s2327_s27, %s2321_s20 }
  0x9b   : > { %657 = vmatmul.mubr.f32.gmra.mrb[44].mxu0 %v247_v16 }
  0x9c   : > { %2068 = vmatprep.mubr.msk.f32.mxu0 %vm325_vm0, %v250_v17  ;;  %p2330_p6 = por %p2329_p5, %p2328_p4 }
  0x9e   : > { %p2331_p7 = pnand %p2330_p6, %p2324_p2 }
  0x9f   : > { %662 = vmatmul.mubr.f32.gmra.mrb[46].mxu0 %v249_v18 }
  0xa0   : > { %2069 = vmatprep.mubr.msk.f32.mxu0 %vm325_vm0, %v252_v19 }
  0xa3   : > { %667 = vmatmul.mubr.f32.gmra.mrb[48].mxu0 %v251_v20 }
  0xa4   : > { %2070 = vmatprep.mubr.msk.f32.mxu0 %vm325_vm0, %v254_v21 }
  0xa7   : > { %672 = vmatmul.mubr.f32.gmra.mrb[50].mxu0 %v253_v22 }
  0xa8   : > { %2071 = vmatprep.mubr.msk.f32.mxu0 %vm325_vm0, %v256_v23 }
  0xab   : > { %677 = vmatmul.mubr.f32.gmra.mrb[52].mxu0 %v255_v24 }
  0xac   : > { %2072 = vmatprep.mubr.msk.f32.mxu0 %vm325_vm0, %v258_v25 }
  0xaf   : > { %682 = vmatmul.mubr.f32.gmra.mrb[54].mxu0 %v257_v26 }
  0xb0   : > { %2073 = vmatprep.mubr.msk.f32.mxu0 %vm325_vm0, %v260_v27 }
  0xb3   : > { %687 = vmatmul.mubr.f32.gmra.mrb[56].mxu0 %v259_v28 }
  0xb4   : > { %2074 = vmatprep.mubr.msk.f32.mxu0 %vm325_vm0, %v262_v29 }
  0xb7   : > { %692 = vmatmul.mubr.f32.gmra.mrb[58].mxu0 %v261_v30 }
  0xb8   : > { %2075 = vmatprep.mubr.msk.f32.mxu0 %vm325_vm0, %v264_v31 }
  0xbb   : > { %697 = vmatmul.mubr.f32.gmra.mrb[60].mxu0 %v263_v32 }
  0xbc   : > { %2076 = vmatprep.mubr.msk.f32.mxu0 %vm325_vm0, %v266_v33 }
  0xbf   : > { %702 = vmatmul.mubr.f32.gmra.mrb[62].mxu0 %v265_v34 }
  0xc0   : > { %2077 = vmatprep.mubr.msk.f32.mxu0 %vm325_vm0, %v268_v35 }
  0xc3   : > { %707 = vmatmul.mubr.f32.gmra.mrb[64].mxu0 %v267_v36 }
  0xc4   : > { %2078 = vmatprep.mubr.msk.f32.mxu0 %vm325_vm0, %v270_v37 }
  0xc7   : > { %712 = vmatmul.mubr.f32.gmra.mrb[66].mxu0 %v269_v38 }
  0xc8   : > { %2079 = vmatprep.mubr.msk.f32.mxu0 %vm325_vm0, %v272_v39 }
  0xcb   : > { %717 = vmatmul.mubr.f32.gmra.mrb[68].mxu0 %v271_v40 }
  0xcc   : > { %2080 = vmatprep.mubr.msk.f32.mxu0 %vm325_vm0, %v274_v41 }
  0xcf   : > { %722 = vmatmul.mubr.f32.gmra.mrb[70].mxu0 %v273_v42 }
  0xd0   : > { %2081 = vmatprep.mubr.msk.f32.mxu0 %vm325_vm0, %v276_v43 }
  0xd3   : > { %727 = vmatmul.mubr.f32.gmra.mrb[72].mxu0 %v275_v44 }
  0xd4   : > { %2082 = vmatprep.mubr.msk.f32.mxu0 %vm325_vm0, %v278_v45 }
  0xd7   : > { %732 = vmatmul.mubr.f32.gmra.mrb[74].mxu0 %v277_v46 }
  0xd8   : > { %2083 = vmatprep.mubr.msk.f32.mxu0 %vm325_vm0, %v280_v47 }
  0xdb   : > { %737 = vmatmul.mubr.f32.gmra.mrb[76].mxu0 %v279_v48 }
  0xdc   : > { %2084 = vmatprep.mubr.msk.f32.mxu0 %vm325_vm0, %v282_v49 }
  0xdf   : > { %742 = vmatmul.mubr.f32.gmra.mrb[78].mxu0 %v281_v50 }
  0xe0   : > { %2085 = vmatprep.mubr.msk.f32.mxu0 %vm325_vm0, %v284_v51 }
  0xe3   : > { %747 = vmatmul.mubr.f32.gmra.mrb[80].mxu0 %v283_v52 }
  0xe4   : > { %2086 = vmatprep.mubr.msk.f32.mxu0 %vm325_vm0, %v286_v53 }
  0xe7   : > { %752 = vmatmul.mubr.f32.gmra.mrb[82].mxu0 %v285_v54 }
  0xe8   : > { %2087 = vmatprep.mubr.msk.f32.mxu0 %vm325_vm0, %v288_v55 }
  0xeb   : > { %757 = vmatmul.mubr.f32.gmra.mrb[84].mxu0 %v287_v56 }
  0xec   : > { %2088 = vmatprep.mubr.msk.f32.mxu0 %vm325_vm0, %v290_v57  ;;  %v809_v57 = vld [vmem:[%s3472_s2 + $0x10] sm:$0xff] }
  0xef   : > { %762 = vmatmul.mubr.f32.gmra.mrb[86].mxu0 %v289_v58  ;;  %v813_v58 = vld [vmem:[%s3472_s2 + $0x30] sm:$0xff] }
  0xf0   : > { %2089 = vmatprep.mubr.msk.f32.mxu0 %vm325_vm0, %v292_v59  ;;  %v2237_v61 = vpack.c.bf16 %v813_v58, %v809_v57 }
  0xf3   : > { %767 = vmatmul.mubr.f32.gmra.mrb[88].mxu0 %v291_v63 }
  0xf4   : > { %2090 = vmatprep.mubr.msk.f32.mxu0 %vm325_vm0, %v294_v0 }
  0xf7   : > { %772 = vmatmul.mubr.f32.gmra.mrb[90].mxu0 %v293_v1 }
  0xf8   : > { %2091 = vmatprep.mubr.msk.f32.mxu0 %vm325_vm0, %v296_v2 }
  0xfb   : > { %777 = vmatmul.mubr.f32.gmra.mrb[92].mxu0 %v295_v3 }
  0xfc   : > { %2092 = vmatprep.mubr.msk.f32.mxu0 %vm325_vm0, %v298_v4 }
  0xff   : > { %782 = vmatmul.mubr.f32.gmra.mrb[94].mxu0 %v297_v5 }
 0x100   : > { %2093 = vmatprep.mubr.msk.f32.mxu0 %vm325_vm0, %v300_v6 }
 0x103   : > { %787 = vmatmul.mubr.f32.gmra.mrb[96].mxu0 %v299_v7 }
 0x104   : > { %2094 = vmatprep.mubr.msk.f32.mxu0 %vm325_vm0, %v302_v8 }
 0x107   : > { %792 = vmatmul.mubr.f32.gmra.mrb[98].mxu0 %v301_v9 }
 0x108   : > { %2095 = vmatprep.mubr.msk.f32.mxu0 %vm325_vm0, %v304_v10 }
 0x10b   : > { %797 = vmatmul.mubr.f32.gmra.mrb[100].mxu0 %v303_v11 }
 0x10c   : > { %2096 = vmatprep.mubr.msk.f32.mxu0 %vm325_vm0, %v306_v12 }
 0x10f   : > { %802 = vmatmul.mubr.f32.gmra.mrb[102].mxu0 %v305_v13 }
 0x110   : > { %1035 = vmatprep.mubr.f32.mxu0 %v2418_v15 }
 0x116   : > { %v2721_v14 = vpop.f32.mrb[0].mxu0 }
 0x117   : > { %v550_v16 = vpop.f32.mrb[1].mxu0  ;;  %2097 = vmatmul.mubr.msk.f32.vlgmr.msra.gmra.mrb[104].mxu0 %vm325_vm0, %v2721_v14 }
 0x118   : > { %1041 = vmatprep.mubr.f32.mxu0 %v2418_v15 }
 0x11a   : > { %v2726_v17 = vpop.f32.mrb[2].mxu0 }
 0x11b   : > { %v555_v18 = vpop.f32.mrb[3].mxu0  ;;  %2098 = vmatmul.mubr.msk.f32.gmra.mrb[106].mxu0 %vm325_vm0, %v2726_v17 }
 0x11c   : > { %1047 = vmatprep.mubr.f32.mxu0 %v2418_v15 }
 0x11e   : > { %v2731_v19 = vpop.f32.mrb[4].mxu0 }
 0x11f   : > { %v560_v20 = vpop.f32.mrb[5].mxu0  ;;  %2099 = vmatmul.mubr.msk.f32.gmra.mrb[108].mxu0 %vm325_vm0, %v2731_v19 }
 0x120   : > { %1053 = vmatprep.mubr.f32.mxu0 %v2418_v15 }
 0x122   : > { %v2736_v21 = vpop.f32.mrb[6].mxu0 }
 0x123   : > { %v565_v22 = vpop.f32.mrb[7].mxu0  ;;  %2100 = vmatmul.mubr.msk.f32.gmra.mrb[110].mxu0 %vm325_vm0, %v2736_v21 }
 0x124   : > { %1059 = vmatprep.mubr.f32.mxu0 %v2418_v15 }
 0x126   : > { %v2741_v23 = vpop.f32.mrb[8].mxu0 }
 0x127   : > { %v570_v24 = vpop.f32.mrb[9].mxu0  ;;  %2101 = vmatmul.mubr.msk.f32.gmra.mrb[112].mxu0 %vm325_vm0, %v2741_v23 }
 0x128   : > { %1065 = vmatprep.mubr.f32.mxu0 %v2418_v15 }
 0x12a   : > { %v2746_v25 = vpop.f32.mrb[10].mxu0 }
 0x12b   : > { %v575_v26 = vpop.f32.mrb[11].mxu0  ;;  %2102 = vmatmul.mubr.msk.f32.gmra.mrb[114].mxu0 %vm325_vm0, %v2746_v25 }
 0x12c   : > { %1071 = vmatprep.mubr.f32.mxu0 %v2418_v15 }
 0x12e   : > { %v2751_v27 = vpop.f32.mrb[12].mxu0 }
 0x12f   : > { %v580_v28 = vpop.f32.mrb[13].mxu0  ;;  %2103 = vmatmul.mubr.msk.f32.gmra.mrb[116].mxu0 %vm325_vm0, %v2751_v27 }
 0x130   : > { %1077 = vmatprep.mubr.f32.mxu0 %v2418_v15 }
 0x132   : > { %v2756_v29 = vpop.f32.mrb[14].mxu0 }
 0x133   : > { %v585_v30 = vpop.f32.mrb[15].mxu0  ;;  %2104 = vmatmul.mubr.msk.f32.gmra.mrb[118].mxu0 %vm325_vm0, %v2756_v29 }
 0x134   : > { %1083 = vmatprep.mubr.f32.mxu0 %v2418_v15 }
 0x136   : > { %v2761_v31 = vpop.f32.mrb[16].mxu0 }
 0x137   : > { %v590_v32 = vpop.f32.mrb[17].mxu0  ;;  %2105 = vmatmul.mubr.msk.f32.gmra.mrb[120].mxu0 %vm325_vm0, %v2761_v31 }
 0x138   : > { %1089 = vmatprep.mubr.f32.mxu0 %v2418_v15 }
 0x13a   : > { %v2766_v33 = vpop.f32.mrb[18].mxu0 }
 0x13b   : > { %v595_v34 = vpop.f32.mrb[19].mxu0  ;;  %2106 = vmatmul.mubr.msk.f32.gmra.mrb[122].mxu0 %vm325_vm0, %v2766_v33 }
 0x13c   : > { %1095 = vmatprep.mubr.f32.mxu0 %v2418_v15 }
 0x13e   : > { %v2771_v35 = vpop.f32.mrb[20].mxu0 }
 0x13f   : > { %v600_v36 = vpop.f32.mrb[21].mxu0  ;;  %2107 = vmatmul.mubr.msk.f32.gmra.mrb[124].mxu0 %vm325_vm0, %v2771_v35 }
 0x140   : > { %1101 = vmatprep.mubr.f32.mxu0 %v2418_v15 }
 0x142   : > { %v2776_v37 = vpop.f32.mrb[22].mxu0 }
 0x143   : > { %v605_v38 = vpop.f32.mrb[23].mxu0  ;;  %2108 = vmatmul.mubr.msk.f32.gmra.mrb[126].mxu0 %vm325_vm0, %v2776_v37 }
 0x144   : > { %1107 = vmatprep.mubr.f32.mxu0 %v2418_v15 }
 0x146   : > { %v2781_v39 = vpop.f32.mrb[24].mxu0 }
 0x147   : > { %v610_v40 = vpop.f32.mrb[25].mxu0  ;;  %2109 = vmatmul.mubr.msk.f32.gmra.mrb[128].mxu0 %vm325_vm0, %v2781_v39 }
 0x148   : > { %1113 = vmatprep.mubr.f32.mxu0 %v2418_v15 }
 0x14a   : > { %v2786_v41 = vpop.f32.mrb[26].mxu0 }
 0x14b   : > { %v615_v42 = vpop.f32.mrb[27].mxu0  ;;  %2110 = vmatmul.mubr.msk.f32.gmra.mrb[130].mxu0 %vm325_vm0, %v2786_v41 }
 0x14c   : > { %1119 = vmatprep.mubr.f32.mxu0 %v2418_v15 }
 0x14e   : > { %v2791_v43 = vpop.f32.mrb[28].mxu0 }
 0x14f   : > { %v620_v44 = vpop.f32.mrb[29].mxu0  ;;  %2111 = vmatmul.mubr.msk.f32.gmra.mrb[132].mxu0 %vm325_vm0, %v2791_v43 }
 0x150   : > { %1125 = vmatprep.mubr.f32.mxu0 %v2418_v15 }
 0x152   : > { %v2796_v45 = vpop.f32.mrb[30].mxu0 }
 0x153   : > { %v625_v46 = vpop.f32.mrb[31].mxu0  ;;  %2112 = vmatmul.mubr.msk.f32.gmra.mrb[134].mxu0 %vm325_vm0, %v2796_v45 }
 0x154   : > { %1131 = vmatprep.mubr.f32.mxu0 %v2418_v15 }
 0x156   : > { %v2801_v47 = vpop.f32.mrb[32].mxu0 }
 0x157   : > { %v630_v48 = vpop.f32.mrb[33].mxu0  ;;  %2113 = vmatmul.mubr.msk.f32.gmra.mrb[136].mxu0 %vm325_vm0, %v2801_v47 }
 0x158   : > { %1137 = vmatprep.mubr.f32.mxu0 %v2418_v15 }
 0x15a   : > { %v2806_v49 = vpop.f32.mrb[34].mxu0 }
 0x15b   : > { %v635_v50 = vpop.f32.mrb[35].mxu0  ;;  %2114 = vmatmul.mubr.msk.f32.gmra.mrb[138].mxu0 %vm325_vm0, %v2806_v49 }
 0x15c   : > { %1143 = vmatprep.mubr.f32.mxu0 %v2418_v15 }
 0x15e   : > { %v2811_v51 = vpop.f32.mrb[36].mxu0 }
 0x15f   : > { %v640_v52 = vpop.f32.mrb[37].mxu0  ;;  %2115 = vmatmul.mubr.msk.f32.gmra.mrb[140].mxu0 %vm325_vm0, %v2811_v51 }
 0x160   : > { %1149 = vmatprep.mubr.f32.mxu0 %v2418_v15 }
 0x162   : > { %v2816_v53 = vpop.f32.mrb[38].mxu0 }
 0x163   : > { %v645_v54 = vpop.f32.mrb[39].mxu0  ;;  %2116 = vmatmul.mubr.msk.f32.gmra.mrb[142].mxu0 %vm325_vm0, %v2816_v53 }
 0x164   : > { %1155 = vmatprep.mubr.f32.mxu0 %v2418_v15 }
 0x166   : > { %v2821_v55 = vpop.f32.mrb[40].mxu0 }
 0x167   : > { %v650_v56 = vpop.f32.mrb[41].mxu0  ;;  %2117 = vmatmul.mubr.msk.f32.gmra.mrb[144].mxu0 %vm325_vm0, %v2821_v55 }
 0x168   : > { %1161 = vmatprep.mubr.f32.mxu0 %v2418_v15 }
 0x16a   : > { %v2832_v59 = vpop.f32.mrb[42].mxu0 }
 0x16b   : > { %v655_v60 = vpop.f32.mrb[43].mxu0  ;;  %2118 = vmatmul.mubr.msk.f32.gmra.mrb[146].mxu0 %vm325_vm0, %v2832_v59 }
 0x16e   : > { %v2836_v62 = vpop.f32.mrb[44].mxu0 }
 0x16f   : > { %v660_v63 = vpop.f32.mrb[45].mxu0  ;;  %2119 = vmatmul.mubr.msk.f32.vlgmr.msra.gmra.mrb[0].mxu1 %vm325_vm0, %v2836_v62 }
 0x170   : > { %2238 = vmatpush1.bf16.msra.mxu1 %v2237_v61  ;;  %1173 = vmatprep.mubr.f32.mxu1 %v2418_v15 }
 0x172   : > { %v2841_v0 = vpop.f32.mrb[46].mxu0 }
 0x173   : > { %v665_v1 = vpop.f32.mrb[47].mxu0  ;;  %2120 = vmatmul.mubr.msk.f32.gmra.mrb[2].mxu1 %vm325_vm0, %v2841_v0 }
 0x174   : > { %1179 = vmatprep.mubr.f32.mxu1 %v2418_v15 }
 0x176   : > { %v2846_v2 = vpop.f32.mrb[48].mxu0 }
 0x177   : > { %v670_v3 = vpop.f32.mrb[49].mxu0  ;;  %2121 = vmatmul.mubr.msk.f32.gmra.mrb[4].mxu1 %vm325_vm0, %v2846_v2 }
 0x178   : > { %1185 = vmatprep.mubr.f32.mxu1 %v2418_v15 }
 0x17a   : > { %v2851_v4 = vpop.f32.mrb[50].mxu0 }
 0x17b   : > { %v675_v5 = vpop.f32.mrb[51].mxu0  ;;  %2122 = vmatmul.mubr.msk.f32.gmra.mrb[6].mxu1 %vm325_vm0, %v2851_v4 }
 0x17c   : > { %1191 = vmatprep.mubr.f32.mxu1 %v2418_v15 }
 0x17e   : > { %v2856_v6 = vpop.f32.mrb[52].mxu0 }
 0x17f   : > { %v680_v7 = vpop.f32.mrb[53].mxu0  ;;  %2123 = vmatmul.mubr.msk.f32.gmra.mrb[8].mxu1 %vm325_vm0, %v2856_v6 }
 0x180   : > { %1197 = vmatprep.mubr.f32.mxu1 %v2418_v15 }
 0x182   : > { %v2861_v8 = vpop.f32.mrb[54].mxu0 }
 0x183   : > { %v685_v9 = vpop.f32.mrb[55].mxu0  ;;  %2124 = vmatmul.mubr.msk.f32.gmra.mrb[10].mxu1 %vm325_vm0, %v2861_v8 }
 0x184   : > { %1203 = vmatprep.mubr.f32.mxu1 %v2418_v15 }
 0x186   : > { %v2866_v10 = vpop.f32.mrb[56].mxu0 }
 0x187   : > { %v690_v11 = vpop.f32.mrb[57].mxu0  ;;  %2125 = vmatmul.mubr.msk.f32.gmra.mrb[12].mxu1 %vm325_vm0, %v2866_v10 }
 0x188   : > { %1209 = vmatprep.mubr.f32.mxu1 %v2418_v15 }
 0x18a   : > { %v2871_v12 = vpop.f32.mrb[58].mxu0 }
 0x18b   : > { %v695_v13 = vpop.f32.mrb[59].mxu0  ;;  %2126 = vmatmul.mubr.msk.f32.gmra.mrb[14].mxu1 %vm325_vm0, %v2871_v12 }
 0x18c   : > { %1215 = vmatprep.mubr.f32.mxu1 %v2418_v15 }
 0x18e   : > { %v2876_v16 = vpop.f32.mrb[60].mxu0 }
 0x18f   : > { %v700_v18 = vpop.f32.mrb[61].mxu0  ;;  %2127 = vmatmul.mubr.msk.f32.gmra.mrb[16].mxu1 %vm325_vm0, %v2876_v16 }
 0x190   : > { %1221 = vmatprep.mubr.f32.mxu1 %v2418_v15 }
 0x192   : > { %v2881_v20 = vpop.f32.mrb[62].mxu0 }
 0x193   : > { %v705_v22 = vpop.f32.mrb[63].mxu0  ;;  %2128 = vmatmul.mubr.msk.f32.gmra.mrb[18].mxu1 %vm325_vm0, %v2881_v20 }
 0x194   : > { %1227 = vmatprep.mubr.f32.mxu1 %v2418_v15 }
 0x196   : > { %v2886_v24 = vpop.f32.mrb[64].mxu0 }
 0x197   : > { %v710_v26 = vpop.f32.mrb[65].mxu0  ;;  %2129 = vmatmul.mubr.msk.f32.gmra.mrb[20].mxu1 %vm325_vm0, %v2886_v24 }
 0x198   : > { %1233 = vmatprep.mubr.f32.mxu1 %v2418_v15 }
 0x19a   : > { %v2891_v28 = vpop.f32.mrb[66].mxu0 }
 0x19b   : > { %v715_v30 = vpop.f32.mrb[67].mxu0  ;;  %2130 = vmatmul.mubr.msk.f32.gmra.mrb[22].mxu1 %vm325_vm0, %v2891_v28 }
 0x19c   : > { %1239 = vmatprep.mubr.f32.mxu1 %v2418_v15 }
 0x19e   : > { %v2896_v32 = vpop.f32.mrb[68].mxu0 }
 0x19f   : > { %v720_v34 = vpop.f32.mrb[69].mxu0  ;;  %2131 = vmatmul.mubr.msk.f32.gmra.mrb[24].mxu1 %vm325_vm0, %v2896_v32 }
 0x1a0   : > { %1245 = vmatprep.mubr.f32.mxu1 %v2418_v15 }
 0x1a2   : > { %v2901_v36 = vpop.f32.mrb[70].mxu0 }
 0x1a3   : > { %v725_v38 = vpop.f32.mrb[71].mxu0  ;;  %2132 = vmatmul.mubr.msk.f32.gmra.mrb[26].mxu1 %vm325_vm0, %v2901_v36 }
 0x1a4   : > { %1251 = vmatprep.mubr.f32.mxu1 %v2418_v15 }
 0x1a6   : > { %v2906_v40 = vpop.f32.mrb[72].mxu0 }
 0x1a7   : > { %v730_v42 = vpop.f32.mrb[73].mxu0  ;;  %2133 = vmatmul.mubr.msk.f32.gmra.mrb[28].mxu1 %vm325_vm0, %v2906_v40 }
 0x1a8   : > { %1257 = vmatprep.mubr.f32.mxu1 %v2418_v15 }
 0x1aa   : > { %v2911_v44 = vpop.f32.mrb[74].mxu0 }
 0x1ab   : > { %v735_v46 = vpop.f32.mrb[75].mxu0  ;;  %2134 = vmatmul.mubr.msk.f32.gmra.mrb[30].mxu1 %vm325_vm0, %v2911_v44 }
 0x1ac   : > { %1263 = vmatprep.mubr.f32.mxu1 %v2418_v15 }
 0x1ae   : > { %v2916_v48 = vpop.f32.mrb[76].mxu0 }
 0x1af   : > { %v740_v50 = vpop.f32.mrb[77].mxu0  ;;  %2135 = vmatmul.mubr.msk.f32.gmra.mrb[32].mxu1 %vm325_vm0, %v2916_v48 }
 0x1b0   : > { %1269 = vmatprep.mubr.f32.mxu1 %v2418_v15 }
 0x1b2   : > { %v2921_v52 = vpop.f32.mrb[78].mxu0 }
 0x1b3   : > { %v745_v54 = vpop.f32.mrb[79].mxu0  ;;  %2136 = vmatmul.mubr.msk.f32.gmra.mrb[34].mxu1 %vm325_vm0, %v2921_v52 }
 0x1b4   : > { %1275 = vmatprep.mubr.f32.mxu1 %v2418_v15 }
 0x1b6   : > { %v2926_v56 = vpop.f32.mrb[80].mxu0 }
 0x1b7   : > { %v750_v57 = vpop.f32.mrb[81].mxu0  ;;  %2137 = vmatmul.mubr.msk.f32.gmra.mrb[36].mxu1 %vm325_vm0, %v2926_v56 }
 0x1b8   : > { %1281 = vmatprep.mubr.f32.mxu1 %v2418_v15 }
 0x1ba   : > { %v2931_v58 = vpop.f32.mrb[82].mxu0 }
 0x1bb   : > { %v755_v60 = vpop.f32.mrb[83].mxu0  ;;  %2138 = vmatmul.mubr.msk.f32.gmra.mrb[38].mxu1 %vm325_vm0, %v2931_v58 }
 0x1bc   : > { %1287 = vmatprep.mubr.f32.mxu1 %v2418_v15 }
 0x1be   : > { %v2936_v61 = vpop.f32.mrb[84].mxu0 }
 0x1bf   : > { %v760_v63 = vpop.f32.mrb[85].mxu0  ;;  %2139 = vmatmul.mubr.msk.f32.gmra.mrb[40].mxu1 %vm325_vm0, %v2936_v61 }
 0x1c0   : > { %1293 = vmatprep.mubr.f32.mxu1 %v2418_v15 }
 0x1c2   : > { %v2941_v1 = vpop.f32.mrb[86].mxu0 }
 0x1c3   : > { %v765_v3 = vpop.f32.mrb[87].mxu0  ;;  %2140 = vmatmul.mubr.msk.f32.gmra.mrb[42].mxu1 %vm325_vm0, %v2941_v1 }
 0x1c4   : > { %1299 = vmatprep.mubr.f32.mxu1 %v2418_v15 }
 0x1c6   : > { %v2946_v5 = vpop.f32.mrb[88].mxu0 }
 0x1c7   : > { %v770_v7 = vpop.f32.mrb[89].mxu0  ;;  %2141 = vmatmul.mubr.msk.f32.gmra.mrb[44].mxu1 %vm325_vm0, %v2946_v5 }
 0x1c8   : > { %1305 = vmatprep.mubr.f32.mxu1 %v2418_v15 }
 0x1ca   : > { %v2951_v9 = vpop.f32.mrb[90].mxu0 }
 0x1cb   : > { %v775_v11 = vpop.f32.mrb[91].mxu0  ;;  %2142 = vmatmul.mubr.msk.f32.gmra.mrb[46].mxu1 %vm325_vm0, %v2951_v9 }
 0x1cc   : > { %1311 = vmatprep.mubr.f32.mxu1 %v2418_v15 }
 0x1ce   : > { %v2956_v13 = vpop.f32.mrb[92].mxu0 }
 0x1cf   : > { %v780_v18 = vpop.f32.mrb[93].mxu0  ;;  %2143 = vmatmul.mubr.msk.f32.gmra.mrb[48].mxu1 %vm325_vm0, %v2956_v13 }
 0x1d0   : > { %1317 = vmatprep.mubr.f32.mxu1 %v2418_v15 }
 0x1d2   : > { %v2961_v22 = vpop.f32.mrb[94].mxu0 }
 0x1d3   : > { %v785_v26 = vpop.f32.mrb[95].mxu0  ;;  %2144 = vmatmul.mubr.msk.f32.gmra.mrb[50].mxu1 %vm325_vm0, %v2961_v22 }
 0x1d4   : > { %1323 = vmatprep.mubr.f32.mxu1 %v2418_v15 }
 0x1d6   : > { %v2966_v30 = vpop.f32.mrb[96].mxu0 }
 0x1d7   : > { %v790_v34 = vpop.f32.mrb[97].mxu0  ;;  %2145 = vmatmul.mubr.msk.f32.gmra.mrb[52].mxu1 %vm325_vm0, %v2966_v30 }
 0x1d8   : > { %1329 = vmatprep.mubr.f32.mxu1 %v2418_v15 }
 0x1da   : > { %v2971_v38 = vpop.f32.mrb[98].mxu0 }
 0x1db   : > { %v795_v42 = vpop.f32.mrb[99].mxu0  ;;  %2146 = vmatmul.mubr.msk.f32.gmra.mrb[54].mxu1 %vm325_vm0, %v2971_v38 }
 0x1dc   : > { %1335 = vmatprep.mubr.f32.mxu1 %v2418_v15 }
 0x1de   : > { %v2976_v46 = vpop.f32.mrb[100].mxu0 }
 0x1df   : > { %v800_v50 = vpop.f32.mrb[101].mxu0  ;;  %2147 = vmatmul.mubr.msk.f32.gmra.mrb[56].mxu1 %vm325_vm0, %v2976_v46 }
 0x1e0   : > { %1341 = vmatprep.mubr.f32.mxu1 %v2418_v15 }
 0x1e2   : > { %v2982_v54 = vpop.f32.mrb[102].mxu0 }
 0x1e3   : > { %v805_v57 = vpop.f32.mrb[103].mxu0  ;;  %2148 = vmatmul.mubr.msk.f32.gmra.mrb[58].mxu1 %vm325_vm0, %v2982_v54 }
 0x1e4   : > { %1412 = vmatprep.mubr.f32.mxu1 %v2418_v15 }
 0x1e7   : > { %2149 = vmatmul.mubr.msk.f32.vlgmr.msra.gmra.mrb[60].mxu1 %vm325_vm0, %v2721_v14 }
 0x1e8   : > { %1418 = vmatprep.mubr.f32.mxu1 %v2418_v15 }
 0x1ea   : > { %v1037_v60 = vpop.f32.mrb[104].mxu0 }
 0x1eb   : > { %1725 = vst [vmem:[%s2992_s4] sm:$0xff] %v1037_v60  ;;  %v1039_v63 = vpop.f32.mrb[105].mxu0  ;;  %2150 = vmatmul.mubr.msk.f32.gmra.mrb[62].mxu1 %vm325_vm0, %v2726_v17 }
 0x1ec   : > { %1726 = vst [vmem:[%s2992_s4 + $0x8] sm:$0xff] %v1039_v63  ;;  %1424 = vmatprep.mubr.f32.mxu1 %v2418_v15 }
 0x1ee   : > { %v1043_v14 = vpop.f32.mrb[106].mxu0 }
 0x1ef   : > { %1730 = vst [vmem:[%s2992_s4 + $0x20] sm:$0xff] %v1043_v14  ;;  %v1045_v3 = vpop.f32.mrb[107].mxu0  ;;  %2151 = vmatmul.mubr.msk.f32.gmra.mrb[64].mxu1 %vm325_vm0, %v2731_v19 }
 0x1f0   : > { %1731 = vst [vmem:[%s2992_s4 + $0x28] sm:$0xff] %v1045_v3  ;;  %1430 = vmatprep.mubr.f32.mxu1 %v2418_v15 }
 0x1f2   : > { %v1049_v7 = vpop.f32.mrb[108].mxu0 }
 0x1f3   : > { %1734 = vst [vmem:[%s2992_s4 + $0x40] sm:$0xff] %v1049_v7  ;;  %v1051_v11 = vpop.f32.mrb[109].mxu0  ;;  %2152 = vmatmul.mubr.msk.f32.gmra.mrb[66].mxu1 %vm325_vm0, %v2736_v21 }
 0x1f4   : > { %1735 = vst [vmem:[%s2992_s4 + $0x48] sm:$0xff] %v1051_v11  ;;  %1436 = vmatprep.mubr.f32.mxu1 %v2418_v15 }
 0x1f6   : > { %v1055_v17 = vpop.f32.mrb[110].mxu0 }
 0x1f7   : > { %1738 = vst [vmem:[%s2992_s4 + $0x60] sm:$0xff] %v1055_v17  ;;  %v1057_v18 = vpop.f32.mrb[111].mxu0  ;;  %2153 = vmatmul.mubr.msk.f32.gmra.mrb[68].mxu1 %vm325_vm0, %v2741_v23 }
 0x1f8   : > { %1739 = vst [vmem:[%s2992_s4 + $0x68] sm:$0xff] %v1057_v18  ;;  %1442 = vmatprep.mubr.f32.mxu1 %v2418_v15 }
 0x1fa   : > { %v1061_v19 = vpop.f32.mrb[112].mxu0 }
 0x1fb   : > { %1742 = vst [vmem:[%s2992_s4 + $0x80] sm:$0xff] %v1061_v19  ;;  %v1063_v26 = vpop.f32.mrb[113].mxu0  ;;  %2154 = vmatmul.mubr.msk.f32.gmra.mrb[70].mxu1 %vm325_vm0, %v2746_v25 }
 0x1fc   : > { %1743 = vst [vmem:[%s2992_s4 + $0x88] sm:$0xff] %v1063_v26  ;;  %1448 = vmatprep.mubr.f32.mxu1 %v2418_v15 }
 0x1fe   : > { %v1067_v21 = vpop.f32.mrb[114].mxu0 }
 0x1ff   : > { %1746 = vst [vmem:[%s2992_s4 + $0xa0] sm:$0xff] %v1067_v21  ;;  %v1069_v34 = vpop.f32.mrb[115].mxu0  ;;  %2155 = vmatmul.mubr.msk.f32.gmra.mrb[72].mxu1 %vm325_vm0, %v2751_v27 }
 0x200   : > { %1747 = vst [vmem:[%s2992_s4 + $0xa8] sm:$0xff] %v1069_v34  ;;  %1454 = vmatprep.mubr.f32.mxu1 %v2418_v15 }
 0x202   : > { %v1073_v23 = vpop.f32.mrb[116].mxu0 }
 0x203   : > { %1750 = vst [vmem:[%s2992_s4 + $0xc0] sm:$0xff] %v1073_v23  ;;  %v1075_v42 = vpop.f32.mrb[117].mxu0  ;;  %2156 = vmatmul.mubr.msk.f32.gmra.mrb[74].mxu1 %vm325_vm0, %v2756_v29 }
 0x204   : > { %1751 = vst [vmem:[%s2992_s4 + $0xc8] sm:$0xff] %v1075_v42  ;;  %1460 = vmatprep.mubr.f32.mxu1 %v2418_v15 }
 0x206   : > { %v1079_v25 = vpop.f32.mrb[118].mxu0 }
 0x207   : > { %1754 = vst [vmem:[%s2992_s4 + $0xe0] sm:$0xff] %v1079_v25  ;;  %v1081_v50 = vpop.f32.mrb[119].mxu0  ;;  %2157 = vmatmul.mubr.msk.f32.gmra.mrb[76].mxu1 %vm325_vm0, %v2761_v31 }
 0x208   : > { %1755 = vst [vmem:[%s2992_s4 + $0xe8] sm:$0xff] %v1081_v50  ;;  %1466 = vmatprep.mubr.f32.mxu1 %v2418_v15 }
 0x20a   : > { %v1085_v27 = vpop.f32.mrb[120].mxu0 }
 0x20b   : > { %1758 = vst [vmem:[%s2992_s4 + $0x100] sm:$0xff] %v1085_v27  ;;  %v1087_v57 = vpop.f32.mrb[121].mxu0  ;;  %2158 = vmatmul.mubr.msk.f32.gmra.mrb[78].mxu1 %vm325_vm0, %v2766_v33 }
 0x20c   : > { %1759 = vst [vmem:[%s2992_s4 + $0x108] sm:$0xff] %v1087_v57  ;;  %1472 = vmatprep.mubr.f32.mxu1 %v2418_v15 }
 0x20e   : > { %v1091_v29 = vpop.f32.mrb[122].mxu0 }
 0x20f   : > { %1762 = vst [vmem:[%s2992_s4 + $0x120] sm:$0xff] %v1091_v29  ;;  %v1093_v60 = vpop.f32.mrb[123].mxu0  ;;  %2159 = vmatmul.mubr.msk.f32.gmra.mrb[80].mxu1 %vm325_vm0, %v2771_v35 }
 0x210   : > { %1763 = vst [vmem:[%s2992_s4 + $0x128] sm:$0xff] %v1093_v60  ;;  %1478 = vmatprep.mubr.f32.mxu1 %v2418_v15 }
 0x212   : > { %v1097_v31 = vpop.f32.mrb[124].mxu0 }
 0x213   : > { %1766 = vst [vmem:[%s2992_s4 + $0x140] sm:$0xff] %v1097_v31  ;;  %v1099_v63 = vpop.f32.mrb[125].mxu0  ;;  %2160 = vmatmul.mubr.msk.f32.gmra.mrb[82].mxu1 %vm325_vm0, %v2776_v37 }
 0x214   : > { %1767 = vst [vmem:[%s2992_s4 + $0x148] sm:$0xff] %v1099_v63  ;;  %1484 = vmatprep.mubr.f32.mxu1 %v2418_v15 }
 0x216   : > { %v1103_v33 = vpop.f32.mrb[126].mxu0 }
 0x217   : > { %1770 = vst [vmem:[%s2992_s4 + $0x160] sm:$0xff] %v1103_v33  ;;  %v1105_v14 = vpop.f32.mrb[127].mxu0  ;;  %2161 = vmatmul.mubr.msk.f32.gmra.mrb[84].mxu1 %vm325_vm0, %v2781_v39 }
 0x218   : > { %1771 = vst [vmem:[%s2992_s4 + $0x168] sm:$0xff] %v1105_v14  ;;  %1490 = vmatprep.mubr.f32.mxu1 %v2418_v15 }
 0x21a   : > { %v1109_v35 = vpop.f32.mrb[128].mxu0 }
 0x21b   : > { %1774 = vst [vmem:[%s2992_s4 + $0x180] sm:$0xff] %v1109_v35  ;;  %v1111_v3 = vpop.f32.mrb[129].mxu0  ;;  %2162 = vmatmul.mubr.msk.f32.gmra.mrb[86].mxu1 %vm325_vm0, %v2786_v41 }
 0x21c   : > { %1775 = vst [vmem:[%s2992_s4 + $0x188] sm:$0xff] %v1111_v3  ;;  %1496 = vmatprep.mubr.f32.mxu1 %v2418_v15 }
 0x21e   : > { %v1115_v37 = vpop.f32.mrb[130].mxu0 }
 0x21f   : > { %1778 = vst [vmem:[%s2992_s4 + $0x1a0] sm:$0xff] %v1115_v37  ;;  %v1117_v7 = vpop.f32.mrb[131].mxu0  ;;  %2163 = vmatmul.mubr.msk.f32.gmra.mrb[88].mxu1 %vm325_vm0, %v2791_v43 }
 0x220   : > { %1779 = vst [vmem:[%s2992_s4 + $0x1a8] sm:$0xff] %v1117_v7  ;;  %1502 = vmatprep.mubr.f32.mxu1 %v2418_v15 }
 0x222   : > { %v1121_v39 = vpop.f32.mrb[132].mxu0 }
 0x223   : > { %1782 = vst [vmem:[%s2992_s4 + $0x1c0] sm:$0xff] %v1121_v39  ;;  %v1123_v11 = vpop.f32.mrb[133].mxu0  ;;  %2164 = vmatmul.mubr.msk.f32.gmra.mrb[90].mxu1 %vm325_vm0, %v2796_v45 }
 0x224   : > { %1783 = vst [vmem:[%s2992_s4 + $0x1c8] sm:$0xff] %v1123_v11  ;;  %1508 = vmatprep.mubr.f32.mxu1 %v2418_v15 }
 0x226   : > { %v1127_v41 = vpop.f32.mrb[134].mxu0 }
 0x227   : > { %1786 = vst [vmem:[%s2992_s4 + $0x1e0] sm:$0xff] %v1127_v41  ;;  %v1129_v17 = vpop.f32.mrb[135].mxu0  ;;  %2165 = vmatmul.mubr.msk.f32.gmra.mrb[92].mxu1 %vm325_vm0, %v2801_v47 }
 0x228   : > { %1787 = vst [vmem:[%s2992_s4 + $0x1e8] sm:$0xff] %v1129_v17  ;;  %1514 = vmatprep.mubr.f32.mxu1 %v2418_v15 }
 0x22a   : > { %v1133_v43 = vpop.f32.mrb[136].mxu0 }
 0x22b   : > { %1790 = vst [vmem:[%s2992_s4 + $0x200] sm:$0xff] %v1133_v43  ;;  %v1135_v18 = vpop.f32.mrb[137].mxu0  ;;  %2166 = vmatmul.mubr.msk.f32.gmra.mrb[94].mxu1 %vm325_vm0, %v2806_v49 }
 0x22c   : > { %1791 = vst [vmem:[%s2992_s4 + $0x208] sm:$0xff] %v1135_v18  ;;  %1520 = vmatprep.mubr.f32.mxu1 %v2418_v15 }
 0x22e   : > { %v1139_v45 = vpop.f32.mrb[138].mxu0 }
 0x22f   : > { %1794 = vst [vmem:[%s2992_s4 + $0x220] sm:$0xff] %v1139_v45  ;;  %v1141_v19 = vpop.f32.mrb[139].mxu0  ;;  %2167 = vmatmul.mubr.msk.f32.gmra.mrb[96].mxu1 %vm325_vm0, %v2811_v51 }
 0x230   : > { %1795 = vst [vmem:[%s2992_s4 + $0x228] sm:$0xff] %v1141_v19  ;;  %1526 = vmatprep.mubr.f32.mxu1 %v2418_v15 }
 0x232   : > { %v1145_v47 = vpop.f32.mrb[140].mxu0 }
 0x233   : > { %1798 = vst [vmem:[%s2992_s4 + $0x240] sm:$0xff] %v1145_v47  ;;  %v1147_v26 = vpop.f32.mrb[141].mxu0  ;;  %2168 = vmatmul.mubr.msk.f32.gmra.mrb[98].mxu1 %vm325_vm0, %v2816_v53 }
 0x234   : > { %1799 = vst [vmem:[%s2992_s4 + $0x248] sm:$0xff] %v1147_v26  ;;  %1532 = vmatprep.mubr.f32.mxu1 %v2418_v15 }
 0x236   : > { %v1151_v49 = vpop.f32.mrb[142].mxu0 }
 0x237   : > { %1802 = vst [vmem:[%s2992_s4 + $0x260] sm:$0xff] %v1151_v49  ;;  %v1153_v21 = vpop.f32.mrb[143].mxu0  ;;  %2169 = vmatmul.mubr.msk.f32.gmra.mrb[100].mxu1 %vm325_vm0, %v2821_v55 }
 0x238   : > { %1803 = vst [vmem:[%s2992_s4 + $0x268] sm:$0xff] %v1153_v21  ;;  %1538 = vmatprep.mubr.f32.mxu1 %v2418_v15 }
 0x23a   : > { %v1157_v51 = vpop.f32.mrb[144].mxu0 }
 0x23b   : > { %1806 = vst [vmem:[%s2992_s4 + $0x280] sm:$0xff] %v1157_v51  ;;  %v1159_v34 = vpop.f32.mrb[145].mxu0  ;;  %2170 = vmatmul.mubr.msk.f32.gmra.mrb[102].mxu1 %vm325_vm0, %v2832_v59 }
 0x23c   : > { %1807 = vst [vmem:[%s2992_s4 + $0x288] sm:$0xff] %v1159_v34  ;;  %1544 = vmatprep.mubr.f32.mxu1 %v2418_v15 }
 0x23e   : > { %v1163_v53 = vpop.f32.mrb[146].mxu0 }
 0x23f   : > { %1810 = vst [vmem:[%s2992_s4 + $0x2a0] sm:$0xff] %v1163_v53  ;;  %v1165_v23 = vpop.f32.mrb[147].mxu0  ;;  %2171 = vmatmul.mubr.msk.f32.gmra.mrb[104].mxu1 %vm325_vm0, %v2836_v62 }
 0x240   : > { %1811 = vst [vmem:[%s2992_s4 + $0x2a8] sm:$0xff] %v1165_v23  ;;  %1550 = vmatprep.mubr.f32.mxu1 %v2418_v15 }
 0x242   : > { %v1169_v55 = vpop.f32.mrb[0].mxu1 }
 0x243   : > { %1814 = vst [vmem:[%s2992_s4 + $0x2c0] sm:$0xff] %v1169_v55  ;;  %v1171_v42 = vpop.f32.mrb[1].mxu1  ;;  %2172 = vmatmul.mubr.msk.f32.gmra.mrb[106].mxu1 %vm325_vm0, %v2841_v0 }
 0x244   : > { %1815 = vst [vmem:[%s2992_s4 + $0x2c8] sm:$0xff] %v1171_v42  ;;  %1556 = vmatprep.mubr.f32.mxu1 %v2418_v15 }
 0x246   : > { %v1175_v59 = vpop.f32.mrb[2].mxu1 }
 0x247   : > { %1818 = vst [vmem:[%s2992_s4 + $0x2e0] sm:$0xff] %v1175_v59  ;;  %v1177_v25 = vpop.f32.mrb[3].mxu1  ;;  %2173 = vmatmul.mubr.msk.f32.gmra.mrb[108].mxu1 %vm325_vm0, %v2846_v2 }
 0x248   : > { %1819 = vst [vmem:[%s2992_s4 + $0x2e8] sm:$0xff] %v1177_v25  ;;  %1562 = vmatprep.mubr.f32.mxu1 %v2418_v15 }
 0x24a   : > { %v1181_v62 = vpop.f32.mrb[4].mxu1 }
 0x24b   : > { %1822 = vst [vmem:[%s2992_s4 + $0x300] sm:$0xff] %v1181_v62  ;;  %v1183_v50 = vpop.f32.mrb[5].mxu1  ;;  %2174 = vmatmul.mubr.msk.f32.gmra.mrb[110].mxu1 %vm325_vm0, %v2851_v4 }
 0x24c   : > { %1823 = vst [vmem:[%s2992_s4 + $0x308] sm:$0xff] %v1183_v50  ;;  %1568 = vmatprep.mubr.f32.mxu1 %v2418_v15 }
 0x24e   : > { %v1187_v0 = vpop.f32.mrb[6].mxu1 }
 0x24f   : > { %1826 = vst [vmem:[%s2992_s4 + $0x320] sm:$0xff] %v1187_v0  ;;  %v1189_v27 = vpop.f32.mrb[7].mxu1  ;;  %2175 = vmatmul.mubr.msk.f32.gmra.mrb[112].mxu1 %vm325_vm0, %v2856_v6 }
 0x250   : > { %1827 = vst [vmem:[%s2992_s4 + $0x328] sm:$0xff] %v1189_v27  ;;  %1574 = vmatprep.mubr.f32.mxu1 %v2418_v15 }
 0x252   : > { %v1193_v2 = vpop.f32.mrb[8].mxu1 }
 0x253   : > { %1830 = vst [vmem:[%s2992_s4 + $0x340] sm:$0xff] %v1193_v2  ;;  %v1195_v57 = vpop.f32.mrb[9].mxu1  ;;  %2176 = vmatmul.mubr.msk.f32.gmra.mrb[114].mxu1 %vm325_vm0, %v2861_v8 }
 0x254   : > { %1831 = vst [vmem:[%s2992_s4 + $0x348] sm:$0xff] %v1195_v57  ;;  %1580 = vmatprep.mubr.f32.mxu1 %v2418_v15 }
 0x256   : > { %v1199_v4 = vpop.f32.mrb[10].mxu1 }
 0x257   : > { %1834 = vst [vmem:[%s2992_s4 + $0x360] sm:$0xff] %v1199_v4  ;;  %v1201_v29 = vpop.f32.mrb[11].mxu1  ;;  %2177 = vmatmul.mubr.msk.f32.gmra.mrb[116].mxu1 %vm325_vm0, %v2866_v10 }
 0x258   : > { %1835 = vst [vmem:[%s2992_s4 + $0x368] sm:$0xff] %v1201_v29  ;;  %1586 = vmatprep.mubr.f32.mxu1 %v2418_v15 }
 0x25a   : > { %v1205_v6 = vpop.f32.mrb[12].mxu1 }
 0x25b   : > { %1838 = vst [vmem:[%s2992_s4 + $0x380] sm:$0xff] %v1205_v6  ;;  %v1207_v60 = vpop.f32.mrb[13].mxu1  ;;  %2178 = vmatmul.mubr.msk.f32.gmra.mrb[118].mxu1 %vm325_vm0, %v2871_v12 }
 0x25c   : > { %1839 = vst [vmem:[%s2992_s4 + $0x388] sm:$0xff] %v1207_v60  ;;  %1592 = vmatprep.mubr.f32.mxu1 %v2418_v15 }
 0x25e   : > { %v1211_v8 = vpop.f32.mrb[14].mxu1 }
 0x25f   : > { %1842 = vst [vmem:[%s2992_s4 + $0x3a0] sm:$0xff] %v1211_v8  ;;  %v1213_v31 = vpop.f32.mrb[15].mxu1  ;;  %2179 = vmatmul.mubr.msk.f32.gmra.mrb[120].mxu1 %vm325_vm0, %v2876_v16 }
 0x260   : > { %1843 = vst [vmem:[%s2992_s4 + $0x3a8] sm:$0xff] %v1213_v31  ;;  %1598 = vmatprep.mubr.f32.mxu1 %v2418_v15 }
 0x262   : > { %v1217_v10 = vpop.f32.mrb[16].mxu1 }
 0x263   : > { %1846 = vst [vmem:[%s2992_s4 + $0x3c0] sm:$0xff] %v1217_v10  ;;  %v1219_v63 = vpop.f32.mrb[17].mxu1  ;;  %2180 = vmatmul.mubr.msk.f32.gmra.mrb[122].mxu1 %vm325_vm0, %v2881_v20 }
 0x264   : > { %1847 = vst [vmem:[%s2992_s4 + $0x3c8] sm:$0xff] %v1219_v63  ;;  %1604 = vmatprep.mubr.f32.mxu1 %v2418_v15 }
 0x266   : > { %v1223_v12 = vpop.f32.mrb[18].mxu1 }
 0x267   : > { %1850 = vst [vmem:[%s2992_s4 + $0x3e0] sm:$0xff] %v1223_v12  ;;  %v1225_v33 = vpop.f32.mrb[19].mxu1  ;;  %2181 = vmatmul.mubr.msk.f32.gmra.mrb[124].mxu1 %vm325_vm0, %v2886_v24 }
 0x268   : > { %1851 = vst [vmem:[%s2992_s4 + $0x3e8] sm:$0xff] %v1225_v33  ;;  %1610 = vmatprep.mubr.f32.mxu1 %v2418_v15 }
 0x26a   : > { %v1229_v16 = vpop.f32.mrb[20].mxu1 }
 0x26b   : > { %1854 = vst [vmem:[%s2992_s4 + $0x400] sm:$0xff] %v1229_v16  ;;  %v1231_v14 = vpop.f32.mrb[21].mxu1  ;;  %2182 = vmatmul.mubr.msk.f32.gmra.mrb[126].mxu1 %vm325_vm0, %v2891_v28 }
 0x26c   : > { %1855 = vst [vmem:[%s2992_s4 + $0x408] sm:$0xff] %v1231_v14  ;;  %1616 = vmatprep.mubr.f32.mxu1 %v2418_v15 }
 0x26e   : > { %v1235_v20 = vpop.f32.mrb[22].mxu1 }
 0x26f   : > { %1858 = vst [vmem:[%s2992_s4 + $0x420] sm:$0xff] %v1235_v20  ;;  %v1237_v35 = vpop.f32.mrb[23].mxu1  ;;  %2183 = vmatmul.mubr.msk.f32.gmra.mrb[128].mxu1 %vm325_vm0, %v2896_v32 }
 0x270   : > { %1859 = vst [vmem:[%s2992_s4 + $0x428] sm:$0xff] %v1237_v35  ;;  %1622 = vmatprep.mubr.f32.mxu1 %v2418_v15 }
 0x272   : > { %v1241_v24 = vpop.f32.mrb[24].mxu1 }
 0x273   : > { %1862 = vst [vmem:[%s2992_s4 + $0x440] sm:$0xff] %v1241_v24  ;;  %v1243_v3 = vpop.f32.mrb[25].mxu1  ;;  %2184 = vmatmul.mubr.msk.f32.gmra.mrb[130].mxu1 %vm325_vm0, %v2901_v36 }
 0x274   : > { %1863 = vst [vmem:[%s2992_s4 + $0x448] sm:$0xff] %v1243_v3  ;;  %1628 = vmatprep.mubr.f32.mxu1 %v2418_v15 }
 0x276   : > { %v1247_v28 = vpop.f32.mrb[26].mxu1 }
 0x277   : > { %1866 = vst [vmem:[%s2992_s4 + $0x460] sm:$0xff] %v1247_v28  ;;  %v1249_v37 = vpop.f32.mrb[27].mxu1  ;;  %2185 = vmatmul.mubr.msk.f32.gmra.mrb[132].mxu1 %vm325_vm0, %v2906_v40 }
 0x278   : > { %1867 = vst [vmem:[%s2992_s4 + $0x468] sm:$0xff] %v1249_v37  ;;  %1634 = vmatprep.mubr.f32.mxu1 %v2418_v15 }
 0x27a   : > { %v1253_v32 = vpop.f32.mrb[28].mxu1 }
 0x27b   : > { %1870 = vst [vmem:[%s2992_s4 + $0x480] sm:$0xff] %v1253_v32  ;;  %v1255_v7 = vpop.f32.mrb[29].mxu1  ;;  %2186 = vmatmul.mubr.msk.f32.gmra.mrb[134].mxu1 %vm325_vm0, %v2911_v44 }
 0x27c   : > { %1871 = vst [vmem:[%s2992_s4 + $0x488] sm:$0xff] %v1255_v7  ;;  %1640 = vmatprep.mubr.f32.mxu1 %v2418_v15 }
 0x27e   : > { %v1259_v36 = vpop.f32.mrb[30].mxu1 }
 0x27f   : > { %1874 = vst [vmem:[%s2992_s4 + $0x4a0] sm:$0xff] %v1259_v36  ;;  %v1261_v39 = vpop.f32.mrb[31].mxu1  ;;  %2187 = vmatmul.mubr.msk.f32.gmra.mrb[136].mxu1 %vm325_vm0, %v2916_v48 }
 0x280   : > { %1875 = vst [vmem:[%s2992_s4 + $0x4a8] sm:$0xff] %v1261_v39  ;;  %1646 = vmatprep.mubr.f32.mxu1 %v2418_v15 }
 0x282   : > { %v1265_v40 = vpop.f32.mrb[32].mxu1 }
 0x283   : > { %1878 = vst [vmem:[%s2992_s4 + $0x4c0] sm:$0xff] %v1265_v40  ;;  %v1267_v11 = vpop.f32.mrb[33].mxu1  ;;  %2188 = vmatmul.mubr.msk.f32.gmra.mrb[138].mxu1 %vm325_vm0, %v2921_v52 }
 0x284   : > { %1879 = vst [vmem:[%s2992_s4 + $0x4c8] sm:$0xff] %v1267_v11  ;;  %1652 = vmatprep.mubr.f32.mxu1 %v2418_v15 }
 0x286   : > { %v1271_v44 = vpop.f32.mrb[34].mxu1 }
 0x287   : > { %1882 = vst [vmem:[%s2992_s4 + $0x4e0] sm:$0xff] %v1271_v44  ;;  %v1273_v41 = vpop.f32.mrb[35].mxu1  ;;  %2189 = vmatmul.mubr.msk.f32.gmra.mrb[140].mxu1 %vm325_vm0, %v2926_v56 }
 0x288   : > { %1883 = vst [vmem:[%s2992_s4 + $0x4e8] sm:$0xff] %v1273_v41  ;;  %1658 = vmatprep.mubr.f32.mxu1 %v2418_v15 }
 0x28a   : > { %v1277_v48 = vpop.f32.mrb[36].mxu1 }
 0x28b   : > { %1886 = vst [vmem:[%s2992_s4 + $0x500] sm:$0xff] %v1277_v48  ;;  %v1279_v17 = vpop.f32.mrb[37].mxu1  ;;  %2190 = vmatmul.mubr.msk.f32.gmra.mrb[142].mxu1 %vm325_vm0, %v2931_v58 }
 0x28c   : > { %1887 = vst [vmem:[%s2992_s4 + $0x508] sm:$0xff] %v1279_v17  ;;  %1664 = vmatprep.mubr.f32.mxu1 %v2418_v15 }
 0x28e   : > { %v1283_v52 = vpop.f32.mrb[38].mxu1 }
 0x28f   : > { %1890 = vst [vmem:[%s2992_s4 + $0x520] sm:$0xff] %v1283_v52  ;;  %v1285_v43 = vpop.f32.mrb[39].mxu1  ;;  %2191 = vmatmul.mubr.msk.f32.gmra.mrb[144].mxu1 %vm325_vm0, %v2936_v61 }
 0x290   : > { %1891 = vst [vmem:[%s2992_s4 + $0x528] sm:$0xff] %v1285_v43  ;;  %1670 = vmatprep.mubr.f32.mxu1 %v2418_v15 }
 0x292   : > { %v1289_v56 = vpop.f32.mrb[40].mxu1 }
 0x293   : > { %1894 = vst [vmem:[%s2992_s4 + $0x540] sm:$0xff] %v1289_v56  ;;  %v1291_v18 = vpop.f32.mrb[41].mxu1  ;;  %2192 = vmatmul.mubr.msk.f32.gmra.mrb[146].mxu1 %vm325_vm0, %v2941_v1 }
 0x294   : > { %1895 = vst [vmem:[%s2992_s4 + $0x548] sm:$0xff] %v1291_v18  ;;  %1676 = vmatprep.mubr.f32.mxu1 %v2418_v15 }
 0x296   : > { %v1295_v58 = vpop.f32.mrb[42].mxu1 }
 0x297   : > { %1898 = vst [vmem:[%s2992_s4 + $0x560] sm:$0xff] %v1295_v58  ;;  %v1297_v45 = vpop.f32.mrb[43].mxu1  ;;  %2193 = vmatmul.mubr.msk.f32.gmra.mrb[148].mxu1 %vm325_vm0, %v2946_v5 }
 0x298   : > { %1899 = vst [vmem:[%s2992_s4 + $0x568] sm:$0xff] %v1297_v45  ;;  %1682 = vmatprep.mubr.f32.mxu1 %v2418_v15 }
 0x29a   : > { %v1301_v61 = vpop.f32.mrb[44].mxu1 }
 0x29b   : > { %1902 = vst [vmem:[%s2992_s4 + $0x580] sm:$0xff] %v1301_v61  ;;  %v1303_v19 = vpop.f32.mrb[45].mxu1  ;;  %2194 = vmatmul.mubr.msk.f32.gmra.mrb[150].mxu1 %vm325_vm0, %v2951_v9 }
 0x29c   : > { %1903 = vst [vmem:[%s2992_s4 + $0x588] sm:$0xff] %v1303_v19  ;;  %1688 = vmatprep.mubr.f32.mxu1 %v2418_v15 }
 0x29e   : > { %v1307_v1 = vpop.f32.mrb[46].mxu1 }
 0x29f   : > { %1906 = vst [vmem:[%s2992_s4 + $0x5a0] sm:$0xff] %v1307_v1  ;;  %v1309_v47 = vpop.f32.mrb[47].mxu1  ;;  %2195 = vmatmul.mubr.msk.f32.gmra.mrb[152].mxu1 %vm325_vm0, %v2956_v13 }
 0x2a0   : > { %1907 = vst [vmem:[%s2992_s4 + $0x5a8] sm:$0xff] %v1309_v47  ;;  %1694 = vmatprep.mubr.f32.mxu1 %v2418_v15 }
 0x2a2   : > { %v1313_v5 = vpop.f32.mrb[48].mxu1 }
 0x2a3   : > { %1910 = vst [vmem:[%s2992_s4 + $0x5c0] sm:$0xff] %v1313_v5  ;;  %v1315_v26 = vpop.f32.mrb[49].mxu1  ;;  %2196 = vmatmul.mubr.msk.f32.gmra.mrb[154].mxu1 %vm325_vm0, %v2961_v22 }
 0x2a4   : > { %1911 = vst [vmem:[%s2992_s4 + $0x5c8] sm:$0xff] %v1315_v26  ;;  %1700 = vmatprep.mubr.f32.mxu1 %v2418_v15 }
 0x2a6   : > { %v1319_v9 = vpop.f32.mrb[50].mxu1 }
 0x2a7   : > { %1914 = vst [vmem:[%s2992_s4 + $0x5e0] sm:$0xff] %v1319_v9  ;;  %v1321_v49 = vpop.f32.mrb[51].mxu1  ;;  %2197 = vmatmul.mubr.msk.f32.gmra.mrb[156].mxu1 %vm325_vm0, %v2966_v30 }
 0x2a8   : > { %1915 = vst [vmem:[%s2992_s4 + $0x5e8] sm:$0xff] %v1321_v49  ;;  %1706 = vmatprep.mubr.f32.mxu1 %v2418_v15 }
 0x2aa   : > { %v1325_v13 = vpop.f32.mrb[52].mxu1 }
 0x2ab   : > { %1918 = vst [vmem:[%s2992_s4 + $0x600] sm:$0xff] %v1325_v13  ;;  %v1327_v21 = vpop.f32.mrb[53].mxu1  ;;  %2198 = vmatmul.mubr.msk.f32.gmra.mrb[158].mxu1 %vm325_vm0, %v2971_v38 }
 0x2ac   : > { %1919 = vst [vmem:[%s2992_s4 + $0x608] sm:$0xff] %v1327_v21  ;;  %1712 = vmatprep.mubr.f32.mxu1 %v2418_v15 }
 0x2ae   : > { %v1331_v22 = vpop.f32.mrb[54].mxu1 }
 0x2af   : > { %1922 = vst [vmem:[%s2992_s4 + $0x620] sm:$0xff] %v1331_v22  ;;  %v1333_v30 = vpop.f32.mrb[55].mxu1  ;;  %2199 = vmatmul.mubr.msk.f32.gmra.mrb[160].mxu1 %vm325_vm0, %v2976_v46 }
 0x2b0   : > { %1923 = vst [vmem:[%s2992_s4 + $0x628] sm:$0xff] %v1333_v30  ;;  %1718 = vmatprep.mubr.f32.mxu1 %v2418_v15 }
 0x2b2   : > { %v1337_v51 = vpop.f32.mrb[56].mxu1 }
 0x2b3   : > { %1926 = vst [vmem:[%s2992_s4 + $0x640] sm:$0xff] %v1337_v51  ;;  %v1339_v38 = vpop.f32.mrb[57].mxu1  ;;  %2200 = vmatmul.mubr.msk.f32.gmra.mrb[162].mxu1 %vm325_vm0, %v2982_v54 }
 0x2b4   : > { %1927 = vst [vmem:[%s2992_s4 + $0x648] sm:$0xff] %v1339_v38 }
 0x2b6   : > { %v1343_v34 = vpop.f32.mrb[58].mxu1 }
 0x2b7   : > { %1930 = vst [vmem:[%s2992_s4 + $0x660] sm:$0xff] %v1343_v34  ;;  %v1345_v53 = vpop.f32.mrb[59].mxu1 }
 0x2b8   : > { %1931 = vst [vmem:[%s2992_s4 + $0x668] sm:$0xff] %v1345_v53 }
 0x2ba   : > { %v1414_v46 = vpop.f32.mrb[60].mxu1 }
 0x2bb   : > { %1727 = vst [vmem:[%s2992_s4 + $0x10] sm:$0xff] %v1414_v46  ;;  %v1416_v15 = vpop.f32.mrb[61].mxu1 }
 0x2bc   : > { %1729 = vst.msk [vmem:[%s2992_s4 + $0x18] sm:$0xff] %vm1728_vm1, %v1416_v15 }
 0x2be   : > { %v1420_v23 = vpop.f32.mrb[62].mxu1 }
 0x2bf   : > { %1732 = vst [vmem:[%s2992_s4 + $0x30] sm:$0xff] %v1420_v23  ;;  %v1422_v54 = vpop.f32.mrb[63].mxu1 }
 0x2c0   : > { %1733 = vst.msk [vmem:[%s2992_s4 + $0x38] sm:$0xff] %vm1728_vm1, %v1422_v54 }
 0x2c2   : > { %v1426_v55 = vpop.f32.mrb[64].mxu1 }
 0x2c3   : > { %1736 = vst [vmem:[%s2992_s4 + $0x50] sm:$0xff] %v1426_v55  ;;  %v1428_v42 = vpop.f32.mrb[65].mxu1 }
 0x2c4   : > { %1737 = vst.msk [vmem:[%s2992_s4 + $0x58] sm:$0xff] %vm1728_vm1, %v1428_v42 }
 0x2c6   : > { %v1432_v59 = vpop.f32.mrb[66].mxu1 }
 0x2c7   : > { %1740 = vst [vmem:[%s2992_s4 + $0x70] sm:$0xff] %v1432_v59  ;;  %v1434_v25 = vpop.f32.mrb[67].mxu1 }
 0x2c8   : > { %1741 = vst.msk [vmem:[%s2992_s4 + $0x78] sm:$0xff] %vm1728_vm1, %v1434_v25 }
 0x2ca   : > { %v1438_v62 = vpop.f32.mrb[68].mxu1 }
 0x2cb   : > { %1744 = vst [vmem:[%s2992_s4 + $0x90] sm:$0xff] %v1438_v62  ;;  %v1440_v50 = vpop.f32.mrb[69].mxu1 }
 0x2cc   : > { %1745 = vst.msk [vmem:[%s2992_s4 + $0x98] sm:$0xff] %vm1728_vm1, %v1440_v50 }
 0x2ce   : > { %v1444_v0 = vpop.f32.mrb[70].mxu1 }
 0x2cf   : > { %1748 = vst [vmem:[%s2992_s4 + $0xb0] sm:$0xff] %v1444_v0  ;;  %v1446_v27 = vpop.f32.mrb[71].mxu1 }
 0x2d0   : > { %1749 = vst.msk [vmem:[%s2992_s4 + $0xb8] sm:$0xff] %vm1728_vm1, %v1446_v27 }
 0x2d2   : > { %v1450_v2 = vpop.f32.mrb[72].mxu1 }
 0x2d3   : > { %1752 = vst [vmem:[%s2992_s4 + $0xd0] sm:$0xff] %v1450_v2  ;;  %v1452_v57 = vpop.f32.mrb[73].mxu1 }
 0x2d4   : > { %1753 = vst.msk [vmem:[%s2992_s4 + $0xd8] sm:$0xff] %vm1728_vm1, %v1452_v57 }
 0x2d6   : > { %v1456_v4 = vpop.f32.mrb[74].mxu1 }
 0x2d7   : > { %1756 = vst [vmem:[%s2992_s4 + $0xf0] sm:$0xff] %v1456_v4  ;;  %v1458_v29 = vpop.f32.mrb[75].mxu1 }
 0x2d8   : > { %1757 = vst.msk [vmem:[%s2992_s4 + $0xf8] sm:$0xff] %vm1728_vm1, %v1458_v29 }
 0x2da   : > { %v1462_v6 = vpop.f32.mrb[76].mxu1 }
 0x2db   : > { %1760 = vst [vmem:[%s2992_s4 + $0x110] sm:$0xff] %v1462_v6  ;;  %v1464_v60 = vpop.f32.mrb[77].mxu1 }
 0x2dc   : > { %1761 = vst.msk [vmem:[%s2992_s4 + $0x118] sm:$0xff] %vm1728_vm1, %v1464_v60 }
 0x2de   : > { %v1468_v8 = vpop.f32.mrb[78].mxu1 }
 0x2df   : > { %1764 = vst [vmem:[%s2992_s4 + $0x130] sm:$0xff] %v1468_v8  ;;  %v1470_v31 = vpop.f32.mrb[79].mxu1 }
 0x2e0   : > { %1765 = vst.msk [vmem:[%s2992_s4 + $0x138] sm:$0xff] %vm1728_vm1, %v1470_v31 }
 0x2e2   : > { %v1474_v10 = vpop.f32.mrb[80].mxu1 }
 0x2e3   : > { %1768 = vst [vmem:[%s2992_s4 + $0x150] sm:$0xff] %v1474_v10  ;;  %v1476_v63 = vpop.f32.mrb[81].mxu1 }
 0x2e4   : > { %1769 = vst.msk [vmem:[%s2992_s4 + $0x158] sm:$0xff] %vm1728_vm1, %v1476_v63 }
 0x2e6   : > { %v1480_v12 = vpop.f32.mrb[82].mxu1 }
 0x2e7   : > { %1772 = vst [vmem:[%s2992_s4 + $0x170] sm:$0xff] %v1480_v12  ;;  %v1482_v33 = vpop.f32.mrb[83].mxu1 }
 0x2e8   : > { %1773 = vst.msk [vmem:[%s2992_s4 + $0x178] sm:$0xff] %vm1728_vm1, %v1482_v33 }
 0x2ea   : > { %v1486_v16 = vpop.f32.mrb[84].mxu1 }
 0x2eb   : > { %1776 = vst [vmem:[%s2992_s4 + $0x190] sm:$0xff] %v1486_v16  ;;  %v1488_v14 = vpop.f32.mrb[85].mxu1 }
 0x2ec   : > { %1777 = vst.msk [vmem:[%s2992_s4 + $0x198] sm:$0xff] %vm1728_vm1, %v1488_v14 }
 0x2ee   : > { %v1492_v20 = vpop.f32.mrb[86].mxu1 }
 0x2ef   : > { %1780 = vst [vmem:[%s2992_s4 + $0x1b0] sm:$0xff] %v1492_v20  ;;  %v1494_v35 = vpop.f32.mrb[87].mxu1 }
 0x2f0   : > { %1781 = vst.msk [vmem:[%s2992_s4 + $0x1b8] sm:$0xff] %vm1728_vm1, %v1494_v35 }
 0x2f2   : > { %v1498_v24 = vpop.f32.mrb[88].mxu1 }
 0x2f3   : > { %1784 = vst [vmem:[%s2992_s4 + $0x1d0] sm:$0xff] %v1498_v24  ;;  %v1500_v3 = vpop.f32.mrb[89].mxu1 }
 0x2f4   : > { %1785 = vst.msk [vmem:[%s2992_s4 + $0x1d8] sm:$0xff] %vm1728_vm1, %v1500_v3 }
 0x2f6   : > { %v1504_v28 = vpop.f32.mrb[90].mxu1 }
 0x2f7   : > { %1788 = vst [vmem:[%s2992_s4 + $0x1f0] sm:$0xff] %v1504_v28  ;;  %v1506_v37 = vpop.f32.mrb[91].mxu1 }
 0x2f8   : > { %1789 = vst.msk [vmem:[%s2992_s4 + $0x1f8] sm:$0xff] %vm1728_vm1, %v1506_v37 }
 0x2fa   : > { %v1510_v32 = vpop.f32.mrb[92].mxu1 }
 0x2fb   : > { %1792 = vst [vmem:[%s2992_s4 + $0x210] sm:$0xff] %v1510_v32  ;;  %v1512_v7 = vpop.f32.mrb[93].mxu1 }
 0x2fc   : > { %1793 = vst.msk [vmem:[%s2992_s4 + $0x218] sm:$0xff] %vm1728_vm1, %v1512_v7 }
 0x2fe   : > { %v1516_v36 = vpop.f32.mrb[94].mxu1 }
 0x2ff   : > { %1796 = vst [vmem:[%s2992_s4 + $0x230] sm:$0xff] %v1516_v36  ;;  %v1518_v39 = vpop.f32.mrb[95].mxu1 }
 0x300   : > { %1797 = vst.msk [vmem:[%s2992_s4 + $0x238] sm:$0xff] %vm1728_vm1, %v1518_v39 }
 0x302   : > { %v1522_v40 = vpop.f32.mrb[96].mxu1 }
 0x303   : > { %1800 = vst [vmem:[%s2992_s4 + $0x250] sm:$0xff] %v1522_v40  ;;  %v1524_v11 = vpop.f32.mrb[97].mxu1 }
 0x304   : > { %1801 = vst.msk [vmem:[%s2992_s4 + $0x258] sm:$0xff] %vm1728_vm1, %v1524_v11 }
 0x306   : > { %v1528_v44 = vpop.f32.mrb[98].mxu1 }
 0x307   : > { %1804 = vst [vmem:[%s2992_s4 + $0x270] sm:$0xff] %v1528_v44  ;;  %v1530_v41 = vpop.f32.mrb[99].mxu1 }
 0x308   : > { %1805 = vst.msk [vmem:[%s2992_s4 + $0x278] sm:$0xff] %vm1728_vm1, %v1530_v41 }
 0x30a   : > { %v1534_v48 = vpop.f32.mrb[100].mxu1 }
 0x30b   : > { %1808 = vst [vmem:[%s2992_s4 + $0x290] sm:$0xff] %v1534_v48  ;;  %v1536_v17 = vpop.f32.mrb[101].mxu1 }
 0x30c   : > { %1809 = vst.msk [vmem:[%s2992_s4 + $0x298] sm:$0xff] %vm1728_vm1, %v1536_v17 }
 0x30e   : > { %v1540_v52 = vpop.f32.mrb[102].mxu1 }
 0x30f   : > { %1812 = vst [vmem:[%s2992_s4 + $0x2b0] sm:$0xff] %v1540_v52  ;;  %v1542_v43 = vpop.f32.mrb[103].mxu1 }
 0x310   : > { %1813 = vst.msk [vmem:[%s2992_s4 + $0x2b8] sm:$0xff] %vm1728_vm1, %v1542_v43 }
 0x312   : > { %v1546_v56 = vpop.f32.mrb[104].mxu1 }
 0x313   : > { %1816 = vst [vmem:[%s2992_s4 + $0x2d0] sm:$0xff] %v1546_v56  ;;  %v1548_v18 = vpop.f32.mrb[105].mxu1 }
 0x314   : > { %1817 = vst.msk [vmem:[%s2992_s4 + $0x2d8] sm:$0xff] %vm1728_vm1, %v1548_v18 }
 0x316   : > { %v1552_v58 = vpop.f32.mrb[106].mxu1 }
 0x317   : > { %1820 = vst [vmem:[%s2992_s4 + $0x2f0] sm:$0xff] %v1552_v58  ;;  %v1554_v45 = vpop.f32.mrb[107].mxu1 }
 0x318   : > { %1821 = vst.msk [vmem:[%s2992_s4 + $0x2f8] sm:$0xff] %vm1728_vm1, %v1554_v45 }
 0x31a   : > { %v1558_v61 = vpop.f32.mrb[108].mxu1 }
 0x31b   : > { %1824 = vst [vmem:[%s2992_s4 + $0x310] sm:$0xff] %v1558_v61  ;;  %v1560_v19 = vpop.f32.mrb[109].mxu1 }
 0x31c   : > { %1825 = vst.msk [vmem:[%s2992_s4 + $0x318] sm:$0xff] %vm1728_vm1, %v1560_v19 }
 0x31e   : > { %v1564_v1 = vpop.f32.mrb[110].mxu1 }
 0x31f   : > { %1828 = vst [vmem:[%s2992_s4 + $0x330] sm:$0xff] %v1564_v1  ;;  %v1566_v47 = vpop.f32.mrb[111].mxu1 }
 0x320   : > { %1829 = vst.msk [vmem:[%s2992_s4 + $0x338] sm:$0xff] %vm1728_vm1, %v1566_v47 }
 0x322   : > { %v1570_v5 = vpop.f32.mrb[112].mxu1 }
 0x323   : > { %1832 = vst [vmem:[%s2992_s4 + $0x350] sm:$0xff] %v1570_v5  ;;  %v1572_v26 = vpop.f32.mrb[113].mxu1 }
 0x324   : > { %1833 = vst.msk [vmem:[%s2992_s4 + $0x358] sm:$0xff] %vm1728_vm1, %v1572_v26 }
 0x326   : > { %v1576_v9 = vpop.f32.mrb[114].mxu1 }
 0x327   : > { %1836 = vst [vmem:[%s2992_s4 + $0x370] sm:$0xff] %v1576_v9  ;;  %v1578_v49 = vpop.f32.mrb[115].mxu1 }
 0x328   : > { %1837 = vst.msk [vmem:[%s2992_s4 + $0x378] sm:$0xff] %vm1728_vm1, %v1578_v49 }
 0x32a   : > { %v1582_v13 = vpop.f32.mrb[116].mxu1 }
 0x32b   : > { %1840 = vst [vmem:[%s2992_s4 + $0x390] sm:$0xff] %v1582_v13  ;;  %v1584_v21 = vpop.f32.mrb[117].mxu1 }
 0x32c   : > { %1841 = vst.msk [vmem:[%s2992_s4 + $0x398] sm:$0xff] %vm1728_vm1, %v1584_v21 }
 0x32e   : > { %v1588_v22 = vpop.f32.mrb[118].mxu1 }
 0x32f   : > { %1844 = vst [vmem:[%s2992_s4 + $0x3b0] sm:$0xff] %v1588_v22  ;;  %v1590_v30 = vpop.f32.mrb[119].mxu1 }
 0x330   : > { %1845 = vst.msk [vmem:[%s2992_s4 + $0x3b8] sm:$0xff] %vm1728_vm1, %v1590_v30 }
 0x332   : > { %v1594_v51 = vpop.f32.mrb[120].mxu1 }
 0x333   : > { %1848 = vst [vmem:[%s2992_s4 + $0x3d0] sm:$0xff] %v1594_v51  ;;  %v1596_v38 = vpop.f32.mrb[121].mxu1 }
 0x334   : > { %1849 = vst.msk [vmem:[%s2992_s4 + $0x3d8] sm:$0xff] %vm1728_vm1, %v1596_v38 }
 0x336   : > { %v1600_v34 = vpop.f32.mrb[122].mxu1 }
 0x337   : > { %1852 = vst [vmem:[%s2992_s4 + $0x3f0] sm:$0xff] %v1600_v34  ;;  %v1602_v53 = vpop.f32.mrb[123].mxu1 }
 0x338   : > { %1853 = vst.msk [vmem:[%s2992_s4 + $0x3f8] sm:$0xff] %vm1728_vm1, %v1602_v53 }
 0x33a   : > { %v1606_v46 = vpop.f32.mrb[124].mxu1 }
 0x33b   : > { %1856 = vst [vmem:[%s2992_s4 + $0x410] sm:$0xff] %v1606_v46  ;;  %v1608_v15 = vpop.f32.mrb[125].mxu1 }
 0x33c   : > { %1857 = vst.msk [vmem:[%s2992_s4 + $0x418] sm:$0xff] %vm1728_vm1, %v1608_v15 }
 0x33e   : > { %v1612_v23 = vpop.f32.mrb[126].mxu1 }
 0x33f   : > { %1860 = vst [vmem:[%s2992_s4 + $0x430] sm:$0xff] %v1612_v23  ;;  %v1614_v54 = vpop.f32.mrb[127].mxu1 }
 0x340   : > { %1861 = vst.msk [vmem:[%s2992_s4 + $0x438] sm:$0xff] %vm1728_vm1, %v1614_v54 }
 0x342   : > { %v1618_v55 = vpop.f32.mrb[128].mxu1 }
 0x343   : > { %1864 = vst [vmem:[%s2992_s4 + $0x450] sm:$0xff] %v1618_v55  ;;  %v1620_v42 = vpop.f32.mrb[129].mxu1 }
 0x344   : > { %1865 = vst.msk [vmem:[%s2992_s4 + $0x458] sm:$0xff] %vm1728_vm1, %v1620_v42 }
 0x346   : > { %v1624_v59 = vpop.f32.mrb[130].mxu1 }
 0x347   : > { %1868 = vst [vmem:[%s2992_s4 + $0x470] sm:$0xff] %v1624_v59  ;;  %v1626_v25 = vpop.f32.mrb[131].mxu1 }
 0x348   : > { %1869 = vst.msk [vmem:[%s2992_s4 + $0x478] sm:$0xff] %vm1728_vm1, %v1626_v25 }
 0x34a   : > { %v1630_v62 = vpop.f32.mrb[132].mxu1 }
 0x34b   : > { %1872 = vst [vmem:[%s2992_s4 + $0x490] sm:$0xff] %v1630_v62  ;;  %v1632_v50 = vpop.f32.mrb[133].mxu1 }
 0x34c   : > { %1873 = vst.msk [vmem:[%s2992_s4 + $0x498] sm:$0xff] %vm1728_vm1, %v1632_v50 }
 0x34e   : > { %v1636_v0 = vpop.f32.mrb[134].mxu1 }
 0x34f   : > { %1876 = vst [vmem:[%s2992_s4 + $0x4b0] sm:$0xff] %v1636_v0  ;;  %v1638_v27 = vpop.f32.mrb[135].mxu1 }
 0x350   : > { %1877 = vst.msk [vmem:[%s2992_s4 + $0x4b8] sm:$0xff] %vm1728_vm1, %v1638_v27 }
 0x352   : > { %v1642_v2 = vpop.f32.mrb[136].mxu1 }
 0x353   : > { %1880 = vst [vmem:[%s2992_s4 + $0x4d0] sm:$0xff] %v1642_v2  ;;  %v1644_v57 = vpop.f32.mrb[137].mxu1 }
 0x354   : > { %1881 = vst.msk [vmem:[%s2992_s4 + $0x4d8] sm:$0xff] %vm1728_vm1, %v1644_v57 }
 0x356   : > { %v1648_v4 = vpop.f32.mrb[138].mxu1 }
 0x357   : > { %1884 = vst [vmem:[%s2992_s4 + $0x4f0] sm:$0xff] %v1648_v4  ;;  %v1650_v29 = vpop.f32.mrb[139].mxu1 }
 0x358   : > { %1885 = vst.msk [vmem:[%s2992_s4 + $0x4f8] sm:$0xff] %vm1728_vm1, %v1650_v29 }
 0x35a   : > { %v1654_v6 = vpop.f32.mrb[140].mxu1 }
 0x35b   : > { %1888 = vst [vmem:[%s2992_s4 + $0x510] sm:$0xff] %v1654_v6  ;;  %v1656_v60 = vpop.f32.mrb[141].mxu1 }
 0x35c   : > { %1889 = vst.msk [vmem:[%s2992_s4 + $0x518] sm:$0xff] %vm1728_vm1, %v1656_v60 }
 0x35e   : > { %v1660_v8 = vpop.f32.mrb[142].mxu1 }
 0x35f   : > { %1892 = vst [vmem:[%s2992_s4 + $0x530] sm:$0xff] %v1660_v8  ;;  %v1662_v31 = vpop.f32.mrb[143].mxu1 }
 0x360   : > { %1893 = vst.msk [vmem:[%s2992_s4 + $0x538] sm:$0xff] %vm1728_vm1, %v1662_v31 }
 0x362   : > { %v1666_v10 = vpop.f32.mrb[144].mxu1 }
 0x363   : > { %1896 = vst [vmem:[%s2992_s4 + $0x550] sm:$0xff] %v1666_v10  ;;  %v1668_v63 = vpop.f32.mrb[145].mxu1 }
 0x364   : > { %1897 = vst.msk [vmem:[%s2992_s4 + $0x558] sm:$0xff] %vm1728_vm1, %v1668_v63 }
 0x366   : > { %v1672_v12 = vpop.f32.mrb[146].mxu1 }
 0x367   : > { %1900 = vst [vmem:[%s2992_s4 + $0x570] sm:$0xff] %v1672_v12  ;;  %v1674_v33 = vpop.f32.mrb[147].mxu1 }
 0x368   : > { %1901 = vst.msk [vmem:[%s2992_s4 + $0x578] sm:$0xff] %vm1728_vm1, %v1674_v33 }
 0x36a   : > { %v1678_v16 = vpop.f32.mrb[148].mxu1 }
 0x36b   : > { %1904 = vst [vmem:[%s2992_s4 + $0x590] sm:$0xff] %v1678_v16  ;;  %v1680_v14 = vpop.f32.mrb[149].mxu1 }
 0x36c   : > { %1905 = vst.msk [vmem:[%s2992_s4 + $0x598] sm:$0xff] %vm1728_vm1, %v1680_v14 }
 0x36e   : > { %v1684_v20 = vpop.f32.mrb[150].mxu1 }
 0x36f   : > { %1908 = vst [vmem:[%s2992_s4 + $0x5b0] sm:$0xff] %v1684_v20  ;;  %v1686_v35 = vpop.f32.mrb[151].mxu1 }
 0x370   : > { %1909 = vst.msk [vmem:[%s2992_s4 + $0x5b8] sm:$0xff] %vm1728_vm1, %v1686_v35 }
 0x372   : > { %v1690_v24 = vpop.f32.mrb[152].mxu1 }
 0x373   : > { %1912 = vst [vmem:[%s2992_s4 + $0x5d0] sm:$0xff] %v1690_v24  ;;  %v1692_v3 = vpop.f32.mrb[153].mxu1 }
 0x374   : > { %1913 = vst.msk [vmem:[%s2992_s4 + $0x5d8] sm:$0xff] %vm1728_vm1, %v1692_v3 }
 0x376   : > { %v1696_v28 = vpop.f32.mrb[154].mxu1 }
 0x377   : > { %1916 = vst [vmem:[%s2992_s4 + $0x5f0] sm:$0xff] %v1696_v28  ;;  %v1698_v37 = vpop.f32.mrb[155].mxu1 }
 0x378   : > { %1917 = vst.msk [vmem:[%s2992_s4 + $0x5f8] sm:$0xff] %vm1728_vm1, %v1698_v37 }
 0x37a   : > { %v1702_v32 = vpop.f32.mrb[156].mxu1 }
 0x37b   : > { %1920 = vst [vmem:[%s2992_s4 + $0x610] sm:$0xff] %v1702_v32  ;;  %v1704_v7 = vpop.f32.mrb[157].mxu1 }
 0x37c   : > { %1921 = vst.msk [vmem:[%s2992_s4 + $0x618] sm:$0xff] %vm1728_vm1, %v1704_v7 }
 0x37e   : > { %v1708_v36 = vpop.f32.mrb[158].mxu1 }
 0x37f   : > { %1924 = vst [vmem:[%s2992_s4 + $0x630] sm:$0xff] %v1708_v36  ;;  %v1710_v39 = vpop.f32.mrb[159].mxu1 }
 0x380   : > { %1925 = vst.msk [vmem:[%s2992_s4 + $0x638] sm:$0xff] %vm1728_vm1, %v1710_v39 }
 0x382   : > { %v1714_v40 = vpop.f32.mrb[160].mxu1 }
 0x383   : > { %1928 = vst [vmem:[%s2992_s4 + $0x650] sm:$0xff] %v1714_v40  ;;  %v1716_v11 = vpop.f32.mrb[161].mxu1 }
 0x384   : > { %1929 = vst.msk [vmem:[%s2992_s4 + $0x658] sm:$0xff] %vm1728_vm1, %v1716_v11 }
 0x386   : > { %v1720_v44 = vpop.f32.mrb[162].mxu1 }
 0x387   : > { %1932 = vst [vmem:[%s2992_s4 + $0x670] sm:$0xff] %v1720_v44  ;;  %v1722_v41 = vpop.f32.mrb[163].mxu1 }
 0x388   : > { %1933 = vst.msk [vmem:[%s2992_s4 + $0x678] sm:$0xff] %vm1728_vm1, %v1722_v41 }
 0x389   : > { %2334 = shalt.err (!%p2331_p7)
}
 0x38a   : > { %s2335_s28 = scalar_lea.hbm %s3409_s10, 26624  ;;  %s2339_s5 = scalar_lea.hbm %s3473_s3, 159744 }
 0x38b   : > { %p2336_p9 = scmp.ne.s32.totalorder %s3409_s10, %s2335_s28  ;;  %p2340_p12 = scmp.lt.u32.totalorder %s3409_s10, %s3473_s3 }
 0x38c   : > { %p2341_p13 = scmp.lt.u32.totalorder %s2339_s5, %s2335_s28  ;;  %p2343_p1 = scmp.lt.u32.totalorder %s2335_s28, %s3409_s10 }
 0x38d   : > { %p2337_p10 = pnand %p2336_p9, %p2493_p3 }
 0x38e   : > { %p2342_p0 = por %p2341_p13, %p2340_p12 }
 0x38f   : > { %p2338_p11 = pneg %p2337_p10 }
 0x390   : > { %p2344_p2 = por %p2343_p1, %p2342_p0 }
 0x392   : > { %p2345_p4 = pnand %p2344_p2, %p2338_p11 }
 0x394   : > { %2348 = shalt.err (!%p2345_p4)
}
 0x395   : > { %s2420_s8 = smov 512   ;;  %s2421_s15 = smov 32  }
 0x396   : > { %2246 = dma.vmem_to_hbm [thread:$0]  (%p2493_p3), %s3411_s9, 26624, %s3409_s10, %s3418_s11, %s2420_s8, %s2420_s8, %s2421_s15  }
 0x397 PF: > { %p2252_p5 = scmp.ge.s32.totalorder %s2415_s19, 2  ;;  %s1965_s16 = sand.u32 1, %s2387_s12  }
 0x398   : > { %s1966_s20 = scalar_lea.sflag [#allocation3], %s1965_s16 }
 0x399   : > { %p2249_p6 = pnand %p2252_p5, %p2502_p8 }
 0x39b   : > { %2382 = dma.done.wait (!%p2249_p6), %s1966_s20, 26624  }
 0x39c   : > { %2384 = vsyncadd (!%p2249_p6), %s1966_s20, 4294940672  ;;  %s16_s19 = sadd.s32 1, %s2415_s19   ;;  %s3476_s12 = smov %s2391_s13 }
 0x39d   : > { %p13_p7 = scmp.ge.s32.totalorder %s16_s19, 8   ;;  %s3477_s13 = smov %s2395_s14 }
 0x39e   : > { %s3478_s14 = smov %s2511_s30  ;;  %s3479_s15 = smov %s2407_s17 }
 0x39f   : > { %s3480_s16 = smov %s2411_s18  ;;  %s3481_s17 = smov %s3484_s22 }
 0x3a0   : > { %s3482_s18 = smov %s3488_s23  ;;  %15 = sbr.rel (!%p13_p7) target bundleno = 5 (0x5), region = 70 }
 0x3a7   :  { %1971 = vsyncpa [#allocation3], 1 }
 0x3a8   :  { %1973 = vsyncpa [#allocation3 + $0x1], 1 }

// kernel: quantization_layer_forward.2
= control target key start
LH: loop header
LB: loop body
LE: loop exit
PB: predicated region body
PF: predicated region fallthrough
CT: control target
= control target key end

     0   :  { %s6292_s0 = inlined_call_operand.vmem [shape: f32[2,1,1,128], index: 0, kind: input, shape index: {}]   ;;  %s6293_s1 = inlined_call_operand.vmem [shape: s32[2,1,128,1], index: 1, kind: input, shape index: {}]   ;;  %s6294_s2 = inlined_call_operand.vmem [shape: f32[128,1], index: 2, kind: input, shape index: {}]   ;;  %s6295_s3 = inlined_call_operand.vmem [shape: f32[128,1], index: 3, kind: input, shape index: {}]   ;;  %s6296_s4 = inlined_call_operand.hbm [shape: bf16[128,128], index: 4, kind: input, shape index: {}]   ;;  %s6297_s5 = inlined_call_operand.vmem [shape: f32[128,1], index: 5, kind: input, shape index: {}]   ;;  %s6298_s6 = inlined_call_operand.vmem [shape: f32[128,1], index: 6, kind: input, shape index: {}]   ;;  %s6299_s7 = inlined_call_operand.<no memory space> [shape: f32[1,1], index: 7, kind: input, shape index: {}]   ;;  %s6300_s8 = inlined_call_operand.vmem [shape: f32[2,9,256], index: 8, kind: output, shape index: {}]  }
   0x1   :  { %v13_v0 = vstv %s6299_s7 }
   0x2   :  { %14 = vst [vmem:[#allocation3] sm:$0x1] %v13_v0 }
   0x3   :  { %15 = vsyncpa [#allocation5], 0  ;;  %s4763_s29 = smov 0   ;;  %s4765_s30 = smov 0  }
   0x4   :  { %s4767_s9 = smov 0  }
   0x5 LB: > { %s4024_s7 = sadd.s32 4294967295, %s4707_s9   ;;  %s33_s10 = sadd.s32 1, %s4703_s30  ;;  %s4707_s9 = sphi %s4767_s9, %s21_s9   ;;  %s4703_s30 = sphi %s4765_s30, %s6431_s30   ;;  %s4699_s29 = sphi %s4763_s29, %s6430_s29  }
   0x6   : > { %p35_p0 = scmp.ge.s32.totalorder %s33_s10, 2  ;;  %p4026_p1 = scmp.ge.s32.totalorder %s4707_s9, 1 }
   0x7   : > { %p246_p2 = scmp.lt.s32.totalorder %s4707_s9, 3  ;;  %p4788_p4 = scmp.eq.s32.totalorder %s4024_s7, 0 }
   0x8   : > { %s6433_s10 = smov (%p35_p0, %s33_s10), 0  ;;  %s4709_s13 = smov [#allocation4]  }
   0x9   : > { %p4784_p3 = pnand %p4026_p1, %p246_p2  ;;  %s264_s14 = sshll.u32 %s4709_s13, 4  ;;  %s265_s14 = int_to_ptr.vmem [resolvable:$true] %s264_s14 }
   0xa   : > { %s6358_s12 = scalar_select %p4788_p4, 1, 0 }
   0xb   : > { %s6357_s11 = scalar_select %p4784_p3, 1, 0 }
   0xc   : > { %p4579_p5 = pneg %p4784_p3  ;;  %s4653_s18 = scalar_lea.hbm %s6296_s4, 1024 }
   0xd   : > { %p4654_p7 = scmp.ne.s32.totalorder %s6296_s4, %s4653_s18  ;;  %p4660_p11 = scmp.lt.u32.totalorder %s4653_s18, %s6296_s4 }
   0xe   : > { %p4796_p6 = pnand %p4788_p4, %p4579_p5 }
  0x10   : > { %p4655_p8 = pneg %p4796_p6 }
  0x12   : > { %p4656_p9 = pnand %p4655_p8, %p4654_p7 }
  0x14   : > { %p4657_p10 = pneg %p4656_p9 }
  0x16   : > { %p4662_p12 = pnand %p4660_p11, %p4657_p10 }
  0x18   : > { %4665 = shalt.err (!%p4662_p12)
}
  0x19   : > { %s4666_s23 = scalar_lea.vmem %s265_s14, 1024  ;;  %p4674_p2 = scmp.lt.s32.totalorder %s265_s14, %s265_s14 }
  0x1a   : > { %p4667_p13 = scmp.ne.s32.totalorder %s265_s14, %s4666_s23  ;;  %p4675_p5 = scmp.lt.s32.totalorder %s4666_s23, %s4666_s23 }
  0x1c   : > { %p4669_p0 = pnand %p4667_p13, %p4655_p8  ;;  %p4676_p4 = por %p4675_p5, %p4674_p2 }
  0x1e   : > { %p4670_p1 = pneg %p4669_p0 }
  0x20   : > { %p4677_p3 = pnand %p4676_p4, %p4670_p1 }
  0x22   : > { %4680 = shalt.err (!%p4677_p3)
}
  0x23   : > { %s4710_s24 = smov 64   ;;  %s4711_s25 = smov 4  }
  0x24   : > { %4582 = dma.hbm_to_vmem [thread:$0]  (!%p4796_p6), %s6296_s4, 1024, %s265_s14, [#allocation5], %s4710_s24, %s4710_s24, %s4711_s25  }
  0x25   : > { %p6360_p7 = scmp.ne.s32.totalorder %s6357_s11, 0 }
  0x27   : > { %310 = sbr.rel (%p6360_p7) target bundleno = 1018 (0x3fa), region = 52 }
  0x2e   : > { %p6361_p9 = scmp.ne.s32.totalorder %s6358_s12, 0 }
  0x30   : > { %4694 = dma.done.wait (%p6361_p9), [#allocation5], 1024  }
  0x31   : > { %4696 = vsyncadd (%p6361_p9), [#allocation5], 4294966272  ;;  %v4712_v1 = vmov 0   ;;  %v4825_v2 = vld [vmem:[%s6294_s2 + $0x10] sm:$0xff]  ;;  %v4830_v3 = vld [vmem:[%s6294_s2] sm:$0xff]  ;;  %p354_p3 = scmp.lt.s32.totalorder %s4699_s29, 1 }
  0x32   : > { %4616 = vset.pattern.permute.xlu1 %v4712_v1  ;;  %4615 = vset.pattern.permute.xlu0 %v4712_v1  ;;  %v4837_v4 = vld [vmem:[%s6294_s2 + $0x18] sm:$0xff]  ;;  %v4842_v5 = vld [vmem:[%s6294_s2 + $0x8] sm:$0xff]  ;;  %v4854_v7 = vld [vmem:[%s6294_s2 + $0x20] sm:$0xff]  ;;  %v679_v31 = vmul.f32 0.0, %v4830_v3  ;;  %v681_v33 = vmul.f32 0.0, %v4825_v2  ;;  %v1217_v51 = vmul.f32 0.125, %v4830_v3 }
  0x33   : > { %493 = vperm.xlu1 %4616, %v4825_v2   ;;  %483 = vperm.xlu0 %4615, %v4830_v3   ;;  %v4849_v6 = vld [vmem:[%s6294_s2 + $0x28] sm:$0xff]  ;;  %v4861_v8 = vld [vmem:[%s6294_s2 + $0x38] sm:$0xff]  ;;  %v4866_v9 = vld [vmem:[%s6294_s2 + $0x30] sm:$0xff]  ;;  %v680_v30 = vmul.f32 0.0, %v4842_v5  ;;  %v682_v32 = vmul.f32 0.0, %v4837_v4  ;;  %v683_v35 = vmul.f32 0.0, %v4854_v7 }
  0x34   : > { %v4871_v10 = vld [vmem:[%s6294_s2 + $0x48] sm:$0xff]  ;;  %v4878_v11 = vld [vmem:[%s6294_s2 + $0x40] sm:$0xff]  ;;  %v4883_v12 = vld [vmem:[%s6294_s2 + $0x58] sm:$0xff]  ;;  %v684_v34 = vmul.f32 0.0, %v4849_v6  ;;  %v686_v36 = vmul.f32 0.0, %v4861_v8  ;;  %v685_v37 = vmul.f32 0.0, %v4866_v9 }
  0x35   : > { %v4890_v13 = vld [vmem:[%s6294_s2 + $0x50] sm:$0xff]  ;;  %v4897_v14 = vld [vmem:[%s6294_s2 + $0x68] sm:$0xff]  ;;  %v4902_v15 = vld [vmem:[%s6294_s2 + $0x60] sm:$0xff]  ;;  %v688_v38 = vmul.f32 0.0, %v4871_v10  ;;  %v687_v39 = vmul.f32 0.0, %v4878_v11  ;;  %v690_v40 = vmul.f32 0.0, %v4883_v12 }
  0x36   : > { %v4909_v16 = vld [vmem:[%s6294_s2 + $0x78] sm:$0xff]  ;;  %v4914_v17 = vld [vmem:[%s6294_s2 + $0x70] sm:$0xff]  ;;  %v417_v18 = vld [vmem:[%s6295_s3 + $0x8] sm:$0xff]  ;;  %v689_v41 = vmul.f32 0.0, %v4890_v13  ;;  %v692_v44 = vmul.f32 0.0, %v4897_v14  ;;  %v691_v45 = vmul.f32 0.0, %v4902_v15 }
  0x37   : > { %498 = vperm.xlu1 %4616, %v4837_v4   ;;  %488 = vperm.xlu0 %4615, %v4842_v5   ;;  %v416_v19 = vld [vmem:[%s6295_s3] sm:$0xff]  ;;  %v419_v20 = vld [vmem:[%s6295_s3 + $0x18] sm:$0xff]  ;;  %v418_v21 = vld [vmem:[%s6295_s3 + $0x10] sm:$0xff]  ;;  %v694_v48 = vmul.f32 0.0, %v4909_v16  ;;  %v693_v49 = vmul.f32 0.0, %v4914_v17  ;;  %v1218_v50 = vmul.f32 0.125, %v4842_v5 }
  0x38   : > { %v421_v22 = vld [vmem:[%s6295_s3 + $0x28] sm:$0xff]  ;;  %v420_v23 = vld [vmem:[%s6295_s3 + $0x20] sm:$0xff]  ;;  %v423_v24 = vld [vmem:[%s6295_s3 + $0x38] sm:$0xff]  ;;  %v1220_v52 = vmul.f32 0.125, %v4837_v4  ;;  %v1219_v53 = vmul.f32 0.125, %v4825_v2  ;;  %v1539_v54 = vmul.f32 0.25, %v4842_v5 }
  0x39   : > { %v422_v25 = vld [vmem:[%s6295_s3 + $0x30] sm:$0xff]  ;;  %v425_v26 = vld [vmem:[%s6295_s3 + $0x48] sm:$0xff]  ;;  %v424_v27 = vld [vmem:[%s6295_s3 + $0x40] sm:$0xff]  ;;  %v1538_v55 = vmul.f32 0.25, %v4830_v3  ;;  %v1222_v57 = vmul.f32 0.125, %v4849_v6  ;;  %v1221_v58 = vmul.f32 0.125, %v4854_v7 }
  0x3a   : > { %v427_v28 = vld [vmem:[%s6295_s3 + $0x58] sm:$0xff]  ;;  %v426_v29 = vld [vmem:[%s6295_s3 + $0x50] sm:$0xff]  ;;  %v429_v42 = vld [vmem:[%s6295_s3 + $0x68] sm:$0xff]  ;;  %v1541_v59 = vmul.f32 0.25, %v4837_v4  ;;  %v1540_v60 = vmul.f32 0.25, %v4825_v2  ;;  %v1224_v61 = vmul.f32 0.125, %v4861_v8 }
  0x3b   : > { %508 = vperm.xlu1 %4616, %v4849_v6   ;;  %503 = vperm.xlu0 %4615, %v4854_v7   ;;  %v428_v43 = vld [vmem:[%s6295_s3 + $0x60] sm:$0xff]  ;;  %v431_v46 = vld [vmem:[%s6295_s3 + $0x78] sm:$0xff]  ;;  %v430_v47 = vld [vmem:[%s6295_s3 + $0x70] sm:$0xff]  ;;  %v1223_v62 = vmul.f32 0.125, %v4866_v9  ;;  %v1543_v63 = vmul.f32 0.25, %v4849_v6  ;;  %v1542_v0 = vmul.f32 0.25, %v4854_v7 }
  0x3c   : > { %v4988_v56 = vld [vmem:[#allocation4] sm:$0xff]   ;;  %v1226_v1 = vmul.f32 0.125, %v4871_v10  ;;  %s6435_s29 = smov (!%p354_p3, %s4699_s29), 1 }
  0x3d   : > { %4271 = vmatprep.mubr.bf16.mxu0 %v4988_v56  ;;  %4303 = vmatprep.mubr.bf16.mxu1 %v4988_v56  ;;  %s5069_s18 = scalar_lea.vmem %s6292_s0, %s6435_s29  ;;  %s4109_s15 = sshll.u32 %s6435_s29, 7 }
  0x3e   : > { %s5517_s20 = scalar_lea.vmem %s6293_s1, %s4109_s15  ;;  %s4110_s7 = sshll.u32 %s6435_s29, 5 }
  0x3f   : > { %518 = vperm.xlu1 %4616, %v4861_v8   ;;  %513 = vperm.xlu0 %4615, %v4866_v9   ;;  %s6098_s11 = scalar_lea.vmem %s6300_s8, %s4110_s7 }
  0x43   : > { %528 = vperm.xlu1 %4616, %v4871_v10   ;;  %523 = vperm.xlu0 %4615, %v4878_v11  }
  0x47   : > { %538 = vperm.xlu1 %4616, %v4883_v12   ;;  %533 = vperm.xlu0 %4615, %v4890_v13  }
  0x4b   : > { %548 = vperm.xlu1 %4616, %v4897_v14   ;;  %543 = vperm.xlu0 %4615, %v4902_v15  }
  0x4f   : > { %558 = vperm.xlu1 %4616, %v4909_v16   ;;  %553 = vperm.xlu0 %4615, %v4914_v17  }
  0x53   : > { %590 = vperm.xlu1 %4616, %v417_v18   ;;  %585 = vperm.xlu0 %4615, %v416_v19   ;;  %v1225_v18 = vmul.f32 0.125, %v4878_v11  ;;  %v1545_v19 = vmul.f32 0.25, %v4861_v8 }
  0x57   : > { %600 = vperm.xlu1 %4616, %v419_v20   ;;  %595 = vperm.xlu0 %4615, %v418_v21   ;;  %v1544_v20 = vmul.f32 0.25, %v4866_v9 }
  0x5b   : > { %610 = vperm.xlu1 %4616, %v421_v22   ;;  %605 = vperm.xlu0 %4615, %v420_v23   ;;  %v1228_v23 = vmul.f32 0.125, %v4883_v12 }
  0x5f   : > { %620 = vperm.xlu1 %4616, %v423_v24   ;;  %615 = vperm.xlu0 %4615, %v422_v25   ;;  %v1227_v24 = vmul.f32 0.125, %v4890_v13 }
  0x63   : > { %630 = vperm.xlu1 %4616, %v425_v26   ;;  %625 = vperm.xlu0 %4615, %v424_v27   ;;  %v1547_v27 = vmul.f32 0.25, %v4871_v10 }
  0x67   : > { %640 = vperm.xlu1 %4616, %v427_v28   ;;  %635 = vperm.xlu0 %4615, %v426_v29   ;;  %v1546_v28 = vmul.f32 0.25, %v4878_v11 }
  0x6b   : > { %702 = vperm.xlu1 %4616, %v680_v30   ;;  %697 = vperm.xlu0 %4615, %v679_v31   ;;  %v1230_v31 = vmul.f32 0.125, %v4897_v14 }
  0x6f   : > { %712 = vperm.xlu1 %4616, %v682_v32   ;;  %707 = vperm.xlu0 %4615, %v681_v33   ;;  %v1229_v32 = vmul.f32 0.125, %v4902_v15 }
  0x73   : > { %722 = vperm.xlu1 %4616, %v684_v34   ;;  %717 = vperm.xlu0 %4615, %v683_v35   ;;  %v1549_v35 = vmul.f32 0.25, %v4883_v12 }
  0x77   : > { %732 = vperm.xlu1 %4616, %v686_v36   ;;  %727 = vperm.xlu0 %4615, %v685_v37   ;;  %v1548_v36 = vmul.f32 0.25, %v4890_v13 }
  0x7b   : > { %742 = vperm.xlu1 %4616, %v688_v38   ;;  %737 = vperm.xlu0 %4615, %v687_v39   ;;  %v1232_v39 = vmul.f32 0.125, %v4909_v16 }
  0x7f   : > { %752 = vperm.xlu1 %4616, %v690_v40   ;;  %747 = vperm.xlu0 %4615, %v689_v41   ;;  %v1231_v40 = vmul.f32 0.125, %v4914_v17 }
  0x83   : > { %650 = vperm.xlu1 %4616, %v429_v42   ;;  %645 = vperm.xlu0 %4615, %v428_v43   ;;  %v1551_v43 = vmul.f32 0.25, %v4897_v14 }
  0x87   : > { %762 = vperm.xlu1 %4616, %v692_v44   ;;  %757 = vperm.xlu0 %4615, %v691_v45   ;;  %v1550_v44 = vmul.f32 0.25, %v4902_v15 }
  0x8b   : > { %660 = vperm.xlu1 %4616, %v431_v46   ;;  %655 = vperm.xlu0 %4615, %v430_v47   ;;  %v1553_v47 = vmul.f32 0.25, %v4909_v16 }
  0x8f   : > { %772 = vperm.xlu1 %4616, %v694_v48   ;;  %767 = vperm.xlu0 %4615, %v693_v49   ;;  %v1552_v48 = vmul.f32 0.25, %v4914_v17 }
  0x93   : > { %1240 = vperm.xlu1 %4616, %v1218_v50   ;;  %1235 = vperm.xlu0 %4615, %v1217_v51   ;;  %v1860_v51 = vmul.f32 0.375, %v4842_v5 }
  0x97   : > { %1250 = vperm.xlu1 %4616, %v1220_v52   ;;  %1245 = vperm.xlu0 %4615, %v1219_v53   ;;  %v1859_v52 = vmul.f32 0.375, %v4830_v3 }
  0x9b   : > { %1561 = vperm.xlu1 %4616, %v1539_v54   ;;  %1556 = vperm.xlu0 %4615, %v1538_v55   ;;  %v1862_v55 = vmul.f32 0.375, %v4837_v4 }
  0x9f   : > { %1260 = vperm.xlu1 %4616, %v1222_v57   ;;  %1255 = vperm.xlu0 %4615, %v1221_v58   ;;  %v1861_v57 = vmul.f32 0.375, %v4825_v2 }
  0xa3   : > { %1571 = vperm.xlu1 %4616, %v1541_v59   ;;  %1566 = vperm.xlu0 %4615, %v1540_v60   ;;  %v6304_v60 = vlaneseq }
  0xa7   : > { %1270 = vperm.xlu1 %4616, %v1224_v61   ;;  %1265 = vperm.xlu0 %4615, %v1223_v62   ;;  %v2181_v61 = vmul.f32 0.5, %v4842_v5  ;;  %v2180_v62 = vmul.f32 0.5, %v4830_v3 }
  0xab   : > { %1581 = vperm.xlu1 %4616, %v1543_v63   ;;  %1576 = vperm.xlu0 %4615, %v1542_v0  }
  0xaf   : > { %1280 = vperm.xlu1 %4616, %v1226_v1   ;;  %1275 = vperm.xlu0 %4615, %v1225_v18   ;;  %v5061_v1 = vshrl.u32 %v6304_v60, 7  ;;  %v1864_v18 = vmul.f32 0.375, %v4849_v6 }
  0xb1   : > { %6367 = vst [vmem:[#allocation12_spill] sm:$0xff] %v5061_v1 }
  0xb2   : > { %v5004_v21 = vpop.permute.xlu1 %493  ;;  %v5006_v22 = vpop.permute.xlu0 %483 }
  0xb3   : > { %6362 = vst [vmem:[#allocation7_spill] sm:$0xff] %v5004_v21  ;;  %1591 = vperm.xlu1 %4616, %v1545_v19   ;;  %1586 = vperm.xlu0 %4615, %v1544_v20   ;;  %v1863_v19 = vmul.f32 0.375, %v4854_v7 }
  0xb6   : > { %v5010_v25 = vpop.permute.xlu1 %498  ;;  %v5012_v26 = vpop.permute.xlu0 %488 }
  0xb7   : > { %6363 = vst [vmem:[#allocation8_spill] sm:$0xff] %v5010_v25  ;;  %1290 = vperm.xlu1 %4616, %v1228_v23   ;;  %1285 = vperm.xlu0 %4615, %v1227_v24  }
  0xba   : > { %v5016_v29 = vpop.permute.xlu1 %508  ;;  %v5018_v30 = vpop.permute.xlu0 %503 }
  0xbb   : > { %6364 = vst [vmem:[#allocation9_spill] sm:$0xff] %v5016_v29  ;;  %6365 = vst [vmem:[#allocation10_spill] sm:$0xff] %v5018_v30  ;;  %1601 = vperm.xlu1 %4616, %v1547_v27   ;;  %1596 = vperm.xlu0 %4615, %v1546_v28   ;;  %v2183_v27 = vmul.f32 0.5, %v4837_v4  ;;  %v2182_v28 = vmul.f32 0.5, %v4825_v2 }
  0xbe   : > { %v5022_v33 = vpop.permute.xlu1 %518  ;;  %v5024_v34 = vpop.permute.xlu0 %513 }
  0xbf   : > { %1300 = vperm.xlu1 %4616, %v1230_v31   ;;  %1295 = vperm.xlu0 %4615, %v1229_v32   ;;  %v5079_v31 = vld [vmem:[%s5069_s18] ss:$0 sm:$0xff] }
  0xc0   : > { %v571_v24 = vmul.f32 %v5079_v31, %v5018_v30 }
  0xc2   : > { %v5028_v37 = vpop.permute.xlu1 %528  ;;  %v5030_v38 = vpop.permute.xlu0 %523 }
  0xc3   : > { %1611 = vperm.xlu1 %4616, %v1549_v35   ;;  %1606 = vperm.xlu0 %4615, %v1548_v36   ;;  %v1866_v36 = vmul.f32 0.375, %v4861_v8 }
  0xc6   : > { %v5034_v41 = vpop.permute.xlu1 %538  ;;  %v5036_v42 = vpop.permute.xlu0 %533 }
  0xc7   : > { %1310 = vperm.xlu1 %4616, %v1232_v39   ;;  %1305 = vperm.xlu0 %4615, %v1231_v40   ;;  %v1865_v39 = vmul.f32 0.375, %v4866_v9 }
  0xca   : > { %v5040_v45 = vpop.permute.xlu1 %548  ;;  %v5042_v46 = vpop.permute.xlu0 %543 }
  0xcb   : > { %1621 = vperm.xlu1 %4616, %v1551_v43   ;;  %1616 = vperm.xlu0 %4615, %v1550_v44   ;;  %v567_v44 = vmul.f32 %v5079_v31, %v5006_v22 }
  0xce   : > { %v5046_v49 = vpop.permute.xlu1 %558  ;;  %v5048_v50 = vpop.permute.xlu0 %553 }
  0xcf   : > { %6366 = vst [vmem:[#allocation11_spill] sm:$0xff] %v5046_v49  ;;  %1631 = vperm.xlu1 %4616, %v1553_v47   ;;  %1626 = vperm.xlu0 %4615, %v1552_v48   ;;  %v568_v47 = vmul.f32 %v5079_v31, %v5012_v26  ;;  %v2185_v48 = vmul.f32 0.5, %v4849_v6 }
  0xd2   : > { %v591_v53 = vpop.permute.xlu1 %590  ;;  %v586_v54 = vpop.permute.xlu0 %585 }
  0xd3   : > { %1882 = vperm.xlu1 %4616, %v1860_v51   ;;  %1877 = vperm.xlu0 %4615, %v1859_v52   ;;  %v2184_v51 = vmul.f32 0.5, %v4854_v7  ;;  %v5097_v52 = vadd.f32 %v591_v53, %v568_v47  ;;  %v1867_v53 = vmul.f32 0.375, %v4878_v11  ;;  %v572_v47 = vmul.f32 %v5079_v31, %v5016_v29 }
  0xd6   : > { %v601_v58 = vpop.permute.xlu1 %600  ;;  %v596_v59 = vpop.permute.xlu0 %595 }
  0xd7   : > { %1892 = vperm.xlu1 %4616, %v1862_v55   ;;  %1887 = vperm.xlu0 %4615, %v1861_v57   ;;  %v5099_v55 = vadd.f32 %v586_v54, %v567_v44  ;;  %v569_v57 = vmul.f32 %v5079_v31, %v5004_v21 }
  0xda   : > { %v611_v63 = vpop.permute.xlu1 %610  ;;  %v606_v0 = vpop.permute.xlu0 %605 }
  0xdb   : > { %2203 = vperm.xlu1 %4616, %v2181_v61   ;;  %2198 = vperm.xlu0 %4615, %v2180_v62   ;;  %v5123_v1 = vadd.f32 %v606_v0, %v571_v24 }
  0xde   : > { %v5071_v20 = vpop.permute.xlu1 %620  ;;  %v5073_v23 = vpop.permute.xlu0 %615 }
  0xdf   : > { %1902 = vperm.xlu1 %4616, %v1864_v18   ;;  %1897 = vperm.xlu0 %4615, %v1863_v19   ;;  %v1868_v18 = vmul.f32 0.375, %v4871_v10  ;;  %v570_v19 = vmul.f32 %v5079_v31, %v5010_v25  ;;  %v574_v25 = vmul.f32 %v5079_v31, %v5022_v33 }
  0xe1   : > { %v5109_v54 = vadd.f32 %v601_v58, %v570_v19  ;;  %v2187_v58 = vmul.f32 0.5, %v4861_v8  ;;  %v5121_v19 = vadd.f32 %v611_v63, %v572_v47  ;;  %v5133_v24 = vadd.f32 %v5071_v20, %v574_v25 }
  0xe2   : > { %v5081_v32 = vpop.permute.xlu1 %630  ;;  %v5083_v35 = vpop.permute.xlu0 %625  ;;  %v2189_v20 = vmul.f32 0.5, %v4871_v10 }
  0xe3   : > { %2213 = vperm.xlu1 %4616, %v2183_v27   ;;  %2208 = vperm.xlu0 %4615, %v2182_v28  }
  0xe6   : > { %v5087_v40 = vpop.permute.xlu1 %640  ;;  %v5089_v43 = vpop.permute.xlu0 %635 }
  0xe7   : > { %1912 = vperm.xlu1 %4616, %v1866_v36   ;;  %1907 = vperm.xlu0 %4615, %v1865_v39   ;;  %v5111_v36 = vadd.f32 %v596_v59, %v569_v57 }
  0xea   : > { %v703_v61 = vpop.permute.xlu1 %702  ;;  %v698_v62 = vpop.permute.xlu0 %697 }
  0xeb   : > { %v776_v27 = vsub.f32 %v5097_v52, %v703_v61  ;;  %v775_v28 = vsub.f32 %v5099_v55, %v698_v62  ;;  %2223 = vperm.xlu1 %4616, %v2185_v48   ;;  %2218 = vperm.xlu0 %4615, %v2184_v51   ;;  %v2186_v51 = vmul.f32 0.5, %v4866_v9 }
  0xed   : > { %v792_v39 = vmul.f32 0.1, %v776_v27  ;;  %v791_v44 = vmul.f32 0.1, %v775_v28 }
  0xee   : > { %v713_v60 = vpop.permute.xlu1 %712  ;;  %v708_v61 = vpop.permute.xlu0 %707 }
  0xef   : > { %v778_v62 = vsub.f32 %v5109_v54, %v713_v60  ;;  %v777_v48 = vsub.f32 %v5111_v36, %v708_v61  ;;  %1922 = vperm.xlu1 %4616, %v1868_v18   ;;  %1917 = vperm.xlu0 %4615, %v1867_v53   ;;  %v807_v59 = vmax.f32 %v775_v28, %v791_v44  ;;  %v1870_v28 = vmul.f32 0.375, %v4883_v12 }
  0xf0   : > { %v808_v57 = vmax.f32 %v776_v27, %v792_v39  ;;  %v573_v60 = vmul.f32 %v5079_v31, %v5024_v34  ;;  %v1869_v27 = vmul.f32 0.375, %v4890_v13 }
  0xf1   : > { %v794_v29 = vmul.f32 0.1, %v778_v62  ;;  %v793_v30 = vmul.f32 0.1, %v777_v48 }
  0xf2   : > { %v723_v18 = vpop.permute.xlu1 %722  ;;  %v718_v53 = vpop.permute.xlu0 %717  ;;  %v823_v61 = vpack.c.bf16 %v808_v57, %v807_v59  ;;  %v5137_v39 = vadd.f32 %v5073_v23, %v573_v60 }
  0xf3   : > { %v810_v44 = vmax.f32 %v778_v62, %v794_v29  ;;  %v809_v21 = vmax.f32 %v777_v48, %v793_v30  ;;  %v780_v63 = vsub.f32 %v5121_v19, %v723_v18  ;;  %v779_v0 = vsub.f32 %v5123_v1, %v718_v53  ;;  %2233 = vperm.xlu1 %4616, %v2187_v58  }
  0xf4   : > { %2228 = vperm.xlu0 %4615, %v2186_v51   ;;  %4255 = vmatprep.subr.bf16.mxu0 %v823_v61  ;;  %v576_v30 = vmul.f32 %v5079_v31, %v5028_v37  ;;  %v575_v62 = vmul.f32 %v5079_v31, %v5030_v38 }
  0xf5   : > { %v796_v47 = vmul.f32 0.1, %v780_v63  ;;  %v795_v59 = vmul.f32 0.1, %v779_v0  ;;  %4256 = vmatpush3.bf16.msra.mxu0 %v823_v61  ;;  %v824_v29 = vpack.c.bf16 %v810_v44, %v809_v21  ;;  %v2188_v21 = vmul.f32 0.5, %v4878_v11 }
  0xf6   : > { %v733_v48 = vpop.permute.xlu1 %732  ;;  %v728_v25 = vpop.permute.xlu0 %727  ;;  %v5147_v60 = vadd.f32 %v5081_v32, %v576_v30  ;;  %v5151_v18 = vadd.f32 %v5083_v35, %v575_v62  ;;  %v1871_v62 = vmul.f32 0.375, %v4902_v15 }
  0xf7   : > { %v812_v58 = vmax.f32 %v780_v63, %v796_v47  ;;  %v811_v51 = vmax.f32 %v779_v0, %v795_v59  ;;  %v782_v57 = vsub.f32 %v5133_v24, %v733_v48  ;;  %v781_v23 = vsub.f32 %v5137_v39, %v728_v25  ;;  %1932 = vperm.xlu1 %4616, %v1870_v28  }
  0xf8   : > { %1927 = vperm.xlu0 %4615, %v1869_v27   ;;  %4257 = vmatprep.subr.bf16.mxu0 %v824_v29  ;;  %v578_v63 = vmul.f32 %v5079_v31, %v5034_v41  ;;  %v577_v28 = vmul.f32 %v5079_v31, %v5036_v42  ;;  %v1872_v27 = vmul.f32 0.375, %v4897_v14 }
  0xf9   : > { %v798_v53 = vmul.f32 0.1, %v782_v57  ;;  %v797_v61 = vmul.f32 0.1, %v781_v23  ;;  %4258 = vmatpush3.bf16.msra.mxu0 %v824_v29  ;;  %v825_v44 = vpack.c.bf16 %v812_v58, %v811_v51 }
  0xfa   : > { %v743_v0 = vpop.permute.xlu1 %742  ;;  %v738_v32 = vpop.permute.xlu0 %737  ;;  %v5161_v29 = vadd.f32 %v5087_v40, %v578_v63  ;;  %v5165_v48 = vadd.f32 %v5089_v43, %v577_v28  ;;  %v2190_v43 = vmul.f32 0.5, %v4890_v13 }
  0xfb   : > { %v814_v47 = vmax.f32 %v782_v57, %v798_v53  ;;  %v813_v59 = vmax.f32 %v781_v23, %v797_v61  ;;  %v784_v30 = vsub.f32 %v5147_v60, %v743_v0  ;;  %v783_v35 = vsub.f32 %v5151_v18, %v738_v32  ;;  %2243 = vperm.xlu1 %4616, %v2189_v20  }
  0xfc   : > { %2238 = vperm.xlu0 %4615, %v2188_v21   ;;  %4259 = vmatprep.subr.bf16.mxu0 %v825_v44  ;;  %v2191_v53 = vmul.f32 0.5, %v4883_v12 }
  0xfd   : > { %v800_v25 = vmul.f32 0.1, %v784_v30  ;;  %v799_v58 = vmul.f32 0.1, %v783_v35  ;;  %4260 = vmatpush3.bf16.msra.mxu0 %v825_v44  ;;  %v826_v51 = vpack.c.bf16 %v814_v47, %v813_v59  ;;  %v1874_v47 = vmul.f32 0.375, %v4909_v16 }
  0xfe   : > { %v753_v57 = vpop.permute.xlu1 %752  ;;  %v748_v23 = vpop.permute.xlu0 %747  ;;  %v580_v59 = vmul.f32 %v5079_v31, %v5040_v45 }
  0xff   : > { %v816_v61 = vmax.f32 %v784_v30, %v800_v25  ;;  %v815_v20 = vmax.f32 %v783_v35, %v799_v58  ;;  %v786_v40 = vsub.f32 %v5161_v29, %v753_v57  ;;  %v785_v21 = vsub.f32 %v5165_v48, %v748_v23  ;;  %1942 = vperm.xlu1 %4616, %v1872_v27  }
 0x100   : > { %1937 = vperm.xlu0 %4615, %v1871_v62   ;;  %4261 = vmatprep.subr.bf16.mxu0 %v826_v51  ;;  %v579_v30 = vmul.f32 %v5079_v31, %v5042_v46  ;;  %v1873_v62 = vmul.f32 0.375, %v4914_v17 }
 0x101   : > { %v802_v63 = vmul.f32 0.1, %v786_v40  ;;  %v801_v28 = vmul.f32 0.1, %v785_v21  ;;  %4262 = vmatpush3.bf16.msra.mxu0 %v826_v51  ;;  %v827_v44 = vpack.c.bf16 %v816_v61, %v815_v20 }
 0x102   : > { %v651_v0 = vpop.permute.xlu1 %650  ;;  %v646_v32 = vpop.permute.xlu0 %645 }
 0x103   : > { %v818_v35 = vmax.f32 %v786_v40, %v802_v63  ;;  %v817_v27 = vmax.f32 %v785_v21, %v801_v28  ;;  %2253 = vperm.xlu1 %4616, %v2191_v53   ;;  %4263 = vmatprep.subr.bf16.mxu0 %v827_v44  ;;  %v5177_v25 = vadd.f32 %v651_v0, %v580_v59  ;;  %v2193_v53 = vmul.f32 0.5, %v4897_v14 }
 0x104   : > { %2248 = vperm.xlu0 %4615, %v2190_v43   ;;  %v5179_v58 = vadd.f32 %v646_v32, %v579_v30  ;;  %v2192_v40 = vmul.f32 0.5, %v4902_v15  ;;  %v582_v0 = vmul.f32 %v5079_v31, %v5046_v49  ;;  %v581_v32 = vmul.f32 %v5079_v31, %v5048_v50 }
 0x105   : > { %4264 = vmatpush3.bf16.msra.mxu0 %v827_v44  ;;  %v828_v51 = vpack.c.bf16 %v818_v35, %v817_v27  ;;  %v2195_v44 = vmul.f32 0.5, %v4909_v16  ;;  %v2194_v14 = vmul.f32 0.5, %v4914_v17  ;;  %v2502_v31 = vmul.f32 0.625, %v4842_v5 }
 0x106   : > { %v763_v57 = vpop.permute.xlu1 %762  ;;  %v758_v23 = vpop.permute.xlu0 %757 }
 0x107   : > { %v788_v61 = vsub.f32 %v5177_v25, %v763_v57  ;;  %v787_v20 = vsub.f32 %v5179_v58, %v758_v23  ;;  %1952 = vperm.xlu1 %4616, %v1874_v47   ;;  %4265 = vmatprep.subr.bf16.mxu0 %v828_v51  ;;  %v2501_v57 = vmul.f32 0.625, %v4830_v3 }
 0x108   : > { %1947 = vperm.xlu0 %4615, %v1873_v62  }
 0x109   : > { %v804_v21 = vmul.f32 0.1, %v788_v61  ;;  %v803_v43 = vmul.f32 0.1, %v787_v20  ;;  %4266 = vmatpush3.bf16.msra.mxu0 %v828_v51 }
 0x10a   : > { %v661_v63 = vpop.permute.xlu1 %660  ;;  %v656_v28 = vpop.permute.xlu0 %655 }
 0x10b   : > { %v820_v47 = vmax.f32 %v788_v61, %v804_v21  ;;  %v819_v59 = vmax.f32 %v787_v20, %v803_v43  ;;  %2263 = vperm.xlu1 %4616, %v2193_v53   ;;  %v5191_v15 = vadd.f32 %v661_v63, %v582_v0  ;;  %v5193_v30 = vadd.f32 %v656_v28, %v581_v32 }
 0x10c   : > { %2258 = vperm.xlu0 %4615, %v2192_v40   ;;  %v2504_v53 = vmul.f32 0.625, %v4837_v4  ;;  %v2503_v28 = vmul.f32 0.625, %v4825_v2 }
 0x10d   : > { %v829_v35 = vpack.c.bf16 %v820_v47, %v819_v59 }
 0x10e   : > { %v773_v27 = vpop.permute.xlu1 %772  ;;  %v768_v62 = vpop.permute.xlu0 %767 }
 0x10f   : > { %v790_v16 = vsub.f32 %v5191_v15, %v773_v27  ;;  %v789_v51 = vsub.f32 %v5193_v30, %v768_v62  ;;  %2273 = vperm.xlu1 %4616, %v2195_v44   ;;  %4267 = vmatprep.subr.bf16.mxu0 %v829_v35  ;;  %v2823_v27 = vmul.f32 0.75, %v4842_v5 }
 0x110   : > { %2268 = vperm.xlu0 %4615, %v2194_v14   ;;  %4268 = vmatpush3.bf16.msra.mxu0 %v829_v35 }
 0x111   : > { %v806_v17 = vmul.f32 0.1, %v790_v16  ;;  %v805_v23 = vmul.f32 0.1, %v789_v51 }
 0x112   : > { %v1241_v61 = vpop.permute.xlu1 %1240  ;;  %v1236_v20 = vpop.permute.xlu0 %1235 }
 0x113   : > { %v822_v40 = vmax.f32 %v790_v16, %v806_v17  ;;  %v821_v21 = vmax.f32 %v789_v51, %v805_v23  ;;  %v1314_v43 = vsub.f32 %v5097_v52, %v1241_v61  ;;  %v1313_v63 = vsub.f32 %v5099_v55, %v1236_v20  ;;  %2524 = vperm.xlu1 %4616, %v2502_v31   ;;  %v5207_v17 = vld [vmem:[#allocation4 + $0x8] sm:$0xff]  }
 0x114   : > { %2519 = vperm.xlu0 %4615, %v2501_v57   ;;  %v2822_v16 = vmul.f32 0.75, %v4830_v3  ;;  %v2505_v3 = vmul.f32 0.625, %v4854_v7 }
 0x115   : > { %v1330_v44 = vmul.f32 0.1, %v1314_v43  ;;  %v1329_v0 = vmul.f32 0.1, %v1313_v63  ;;  %v830_v32 = vpack.c.bf16 %v822_v40, %v821_v21  ;;  %v2506_v40 = vmul.f32 0.625, %v4849_v6  ;;  %v5210_v21 = vld [vmem:[#allocation4 + $0x10] sm:$0xff]  }
 0x116   : > { %v1251_v47 = vpop.permute.xlu1 %1250  ;;  %v1246_v59 = vpop.permute.xlu0 %1245 }
 0x117   : > { %v1316_v14 = vsub.f32 %v5109_v54, %v1251_v47  ;;  %v1315_v35 = vsub.f32 %v5111_v36, %v1246_v59  ;;  %2534 = vperm.xlu1 %4616, %v2504_v53   ;;  %4269 = vmatprep.subr.bf16.mxu0 %v830_v32  ;;  %v1345_v62 = vmax.f32 %v1313_v63, %v1329_v0  ;;  %v2825_v59 = vmul.f32 0.75, %v4837_v4  ;;  %v5221_v4 = vld [vmem:[#allocation4 + $0x18] sm:$0xff]  }
 0x118   : > { %2529 = vperm.xlu0 %4615, %v2503_v28   ;;  %4270 = vmatpush3.bf16.msra.mxu0 %v830_v32  ;;  %v1346_v51 = vmax.f32 %v1314_v43, %v1330_v44 }
 0x119   : > { %v1332_v31 = vmul.f32 0.1, %v1316_v14  ;;  %v1331_v57 = vmul.f32 0.1, %v1315_v35 }
 0x11a   : > { %v1562_v23 = vpop.permute.xlu1 %1561  ;;  %v1557_v61 = vpop.permute.xlu0 %1556  ;;  %v1361_v20 = vpack.c.bf16 %v1346_v51, %v1345_v62 }
 0x11b   : > { %v1348_v53 = vmax.f32 %v1316_v14, %v1332_v31  ;;  %v1347_v47 = vmax.f32 %v1315_v35, %v1331_v57  ;;  %v1635_v5 = vsub.f32 %v5097_v52, %v1562_v23  ;;  %v1634_v63 = vsub.f32 %v5099_v55, %v1557_v61  ;;  %2845 = vperm.xlu1 %4616, %v2823_v27  }
 0x11c   : > { %2840 = vperm.xlu0 %4615, %v2822_v16   ;;  %4287 = vmatprep.subr.bf16.mxu1 %v1361_v20  ;;  %v2824_v16 = vmul.f32 0.75, %v4825_v2  ;;  %v2507_v2 = vmul.f32 0.625, %v4866_v9 }
 0x11d   : > { %v1651_v43 = vmul.f32 0.1, %v1635_v5  ;;  %v1650_v28 = vmul.f32 0.1, %v1634_v63  ;;  %4272 = vmatmul.mubr.bf16.vlgmr.msra.gmra.mrb[0].mxu0 %v5207_v17  ;;  %4288 = vmatpush3.bf16.msra.mxu1 %v1361_v20  ;;  %v1362_v44 = vpack.c.bf16 %v1348_v53, %v1347_v47  ;;  %v2508_v20 = vmul.f32 0.625, %v4861_v8 }
 0x11e   : > { %v1261_v0 = vpop.permute.xlu1 %1260  ;;  %v1256_v32 = vpop.permute.xlu0 %1255  ;;  %4275 = vmatprep.mubr.bf16.mxu0 %v5210_v21 }
 0x11f   : > { %v1667_v14 = vmax.f32 %v1635_v5, %v1651_v43  ;;  %v1666_v35 = vmax.f32 %v1634_v63, %v1650_v28  ;;  %v1318_v27 = vsub.f32 %v5121_v19, %v1261_v0  ;;  %v1317_v62 = vsub.f32 %v5123_v1, %v1256_v32  ;;  %2544 = vperm.xlu1 %4616, %v2506_v40   ;;  %v5227_v28 = vld [vmem:[#allocation4 + $0x20] sm:$0xff]  }
 0x120   : > { %2539 = vperm.xlu0 %4615, %v2505_v3   ;;  %4289 = vmatprep.subr.bf16.mxu1 %v1362_v44  ;;  %v2827_v32 = vmul.f32 0.75, %v4849_v6  ;;  %v2510_v6 = vmul.f32 0.625, %v4871_v10 }
 0x121   : > { %v1334_v51 = vmul.f32 0.1, %v1318_v27  ;;  %v1333_v31 = vmul.f32 0.1, %v1317_v62  ;;  %4290 = vmatpush3.bf16.msra.mxu1 %v1362_v44  ;;  %v1682_v57 = vpack.c.bf16 %v1667_v14, %v1666_v35 }
 0x122   : > { %v1572_v23 = vpop.permute.xlu1 %1571  ;;  %v1567_v61 = vpop.permute.xlu0 %1566 }
 0x123   : > { %v1350_v53 = vmax.f32 %v1318_v27, %v1334_v51  ;;  %v1349_v47 = vmax.f32 %v1317_v62, %v1333_v31  ;;  %v1637_v5 = vsub.f32 %v5109_v54, %v1572_v23  ;;  %v1636_v40 = vsub.f32 %v5111_v36, %v1567_v61  ;;  %2855 = vperm.xlu1 %4616, %v2825_v59   ;;  %v5236_v61 = vld [vmem:[#allocation4 + $0x28] sm:$0xff]  }
 0x124   : > { %2850 = vperm.xlu0 %4615, %v2824_v16   ;;  %4319 = vmatprep.subr.bf16.mxu0 %v1682_v57  ;;  %v2826_v62 = vmul.f32 0.75, %v4854_v7  ;;  %v2509_v7 = vmul.f32 0.625, %v4878_v11  ;;  %v2828_v11 = vmul.f32 0.75, %v4866_v9  ;;  %v2511_v9 = vmul.f32 0.625, %v4890_v13 }
 0x125   : > { %v1653_v63 = vmul.f32 0.1, %v1637_v5  ;;  %v1652_v3 = vmul.f32 0.1, %v1636_v40  ;;  %4320 = vmatpush3.bf16.msra.mxu0 %v1682_v57  ;;  %v1363_v43 = vpack.c.bf16 %v1350_v53, %v1349_v47 }
 0x126   : > { %v1271_v44 = vpop.permute.xlu1 %1270  ;;  %v1266_v0 = vpop.permute.xlu0 %1265  ;;  %4276 = vmatmul.mubr.bf16.gmra.mrb[4].mxu0 %v5221_v4 }
 0x127   : > { %v1669_v14 = vmax.f32 %v1637_v5, %v1653_v63  ;;  %v1668_v35 = vmax.f32 %v1636_v40, %v1652_v3  ;;  %v1320_v59 = vsub.f32 %v5133_v24, %v1271_v44  ;;  %v1319_v27 = vsub.f32 %v5137_v39, %v1266_v0  ;;  %2554 = vperm.xlu1 %4616, %v2508_v20   ;;  %v5241_v3 = vld [vmem:[#allocation4 + $0x30] sm:$0xff]  }
 0x128   : > { %2549 = vperm.xlu0 %4615, %v2507_v2   ;;  %4291 = vmatprep.subr.bf16.mxu1 %v1363_v43  ;;  %v2829_v44 = vmul.f32 0.75, %v4861_v8 }
 0x129   : > { %v1336_v16 = vmul.f32 0.1, %v1320_v59  ;;  %v1335_v51 = vmul.f32 0.1, %v1319_v27  ;;  %4292 = vmatpush3.bf16.msra.mxu1 %v1363_v43  ;;  %v1683_v31 = vpack.c.bf16 %v1669_v14, %v1668_v35  ;;  %4279 = vmatprep.mubr.bf16.mxu0 %v5227_v28 }
 0x12a   : > { %v1582_v57 = vpop.permute.xlu1 %1581  ;;  %v1577_v23 = vpop.permute.xlu0 %1576 }
 0x12b   : > { %v1352_v53 = vmax.f32 %v1320_v59, %v1336_v16  ;;  %v1351_v47 = vmax.f32 %v1319_v27, %v1335_v51  ;;  %v1639_v20 = vsub.f32 %v5121_v19, %v1582_v57  ;;  %v1638_v5 = vsub.f32 %v5123_v1, %v1577_v23  ;;  %2865 = vperm.xlu1 %4616, %v2827_v32  }
 0x12c   : > { %2860 = vperm.xlu0 %4615, %v2826_v62   ;;  %4321 = vmatprep.subr.bf16.mxu0 %v1683_v31  ;;  %v2512_v51 = vmul.f32 0.625, %v4883_v12  ;;  %v5258_v12 = vld [vmem:[%s6294_s2 + $0x48] sm:$0xff] }
 0x12d   : > { %v1655_v40 = vmul.f32 0.1, %v1639_v20  ;;  %v1654_v2 = vmul.f32 0.1, %v1638_v5  ;;  %4322 = vmatpush3.bf16.msra.mxu0 %v1683_v31  ;;  %v1364_v63 = vpack.c.bf16 %v1352_v53, %v1351_v47  ;;  %v5250_v31 = vld [vmem:[#allocation4 + $0x38] sm:$0xff]  }
 0x12e   : > { %v1281_v10 = vpop.permute.xlu1 %1280  ;;  %v1276_v43 = vpop.permute.xlu0 %1275  ;;  %4280 = vmatmul.mubr.bf16.gmra.mrb[8].mxu0 %v5236_v61 }
 0x12f   : > { %v1671_v0 = vmax.f32 %v1639_v20, %v1655_v40  ;;  %v1670_v14 = vmax.f32 %v1638_v5, %v1654_v2  ;;  %v1322_v32 = vsub.f32 %v5147_v60, %v1281_v10  ;;  %v1321_v35 = vsub.f32 %v5151_v18, %v1276_v43  ;;  %2564 = vperm.xlu1 %4616, %v2510_v6  }
 0x130   : > { %2559 = vperm.xlu0 %4615, %v2509_v7   ;;  %4293 = vmatprep.subr.bf16.mxu1 %v1364_v63  ;;  %v2831_v2 = vmul.f32 0.75, %v5258_v12 }
 0x131   : > { %v1338_v59 = vmul.f32 0.1, %v1322_v32  ;;  %v1337_v27 = vmul.f32 0.1, %v1321_v35  ;;  %4294 = vmatpush3.bf16.msra.mxu1 %v1364_v63  ;;  %v1684_v62 = vpack.c.bf16 %v1671_v0, %v1670_v14  ;;  %4283 = vmatprep.mubr.bf16.mxu0 %v5241_v3 }
 0x132   : > { %v1592_v8 = vpop.permute.xlu1 %1591  ;;  %v1587_v16 = vpop.permute.xlu0 %1586 }
 0x133   : > { %v1354_v57 = vmax.f32 %v1322_v32, %v1338_v59  ;;  %v1353_v23 = vmax.f32 %v1321_v35, %v1337_v27  ;;  %v1641_v6 = vsub.f32 %v5133_v24, %v1592_v8  ;;  %v1640_v53 = vsub.f32 %v5137_v39, %v1587_v16  ;;  %2875 = vperm.xlu1 %4616, %v2829_v44   ;;  %v5267_v44 = vld [vmem:[%s6294_s2 + $0x40] sm:$0xff]  ;;  %v5274_v27 = vld [vmem:[%s6294_s2 + $0x68] sm:$0xff] }
 0x134   : > { %2870 = vperm.xlu0 %4615, %v2828_v11   ;;  %4323 = vmatprep.subr.bf16.mxu0 %v1684_v62  ;;  %v2830_v0 = vmul.f32 0.75, %v5267_v44 }
 0x135   : > { %v1657_v47 = vmul.f32 0.1, %v1641_v6  ;;  %v1656_v20 = vmul.f32 0.1, %v1640_v53  ;;  %4324 = vmatpush3.bf16.msra.mxu0 %v1684_v62  ;;  %v1365_v5 = vpack.c.bf16 %v1354_v57, %v1353_v23  ;;  %v2514_v62 = vmul.f32 0.625, %v5274_v27 }
 0x136   : > { %v1291_v7 = vpop.permute.xlu1 %1290  ;;  %v1286_v40 = vpop.permute.xlu0 %1285  ;;  %4284 = vmatmul.mubr.bf16.gmra.mrb[12].mxu0 %v5250_v31 }
 0x137   : > { %v1673_v63 = vmax.f32 %v1641_v6, %v1657_v47  ;;  %v1672_v10 = vmax.f32 %v1640_v53, %v1656_v20  ;;  %v1324_v43 = vsub.f32 %v5161_v29, %v1291_v7  ;;  %v1323_v13 = vsub.f32 %v5165_v48, %v1286_v40  ;;  %2574 = vperm.xlu1 %4616, %v2512_v51  }
 0x138   : > { %2569 = vperm.xlu0 %4615, %v2511_v9   ;;  %4295 = vmatprep.subr.bf16.mxu1 %v1365_v5 }
 0x139   : > { %v1340_v14 = vmul.f32 0.1, %v1324_v43  ;;  %v1339_v32 = vmul.f32 0.1, %v1323_v13  ;;  %4296 = vmatpush3.bf16.msra.mxu1 %v1365_v5  ;;  %v1685_v35 = vpack.c.bf16 %v1673_v63, %v1672_v10  ;;  %4335 = vmatprep.mubr.bf16.mxu0 %v4988_v56  ;;  %v5282_v56 = vld [vmem:[%s6294_s2 + $0x60] sm:$0xff]  ;;  %v5288_v5 = vld [vmem:[%s6294_s2 + $0x58] sm:$0xff] }
 0x13a   : > { %v1602_v11 = vpop.permute.xlu1 %1601  ;;  %v1597_v59 = vpop.permute.xlu0 %1596  ;;  %v2513_v23 = vmul.f32 0.625, %v5282_v56  ;;  %v2833_v7 = vmul.f32 0.75, %v5288_v5 }
 0x13b   : > { %v1356_v8 = vmax.f32 %v1324_v43, %v1340_v14  ;;  %v1355_v16 = vmax.f32 %v1323_v13, %v1339_v32  ;;  %v1643_v51 = vsub.f32 %v5147_v60, %v1602_v11  ;;  %v1642_v57 = vsub.f32 %v5151_v18, %v1597_v59  ;;  %2885 = vperm.xlu1 %4616, %v2831_v2   ;;  %v5296_v43 = vld [vmem:[%s6294_s2 + $0x50] sm:$0xff]  ;;  %v5302_v59 = vld [vmem:[%s6294_s2 + $0x78] sm:$0xff] }
 0x13c   : > { %2880 = vperm.xlu0 %4615, %v2830_v0   ;;  %4325 = vmatprep.subr.bf16.mxu0 %v1685_v35  ;;  %v2832_v13 = vmul.f32 0.75, %v5296_v43 }
 0x13d   : > { %v1659_v6 = vmul.f32 0.1, %v1643_v51  ;;  %v1658_v53 = vmul.f32 0.1, %v1642_v57  ;;  %4326 = vmatpush3.bf16.msra.mxu0 %v1685_v35  ;;  %v1366_v9 = vpack.c.bf16 %v1356_v8, %v1355_v16 }
 0x13e   : > { %v1301_v47 = vpop.permute.xlu1 %1300  ;;  %v1296_v20 = vpop.permute.xlu0 %1295 }
 0x13f   : > { %v1675_v40 = vmax.f32 %v1643_v51, %v1659_v6  ;;  %v1674_v2 = vmax.f32 %v1642_v57, %v1658_v53  ;;  %v1326_v63 = vsub.f32 %v5177_v25, %v1301_v47  ;;  %v1325_v10 = vsub.f32 %v5179_v58, %v1296_v20  ;;  %2584 = vperm.xlu1 %4616, %v2514_v62  }
 0x140   : > { %2579 = vperm.xlu0 %4615, %v2513_v23   ;;  %4297 = vmatprep.subr.bf16.mxu1 %v1366_v9  ;;  %v2516_v62 = vmul.f32 0.625, %v5302_v59  ;;  %v5310_v23 = vld [vmem:[%s6294_s2 + $0x70] sm:$0xff] }
 0x141   : > { %v1342_v0 = vmul.f32 0.1, %v1326_v63  ;;  %v1341_v14 = vmul.f32 0.1, %v1325_v10  ;;  %4298 = vmatpush3.bf16.msra.mxu1 %v1366_v9  ;;  %v1686_v32 = vpack.c.bf16 %v1675_v40, %v1674_v2  ;;  %v2515_v6 = vmul.f32 0.625, %v5310_v23 }
 0x142   : > { %v1612_v35 = vpop.permute.xlu1 %1611  ;;  %v1607_v11 = vpop.permute.xlu0 %1606  ;;  %v2835_v2 = vmul.f32 0.75, %v5274_v27 }
 0x143   : > { %v1358_v8 = vmax.f32 %v1326_v63, %v1342_v0  ;;  %v1357_v16 = vmax.f32 %v1325_v10, %v1341_v14  ;;  %v1645_v51 = vsub.f32 %v5161_v29, %v1612_v35  ;;  %v1644_v57 = vsub.f32 %v5165_v48, %v1607_v11  ;;  %2895 = vperm.xlu1 %4616, %v2833_v7  }
 0x144   : > { %2890 = vperm.xlu0 %4615, %v2832_v13   ;;  %4327 = vmatprep.subr.bf16.mxu0 %v1686_v32  ;;  %v2834_v0 = vmul.f32 0.75, %v5282_v56 }
 0x145   : > { %v1661_v53 = vmul.f32 0.1, %v1645_v51  ;;  %v1660_v9 = vmul.f32 0.1, %v1644_v57  ;;  %4328 = vmatpush3.bf16.msra.mxu0 %v1686_v32  ;;  %v1367_v47 = vpack.c.bf16 %v1358_v8, %v1357_v16  ;;  %v2837_v16 = vmul.f32 0.75, %v5302_v59 }
 0x146   : > { %v1311_v20 = vpop.permute.xlu1 %1310  ;;  %v1306_v40 = vpop.permute.xlu0 %1305 }
 0x147   : > { %v1677_v63 = vmax.f32 %v1645_v51, %v1661_v53  ;;  %v1676_v10 = vmax.f32 %v1644_v57, %v1660_v9  ;;  %v1328_v7 = vsub.f32 %v5191_v15, %v1311_v20  ;;  %v1327_v13 = vsub.f32 %v5193_v30, %v1306_v40  ;;  %2594 = vperm.xlu1 %4616, %v2516_v62  }
 0x148   : > { %2589 = vperm.xlu0 %4615, %v2515_v6   ;;  %4299 = vmatprep.subr.bf16.mxu1 %v1367_v47  ;;  %v2836_v62 = vmul.f32 0.75, %v5310_v23 }
 0x149   : > { %v1344_v14 = vmul.f32 0.1, %v1328_v7  ;;  %v1343_v35 = vmul.f32 0.1, %v1327_v13  ;;  %4300 = vmatpush3.bf16.msra.mxu1 %v1367_v47  ;;  %v1687_v32 = vpack.c.bf16 %v1677_v63, %v1676_v10  ;;  %v4633_v63 = vld [vmem:[%s6294_s2 + $0x8] sm:$0xff] }
 0x14a   : > { %v1622_v11 = vpop.permute.xlu1 %1621  ;;  %v1617_v8 = vpop.permute.xlu0 %1616  ;;  %v3144_v10 = vmul.f32 0.875, %v4633_v63 }
 0x14b   : > { %v1360_v49 = vmax.f32 %v1328_v7, %v1344_v14  ;;  %v1359_v51 = vmax.f32 %v1327_v13, %v1343_v35  ;;  %v1647_v57 = vsub.f32 %v5177_v25, %v1622_v11  ;;  %v1646_v53 = vsub.f32 %v5179_v58, %v1617_v8  ;;  %2905 = vperm.xlu1 %4616, %v2835_v2  }
 0x14c   : > { %2900 = vperm.xlu0 %4615, %v2834_v0   ;;  %4329 = vmatprep.subr.bf16.mxu0 %v1687_v32 }
 0x14d   : > { %v1663_v6 = vmul.f32 0.1, %v1647_v57  ;;  %v1662_v9 = vmul.f32 0.1, %v1646_v53  ;;  %4330 = vmatpush3.bf16.msra.mxu0 %v1687_v32  ;;  %v1368_v47 = vpack.c.bf16 %v1360_v49, %v1359_v51  ;;  %v4634_v49 = vld [vmem:[%s6294_s2] sm:$0xff] }
 0x14e   : > { %v1632_v20 = vpop.permute.xlu1 %1631  ;;  %v1627_v40 = vpop.permute.xlu0 %1626  ;;  %v3143_v0 = vmul.f32 0.875, %v4634_v49 }
 0x14f   : > { %v1679_v7 = vmax.f32 %v1647_v57, %v1663_v6  ;;  %v1678_v13 = vmax.f32 %v1646_v53, %v1662_v9  ;;  %v1649_v14 = vsub.f32 %v5191_v15, %v1632_v20  ;;  %v1648_v2 = vsub.f32 %v5193_v30, %v1627_v40  ;;  %2915 = vperm.xlu1 %4616, %v2837_v16   ;;  %v4635_v57 = vld [vmem:[%s6294_s2 + $0x18] sm:$0xff] }
 0x150   : > { %2910 = vperm.xlu0 %4615, %v2836_v62   ;;  %4301 = vmatprep.subr.bf16.mxu1 %v1368_v47  ;;  %v3146_v53 = vmul.f32 0.875, %v4635_v57 }
 0x151   : > { %v1665_v35 = vmul.f32 0.1, %v1649_v14  ;;  %v1664_v32 = vmul.f32 0.1, %v1648_v2  ;;  %4302 = vmatpush3.bf16.msra.mxu1 %v1368_v47  ;;  %v1688_v11 = vpack.c.bf16 %v1679_v7, %v1678_v13  ;;  %v4636_v47 = vld [vmem:[%s6294_s2 + $0x10] sm:$0xff] }
 0x152   : > { %v1883_v8 = vpop.permute.xlu1 %1882  ;;  %v1878_v51 = vpop.permute.xlu0 %1877  ;;  %v3145_v20 = vmul.f32 0.875, %v4636_v47 }
 0x153   : > { %v1681_v6 = vmax.f32 %v1649_v14, %v1665_v35  ;;  %v1680_v16 = vmax.f32 %v1648_v2, %v1664_v32  ;;  %v1956_v62 = vsub.f32 %v5097_v52, %v1883_v8  ;;  %v1955_v9 = vsub.f32 %v5099_v55, %v1878_v51  ;;  %3166 = vperm.xlu1 %4616, %v3144_v10   ;;  %v4637_v10 = vld [vmem:[%s6294_s2 + $0x28] sm:$0xff] }
 0x154   : > { %3161 = vperm.xlu0 %4615, %v3143_v0   ;;  %4304 = vmatmul.mubr.bf16.vlgmr.msra.gmra.mrb[0].mxu1 %v5207_v17  ;;  %v3148_v2 = vmul.f32 0.875, %v4637_v10 }
 0x155   : > { %v1972_v40 = vmul.f32 0.1, %v1956_v62  ;;  %v1971_v63 = vmul.f32 0.1, %v1955_v9  ;;  %4331 = vmatprep.subr.bf16.mxu0 %v1688_v11  ;;  %v1689_v7 = vpack.c.bf16 %v1681_v6, %v1680_v16  ;;  %4307 = vmatprep.mubr.bf16.mxu1 %v5210_v21 }
 0x156   : > { %4332 = vmatpush3.bf16.msra.mxu0 %v1688_v11  ;;  %v1893_v13 = vpop.permute.xlu1 %1892  ;;  %v1888_v14 = vpop.permute.xlu0 %1887  ;;  %v4638_v11 = vld [vmem:[%s6294_s2 + $0x20] sm:$0xff] }
 0x157   : > { %v1988_v49 = vmax.f32 %v1956_v62, %v1972_v40  ;;  %v1987_v0 = vmax.f32 %v1955_v9, %v1971_v63  ;;  %v1958_v35 = vsub.f32 %v5109_v54, %v1893_v13  ;;  %v1957_v32 = vsub.f32 %v5111_v36, %v1888_v14  ;;  %3176 = vperm.xlu1 %4616, %v3146_v53   ;;  %v4639_v62 = vld [vmem:[%s6294_s2 + $0x38] sm:$0xff] }
 0x158   : > { %3171 = vperm.xlu0 %4615, %v3145_v20   ;;  %4333 = vmatprep.subr.bf16.mxu0 %v1689_v7  ;;  %v3147_v8 = vmul.f32 0.875, %v4638_v11  ;;  %v3150_v9 = vmul.f32 0.875, %v4639_v62 }
 0x159   : > { %v1974_v51 = vmul.f32 0.1, %v1958_v35  ;;  %v1973_v57 = vmul.f32 0.1, %v1957_v32  ;;  %v2003_v6 = vpack.c.bf16 %v1988_v49, %v1987_v0 }
 0x15a   : > { %4334 = vmatpush3.bf16.msra.mxu0 %v1689_v7  ;;  %v2204_v16 = vpop.permute.xlu1 %2203  ;;  %v2199_v47 = vpop.permute.xlu0 %2198  ;;  %v4640_v7 = vld [vmem:[%s6294_s2 + $0x30] sm:$0xff] }
 0x15b   : > { %v1990_v40 = vmax.f32 %v1958_v35, %v1974_v51  ;;  %v1989_v53 = vmax.f32 %v1957_v32, %v1973_v57  ;;  %v2277_v20 = vsub.f32 %v5097_v52, %v2204_v16  ;;  %v2276_v63 = vsub.f32 %v5099_v55, %v2199_v47  ;;  %3186 = vperm.xlu1 %4616, %v3148_v2  }
 0x15c   : > { %3181 = vperm.xlu0 %4615, %v3147_v8   ;;  %4308 = vmatmul.mubr.bf16.gmra.mrb[4].mxu1 %v5221_v4  ;;  %v3149_v13 = vmul.f32 0.875, %v4640_v7  ;;  %v3152_v2 = vmul.f32 0.875, %v5258_v12  ;;  %v3151_v57 = vmul.f32 0.875, %v5267_v44  ;;  %v3154_v12 = vmul.f32 0.875, %v5288_v5 }
 0x15d   : > { %v2293_v14 = vmul.f32 0.1, %v2277_v20  ;;  %v2292_v10 = vmul.f32 0.1, %v2276_v63  ;;  %4336 = vmatmul.mubr.bf16.vlgmr.msra.gmra.mrb[16].mxu0 %v5207_v17  ;;  %4351 = vmatprep.subr.bf16.mxu1 %v2003_v6  ;;  %v2004_v49 = vpack.c.bf16 %v1990_v40, %v1989_v53  ;;  %v3153_v44 = vmul.f32 0.875, %v5296_v43 }
 0x15e   : > { %4352 = vmatpush3.bf16.msra.mxu1 %v2003_v6  ;;  %v1903_v0 = vpop.permute.xlu1 %1902  ;;  %v1898_v35 = vpop.permute.xlu0 %1897  ;;  %4311 = vmatprep.mubr.bf16.mxu1 %v5227_v28  ;;  %v3155_v43 = vmul.f32 0.875, %v5282_v56  ;;  %v3157_v56 = vmul.f32 0.875, %v5310_v23  ;;  %v449_v23 = vld [vmem:[%s6297_s5 + $0x8] sm:$0xff] }
 0x15f   : > { %v2309_v32 = vmax.f32 %v2277_v20, %v2293_v14  ;;  %v2308_v11 = vmax.f32 %v2276_v63, %v2292_v10  ;;  %v1960_v8 = vsub.f32 %v5121_v19, %v1903_v0  ;;  %v1959_v51 = vsub.f32 %v5123_v1, %v1898_v35  ;;  %3196 = vperm.xlu1 %4616, %v3150_v9  }
 0x160   : > { %3191 = vperm.xlu0 %4615, %v3149_v13   ;;  %4353 = vmatprep.subr.bf16.mxu1 %v2004_v49 }
 0x161   : > { %v1976_v16 = vmul.f32 0.1, %v1960_v8  ;;  %v1975_v47 = vmul.f32 0.1, %v1959_v51  ;;  %4339 = vmatprep.mubr.bf16.mxu0 %v5210_v21  ;;  %v2324_v6 = vpack.c.bf16 %v2309_v32, %v2308_v11 }
 0x162   : > { %4354 = vmatpush3.bf16.msra.mxu1 %v2004_v49  ;;  %v2214_v62 = vpop.permute.xlu1 %2213  ;;  %v2209_v40 = vpop.permute.xlu0 %2208  ;;  %v3156_v49 = vmul.f32 0.875, %v5274_v27  ;;  %v3158_v27 = vmul.f32 0.875, %v5302_v59 }
 0x163   : > { %v1992_v53 = vmax.f32 %v1960_v8, %v1976_v16  ;;  %v1991_v20 = vmax.f32 %v1959_v51, %v1975_v47  ;;  %v2279_v63 = vsub.f32 %v5109_v54, %v2214_v62  ;;  %v2278_v9 = vsub.f32 %v5111_v36, %v2209_v40  ;;  %3206 = vperm.xlu1 %4616, %v3152_v2  }
 0x164   : > { %3201 = vperm.xlu0 %4615, %v3151_v57   ;;  %4312 = vmatmul.mubr.bf16.gmra.mrb[8].mxu1 %v5236_v61 }
 0x165   : > { %v2295_v7 = vmul.f32 0.1, %v2279_v63  ;;  %v2294_v13 = vmul.f32 0.1, %v2278_v9  ;;  %4340 = vmatmul.mubr.bf16.gmra.mrb[20].mxu0 %v5221_v4  ;;  %4383 = vmatprep.subr.bf16.mxu0 %v2324_v6  ;;  %v2005_v14 = vpack.c.bf16 %v1992_v53, %v1991_v20 }
 0x166   : > { %4384 = vmatpush3.bf16.msra.mxu0 %v2324_v6  ;;  %v1913_v5 = vpop.permute.xlu1 %1912  ;;  %v1908_v10 = vpop.permute.xlu0 %1907  ;;  %4315 = vmatprep.mubr.bf16.mxu1 %v5241_v3 }
 0x167   : > { %v2311_v0 = vmax.f32 %v2279_v63, %v2295_v7  ;;  %v2310_v35 = vmax.f32 %v2278_v9, %v2294_v13  ;;  %v1962_v2 = vsub.f32 %v5133_v24, %v1913_v5  ;;  %v1961_v32 = vsub.f32 %v5137_v39, %v1908_v10  ;;  %3216 = vperm.xlu1 %4616, %v3154_v12   ;;  %v448_v10 = vld [vmem:[%s6297_s5] sm:$0xff] }
 0x168   : > { %3211 = vperm.xlu0 %4615, %v3153_v44   ;;  %4355 = vmatprep.subr.bf16.mxu1 %v2005_v14 }
 0x169   : > { %v1978_v11 = vmul.f32 0.1, %v1962_v2  ;;  %v1977_v8 = vmul.f32 0.1, %v1961_v32  ;;  %4356 = vmatpush3.bf16.msra.mxu1 %v2005_v14  ;;  %4343 = vmatprep.mubr.bf16.mxu0 %v5227_v28  ;;  %v2325_v51 = vpack.c.bf16 %v2311_v0, %v2310_v35  ;;  %v5390_v0 = vld [vmem:[#allocation4] sm:$0xff]  }
 0x16a   : > { %v2224_v57 = vpop.permute.xlu1 %2223  ;;  %v2219_v16 = vpop.permute.xlu0 %2218 }
 0x16b   : > { %v1994_v47 = vmax.f32 %v1962_v2, %v1978_v11  ;;  %v1993_v6 = vmax.f32 %v1961_v32, %v1977_v8  ;;  %v2281_v62 = vsub.f32 %v5121_v19, %v2224_v57  ;;  %v2280_v40 = vsub.f32 %v5123_v1, %v2219_v16  ;;  %3226 = vperm.xlu1 %4616, %v3156_v49   ;;  %v450_v16 = vld [vmem:[%s6297_s5 + $0x10] sm:$0xff] }
 0x16c   : > { %3221 = vperm.xlu0 %4615, %v3155_v43   ;;  %4316 = vmatmul.mubr.bf16.gmra.mrb[12].mxu1 %v5250_v31 }
 0x16d   : > { %v2297_v12 = vmul.f32 0.1, %v2281_v62  ;;  %v2296_v53 = vmul.f32 0.1, %v2280_v40  ;;  %4344 = vmatmul.mubr.bf16.gmra.mrb[24].mxu0 %v5236_v61  ;;  %4385 = vmatprep.subr.bf16.mxu0 %v2325_v51  ;;  %v2006_v20 = vpack.c.bf16 %v1994_v47, %v1993_v6 }
 0x16e   : > { %4386 = vmatpush3.bf16.msra.mxu0 %v2325_v51  ;;  %v1923_v59 = vpop.permute.xlu1 %1922  ;;  %v1918_v63 = vpop.permute.xlu0 %1917  ;;  %4347 = vmatprep.mubr.bf16.mxu0 %v5241_v3  ;;  %v451_v51 = vld [vmem:[%s6297_s5 + $0x18] sm:$0xff] }
 0x16f   : > { %v2313_v9 = vmax.f32 %v2281_v62, %v2297_v12  ;;  %v2312_v44 = vmax.f32 %v2280_v40, %v2296_v53  ;;  %v1964_v7 = vsub.f32 %v5147_v60, %v1923_v59  ;;  %v1963_v13 = vsub.f32 %v5151_v18, %v1918_v63  ;;  %3236 = vperm.xlu1 %4616, %v3158_v27   ;;  %v452_v63 = vld [vmem:[%s6297_s5 + $0x20] sm:$0xff] }
 0x170   : > { %3231 = vperm.xlu0 %4615, %v3157_v56   ;;  %4357 = vmatprep.subr.bf16.mxu1 %v2006_v20 }
 0x171   : > { %v1980_v14 = vmul.f32 0.1, %v1964_v7  ;;  %v1979_v5 = vmul.f32 0.1, %v1963_v13  ;;  %4358 = vmatpush3.bf16.msra.mxu1 %v2006_v20  ;;  %v2326_v49 = vpack.c.bf16 %v2313_v9, %v2312_v44  ;;  %4367 = vmatprep.mubr.bf16.mxu1 %v5390_v0  ;;  %v464_v20 = vld [vmem:[%s6298_s6] sm:$0xff] }
 0x172   : > { %v2234_v35 = vpop.permute.xlu1 %2233 }
 0x173   : > { %v1996_v2 = vmax.f32 %v1964_v7, %v1980_v14  ;;  %v1995_v32 = vmax.f32 %v1963_v13, %v1979_v5  ;;  %v2283_v43 = vsub.f32 %v5133_v24, %v2234_v35  ;;  %v2229_v11 = vpop.permute.xlu0 %2228  ;;  %838 = vperm.xlu1 %4616, %v449_v23   ;;  %4387 = vmatprep.subr.bf16.mxu0 %v2326_v49 }
 0x174   : > { %v2282_v8 = vsub.f32 %v5137_v39, %v2229_v11  ;;  %833 = vperm.xlu0 %4615, %v448_v10   ;;  %4388 = vmatpush3.bf16.msra.mxu0 %v2326_v49  ;;  %v453_v49 = vld [vmem:[%s6297_s5 + $0x28] sm:$0xff] }
 0x175   : > { %v2299_v57 = vmul.f32 0.1, %v2283_v43  ;;  %4348 = vmatmul.mubr.bf16.gmra.mrb[28].mxu0 %v5250_v31  ;;  %v2007_v27 = vpack.c.bf16 %v1996_v2, %v1995_v32  ;;  %v465_v2 = vld [vmem:[%s6298_s6 + $0x8] sm:$0xff] }
 0x176   : > { %v2298_v47 = vmul.f32 0.1, %v2282_v8  ;;  %v1933_v6 = vpop.permute.xlu1 %1932  ;;  %4399 = vmatprep.mubr.bf16.mxu0 %v5390_v0 }
 0x177   : > { %v2315_v62 = vmax.f32 %v2283_v43, %v2299_v57  ;;  %v1966_v40 = vsub.f32 %v5161_v29, %v1933_v6  ;;  %v1928_v56 = vpop.permute.xlu0 %1927  ;;  %848 = vperm.xlu1 %4616, %v451_v51   ;;  %4359 = vmatprep.subr.bf16.mxu1 %v2007_v27 }
 0x178   : > { %v2314_v12 = vmax.f32 %v2282_v8, %v2298_v47  ;;  %v1965_v53 = vsub.f32 %v5165_v48, %v1928_v56  ;;  %843 = vperm.xlu0 %4615, %v450_v16   ;;  %4360 = vmatpush3.bf16.msra.mxu1 %v2007_v27  ;;  %v454_v47 = vld [vmem:[%s6297_s5 + $0x30] sm:$0xff] }
 0x179   : > { %v1982_v59 = vmul.f32 0.1, %v1966_v40 }
 0x17a   : > { %v1981_v9 = vmul.f32 0.1, %v1965_v53  ;;  %v2244_v44 = vpop.permute.xlu1 %2243  ;;  %v2327_v7 = vpack.c.bf16 %v2315_v62, %v2314_v12  ;;  %v466_v62 = vld [vmem:[%s6298_s6 + $0x10] sm:$0xff] }
 0x17b   : > { %v1998_v13 = vmax.f32 %v1966_v40, %v1982_v59  ;;  %v2285_v23 = vsub.f32 %v5147_v60, %v2244_v44  ;;  %v2239_v14 = vpop.permute.xlu0 %2238  ;;  %1090 = vperm.xlu1 %4616, %v464_v20   ;;  %v455_v44 = vld [vmem:[%s6297_s5 + $0x38] sm:$0xff] }
 0x17c   : > { %v1997_v5 = vmax.f32 %v1965_v53, %v1981_v9  ;;  %v2284_v10 = vsub.f32 %v5151_v18, %v2239_v14  ;;  %853 = vperm.xlu0 %4615, %v452_v63   ;;  %4389 = vmatprep.subr.bf16.mxu0 %v2327_v7 }
 0x17d   : > { %v2301_v35 = vmul.f32 0.1, %v2285_v23  ;;  %4390 = vmatpush3.bf16.msra.mxu0 %v2327_v7 }
 0x17e   : > { %v2300_v32 = vmul.f32 0.1, %v2284_v10  ;;  %v1943_v43 = vpop.permute.xlu1 %1942  ;;  %v2008_v11 = vpack.c.bf16 %v1998_v13, %v1997_v5  ;;  %v467_v13 = vld [vmem:[%s6298_s6 + $0x18] sm:$0xff] }
 0x17f   : > { %v2317_v8 = vmax.f32 %v2285_v23, %v2301_v35  ;;  %v1968_v51 = vsub.f32 %v5177_v25, %v1943_v43  ;;  %v1938_v57 = vpop.permute.xlu0 %1937  ;;  %858 = vperm.xlu1 %4616, %v453_v49   ;;  %v456_v43 = vld [vmem:[%s6297_s5 + $0x40] sm:$0xff] }
 0x180   : > { %v2316_v16 = vmax.f32 %v2284_v10, %v2300_v32  ;;  %v1967_v27 = vsub.f32 %v5179_v58, %v1938_v57  ;;  %1095 = vperm.xlu0 %4615, %v465_v2   ;;  %4361 = vmatprep.subr.bf16.mxu1 %v2008_v11 }
 0x181   : > { %v1984_v6 = vmul.f32 0.1, %v1968_v51  ;;  %4362 = vmatpush3.bf16.msra.mxu1 %v2008_v11 }
 0x182   : > { %v1983_v40 = vmul.f32 0.1, %v1967_v27  ;;  %v2254_v56 = vpop.permute.xlu1 %2253  ;;  %v2328_v12 = vpack.c.bf16 %v2317_v8, %v2316_v16  ;;  %v468_v8 = vld [vmem:[%s6298_s6 + $0x20] sm:$0xff] }
 0x183   : > { %v2000_v53 = vmax.f32 %v1968_v51, %v1984_v6  ;;  %v2287_v20 = vsub.f32 %v5161_v29, %v2254_v56  ;;  %v2249_v59 = vpop.permute.xlu0 %2248  ;;  %863 = vperm.xlu1 %4616, %v454_v47   ;;  %v457_v56 = vld [vmem:[%s6297_s5 + $0x48] sm:$0xff] }
 0x184   : > { %v1999_v63 = vmax.f32 %v1967_v27, %v1983_v40  ;;  %v2286_v9 = vsub.f32 %v5165_v48, %v2249_v59  ;;  %1100 = vperm.xlu0 %4615, %v466_v62   ;;  %4391 = vmatprep.subr.bf16.mxu0 %v2328_v12 }
 0x185   : > { %v2303_v7 = vmul.f32 0.1, %v2287_v20  ;;  %4392 = vmatpush3.bf16.msra.mxu0 %v2328_v12 }
 0x186   : > { %v2302_v23 = vmul.f32 0.1, %v2286_v9  ;;  %v1953_v14 = vpop.permute.xlu1 %1952  ;;  %v2009_v5 = vpack.c.bf16 %v2000_v53, %v1999_v63  ;;  %v469_v53 = vld [vmem:[%s6298_s6 + $0x28] sm:$0xff] }
 0x187   : > { %v2319_v10 = vmax.f32 %v2287_v20, %v2303_v7  ;;  %v1970_v49 = vsub.f32 %v5191_v15, %v1953_v14  ;;  %v1948_v35 = vpop.permute.xlu0 %1947  ;;  %868 = vperm.xlu1 %4616, %v455_v44   ;;  %v458_v14 = vld [vmem:[%s6297_s5 + $0x50] sm:$0xff] }
 0x188   : > { %v2318_v2 = vmax.f32 %v2286_v9, %v2302_v23  ;;  %v1969_v32 = vsub.f32 %v5193_v30, %v1948_v35  ;;  %1105 = vperm.xlu0 %4615, %v467_v13   ;;  %4363 = vmatprep.subr.bf16.mxu1 %v2009_v5 }
 0x189   : > { %v1986_v11 = vmul.f32 0.1, %v1970_v49  ;;  %4364 = vmatpush3.bf16.msra.mxu1 %v2009_v5 }
 0x18a   : > { %v1985_v51 = vmul.f32 0.1, %v1969_v32  ;;  %v2264_v57 = vpop.permute.xlu1 %2263  ;;  %v2329_v16 = vpack.c.bf16 %v2319_v10, %v2318_v2  ;;  %v470_v10 = vld [vmem:[%s6298_s6 + $0x30] sm:$0xff] }
 0x18b   : > { %v2002_v27 = vmax.f32 %v1970_v49, %v1986_v11  ;;  %v2289_v47 = vsub.f32 %v5177_v25, %v2264_v57  ;;  %v2259_v6 = vpop.permute.xlu0 %2258  ;;  %873 = vperm.xlu1 %4616, %v456_v43   ;;  %v459_v57 = vld [vmem:[%s6297_s5 + $0x58] sm:$0xff] }
 0x18c   : > { %v2001_v62 = vmax.f32 %v1969_v32, %v1985_v51  ;;  %v2288_v40 = vsub.f32 %v5179_v58, %v2259_v6  ;;  %1110 = vperm.xlu0 %4615, %v468_v8   ;;  %4393 = vmatprep.subr.bf16.mxu0 %v2329_v16 }
 0x18d   : > { %v2305_v12 = vmul.f32 0.1, %v2289_v47  ;;  %4394 = vmatpush3.bf16.msra.mxu0 %v2329_v16 }
 0x18e   : > { %v2304_v20 = vmul.f32 0.1, %v2288_v40  ;;  %v2274_v59 = vpop.permute.xlu1 %2273  ;;  %v2010_v63 = vpack.c.bf16 %v2002_v27, %v2001_v62  ;;  %v471_v27 = vld [vmem:[%s6298_s6 + $0x38] sm:$0xff] }
 0x18f   : > { %v2321_v9 = vmax.f32 %v2289_v47, %v2305_v12  ;;  %v2291_v44 = vsub.f32 %v5191_v15, %v2274_v59  ;;  %v2269_v7 = vpop.permute.xlu0 %2268  ;;  %878 = vperm.xlu1 %4616, %v457_v56  }
 0x190   : > { %v2320_v13 = vmax.f32 %v2288_v40, %v2304_v20  ;;  %v2290_v23 = vsub.f32 %v5193_v30, %v2269_v7  ;;  %1115 = vperm.xlu0 %4615, %v469_v53   ;;  %4365 = vmatprep.subr.bf16.mxu1 %v2010_v63  ;;  %v460_v20 = vld [vmem:[%s6297_s5 + $0x60] sm:$0xff] }
 0x191   : > { %v2307_v5 = vmul.f32 0.1, %v2291_v44  ;;  %4366 = vmatpush3.bf16.msra.mxu1 %v2010_v63 }
 0x192   : > { %v2306_v49 = vmul.f32 0.1, %v2290_v23  ;;  %v2525_v35 = vpop.permute.xlu1 %2524  ;;  %v2330_v2 = vpack.c.bf16 %v2321_v9, %v2320_v13 }
 0x193   : > { %v2323_v32 = vmax.f32 %v2291_v44, %v2307_v5  ;;  %v2598_v43 = vsub.f32 %v5097_v52, %v2525_v35  ;;  %v2520_v11 = vpop.permute.xlu0 %2519  ;;  %883 = vperm.xlu1 %4616, %v458_v14   ;;  %v5483_v35 = vld [vmem:[#allocation4 + $0x8] sm:$0xff]  }
 0x194   : > { %v2322_v8 = vmax.f32 %v2290_v23, %v2306_v49  ;;  %v2597_v51 = vsub.f32 %v5099_v55, %v2520_v11  ;;  %1120 = vperm.xlu0 %4615, %v470_v10   ;;  %4368 = vmatmul.mubr.bf16.vlgmr.msra.gmra.mrb[16].mxu1 %v5207_v17  ;;  %v461_v10 = vld [vmem:[%s6297_s5 + $0x68] sm:$0xff] }
 0x195   : > { %v2614_v16 = vmul.f32 0.1, %v2598_v43  ;;  %4395 = vmatprep.subr.bf16.mxu0 %v2330_v2  ;;  %4371 = vmatprep.mubr.bf16.mxu1 %v5210_v21  ;;  %v472_v21 = vld [vmem:[%s6298_s6 + $0x40] sm:$0xff] }
 0x196   : > { %v2613_v47 = vmul.f32 0.1, %v2597_v51  ;;  %4396 = vmatpush3.bf16.msra.mxu0 %v2330_v2  ;;  %v2535_v6 = vpop.permute.xlu1 %2534  ;;  %v2331_v62 = vpack.c.bf16 %v2323_v32, %v2322_v8  ;;  %v473_v2 = vld [vmem:[%s6298_s6 + $0x48] sm:$0xff] }
 0x197   : > { %v2630_v40 = vmax.f32 %v2598_v43, %v2614_v16  ;;  %v2600_v56 = vsub.f32 %v5109_v54, %v2535_v6  ;;  %v2530_v17 = vpop.permute.xlu0 %2529  ;;  %888 = vperm.xlu1 %4616, %v459_v57   ;;  %v5491_v57 = vld [vmem:[#allocation4 + $0x10] sm:$0xff]   ;;  %v474_v6 = vld [vmem:[%s6298_s6 + $0x50] sm:$0xff] }
 0x198   : > { %v2629_v12 = vmax.f32 %v2597_v51, %v2613_v47  ;;  %v2599_v53 = vsub.f32 %v5111_v36, %v2530_v17  ;;  %1125 = vperm.xlu0 %4615, %v471_v27   ;;  %4397 = vmatprep.subr.bf16.mxu0 %v2331_v62  ;;  %v462_v47 = vld [vmem:[%s6297_s5 + $0x70] sm:$0xff] }
 0x199   : > { %v2616_v59 = vmul.f32 0.1, %v2600_v56 }
 0x19a   : > { %v2615_v63 = vmul.f32 0.1, %v2599_v53  ;;  %4398 = vmatpush3.bf16.msra.mxu0 %v2331_v62  ;;  %v2846_v9 = vpop.permute.xlu1 %2845  ;;  %v2645_v44 = vpack.c.bf16 %v2630_v40, %v2629_v12 }
 0x19b   : > { %v2632_v7 = vmax.f32 %v2600_v56, %v2616_v59  ;;  %v2919_v13 = vsub.f32 %v5097_v52, %v2846_v9  ;;  %v2841_v23 = vpop.permute.xlu0 %2840  ;;  %893 = vperm.xlu1 %4616, %v460_v20   ;;  %v5508_v9 = vld [vmem:[#allocation4 + $0x18] sm:$0xff]  }
 0x19c   : > { %v2631_v14 = vmax.f32 %v2599_v53, %v2615_v63  ;;  %v2918_v5 = vsub.f32 %v5099_v55, %v2841_v23  ;;  %1130 = vperm.xlu0 %4615, %v472_v21   ;;  %4372 = vmatmul.mubr.bf16.gmra.mrb[20].mxu1 %v5221_v4  ;;  %v463_v21 = vld [vmem:[%s6297_s5 + $0x78] sm:$0xff] }
 0x19d   : > { %v2935_v49 = vmul.f32 0.1, %v2919_v13  ;;  %4400 = vmatmul.mubr.bf16.vlgmr.msra.gmra.mrb[32].mxu0 %v5483_v35  ;;  %4415 = vmatprep.subr.bf16.mxu1 %v2645_v44 }
 0x19e   : > { %v2934_v32 = vmul.f32 0.1, %v2918_v5  ;;  %4416 = vmatpush3.bf16.msra.mxu1 %v2645_v44  ;;  %v2545_v43 = vpop.permute.xlu1 %2544  ;;  %v2646_v11 = vpack.c.bf16 %v2632_v7, %v2631_v14  ;;  %4375 = vmatprep.mubr.bf16.mxu1 %v5227_v28  ;;  %v475_v44 = vld [vmem:[%s6298_s6 + $0x58] sm:$0xff] }
 0x19f   : > { %v2951_v4 = vmax.f32 %v2919_v13, %v2935_v49  ;;  %v2602_v8 = vsub.f32 %v5121_v19, %v2545_v43  ;;  %v2540_v51 = vpop.permute.xlu0 %2539  ;;  %898 = vperm.xlu1 %4616, %v461_v10   ;;  %4403 = vmatprep.mubr.bf16.mxu0 %v5491_v57  ;;  %v5521_v10 = vld [vmem:[#allocation4 + $0x20] sm:$0xff]  }
 0x1a0   : > { %v2950_v16 = vmax.f32 %v2918_v5, %v2934_v32  ;;  %v2601_v27 = vsub.f32 %v5123_v1, %v2540_v51  ;;  %1135 = vperm.xlu0 %4615, %v473_v2   ;;  %4417 = vmatprep.subr.bf16.mxu1 %v2646_v11  ;;  %v384_v32 = vld [vmem:[%s5517_s20] sm:$0xff] }
 0x1a1   : > { %v2618_v28 = vmul.f32 0.1, %v2602_v8 }
 0x1a2   : > { %v2617_v62 = vmul.f32 0.1, %v2601_v27  ;;  %4418 = vmatpush3.bf16.msra.mxu1 %v2646_v11  ;;  %v2856_v40 = vpop.permute.xlu1 %2855  ;;  %v2966_v56 = vpack.c.bf16 %v2951_v4, %v2950_v16 }
 0x1a3   : > { %v2634_v17 = vmax.f32 %v2602_v8, %v2618_v28  ;;  %v2921_v12 = vsub.f32 %v5109_v54, %v2856_v40  ;;  %v2851_v53 = vpop.permute.xlu0 %2850  ;;  %903 = vperm.xlu1 %4616, %v462_v47   ;;  %v5535_v40 = vld [vmem:[#allocation4 + $0x28] sm:$0xff]  }
 0x1a4   : > { %v2633_v20 = vmax.f32 %v2601_v27, %v2617_v62  ;;  %v2920_v59 = vsub.f32 %v5111_v36, %v2851_v53  ;;  %1140 = vperm.xlu0 %4615, %v474_v6   ;;  %4376 = vmatmul.mubr.bf16.gmra.mrb[24].mxu1 %v5236_v61  ;;  %v477_v6 = vld [vmem:[%s6298_s6 + $0x68] sm:$0xff] }
 0x1a5   : > { %v2937_v63 = vmul.f32 0.1, %v2921_v12  ;;  %4404 = vmatmul.mubr.bf16.gmra.mrb[36].mxu0 %v5508_v9  ;;  %4447 = vmatprep.subr.bf16.mxu0 %v2966_v56 }
 0x1a6   : > { %v2936_v61 = vmul.f32 0.1, %v2920_v59  ;;  %4448 = vmatpush3.bf16.msra.mxu0 %v2966_v56  ;;  %v2555_v7 = vpop.permute.xlu1 %2554  ;;  %v2647_v13 = vpack.c.bf16 %v2634_v17, %v2633_v20  ;;  %4379 = vmatprep.mubr.bf16.mxu1 %v5241_v3  ;;  %v476_v3 = vld [vmem:[%s6298_s6 + $0x60] sm:$0xff]  ;;  %v385_v56 = vld [vmem:[%s5517_s20 + $0x8] sm:$0xff] }
 0x1a7   : > { %v2953_v23 = vmax.f32 %v2921_v12, %v2937_v63  ;;  %v2604_v14 = vsub.f32 %v5133_v24, %v2555_v7  ;;  %v2550_v5 = vpop.permute.xlu0 %2549  ;;  %908 = vperm.xlu1 %4616, %v463_v21   ;;  %4407 = vmatprep.mubr.bf16.mxu0 %v5521_v10  ;;  %v5539_v20 = vld [vmem:[#allocation4 + $0x30] sm:$0xff]  }
 0x1a8   : > { %v2952_v49 = vmax.f32 %v2920_v59, %v2936_v61  ;;  %v2603_v2 = vsub.f32 %v5137_v39, %v2550_v5  ;;  %1145 = vperm.xlu0 %4615, %v475_v44   ;;  %4419 = vmatprep.subr.bf16.mxu1 %v2647_v13  ;;  %v386_v61 = vld [vmem:[%s5517_s20 + $0x10] sm:$0xff] }
 0x1a9   : > { %v2620_v43 = vmul.f32 0.1, %v2604_v14  ;;  %4420 = vmatpush3.bf16.msra.mxu1 %v2647_v13  ;;  %v478_v13 = vld [vmem:[%s6298_s6 + $0x70] sm:$0xff] }
 0x1aa   : > { %v2619_v11 = vmul.f32 0.1, %v2603_v2  ;;  %v2866_v4 = vpop.permute.xlu1 %2865  ;;  %v2967_v8 = vpack.c.bf16 %v2953_v23, %v2952_v49 }
 0x1ab   : > { %v2636_v51 = vmax.f32 %v2604_v14, %v2620_v43  ;;  %v2923_v16 = vsub.f32 %v5121_v19, %v2866_v4  ;;  %v2861_v27 = vpop.permute.xlu0 %2860  ;;  %3693 = vperm.xlu1 %4616, %v384_v32  }
 0x1ac   : > { %v2635_v47 = vmax.f32 %v2603_v2, %v2619_v11  ;;  %v2922_v28 = vsub.f32 %v5123_v1, %v2861_v27  ;;  %1150 = vperm.xlu0 %4615, %v476_v3   ;;  %4380 = vmatmul.mubr.bf16.gmra.mrb[28].mxu1 %v5250_v31  ;;  %v479_v11 = vld [vmem:[%s6298_s6 + $0x78] sm:$0xff] }
 0x1ad   : > { %v2939_v62 = vmul.f32 0.1, %v2923_v16  ;;  %4408 = vmatmul.mubr.bf16.gmra.mrb[40].mxu0 %v5535_v40  ;;  %4449 = vmatprep.subr.bf16.mxu0 %v2967_v8 }
 0x1ae   : > { %v2938_v17 = vmul.f32 0.1, %v2922_v28  ;;  %4450 = vmatpush3.bf16.msra.mxu0 %v2967_v8  ;;  %v2565_v12 = vpop.permute.xlu1 %2564  ;;  %v2648_v53 = vpack.c.bf16 %v2636_v51, %v2635_v47  ;;  %4411 = vmatprep.mubr.bf16.mxu0 %v5539_v20  ;;  %v5554_v8 = vld [vmem:[#allocation4 + $0x38] sm:$0xff]   ;;  %v387_v51 = vld [vmem:[%s5517_s20 + $0x18] sm:$0xff] }
 0x1af   : > { %v2955_v31 = vmax.f32 %v2923_v16, %v2939_v62  ;;  %v2606_v59 = vsub.f32 %v5147_v60, %v2565_v12  ;;  %v2560_v21 = vpop.permute.xlu0 %2559  ;;  %1155 = vperm.xlu1 %4616, %v477_v6   ;;  %4431 = vmatprep.mubr.bf16.mxu1 %v5390_v0  ;;  %v389_v12 = vld [vmem:[%s5517_s20 + $0x28] sm:$0xff] }
 0x1b0   : > { %v2954_v63 = vmax.f32 %v2922_v28, %v2938_v17  ;;  %v2605_v44 = vsub.f32 %v5151_v18, %v2560_v21  ;;  %3696 = vperm.xlu0 %4615, %v385_v56   ;;  %4421 = vmatprep.subr.bf16.mxu1 %v2648_v53 }
 0x1b1   : > { %v2622_v7 = vmul.f32 0.1, %v2606_v59  ;;  %4422 = vmatpush3.bf16.msra.mxu1 %v2648_v53 }
 0x1b2   : > { %v2621_v23 = vmul.f32 0.1, %v2605_v44  ;;  %v2876_v14 = vpop.permute.xlu1 %2875  ;;  %v2968_v5 = vpack.c.bf16 %v2955_v31, %v2954_v63  ;;  %v388_v31 = vld [vmem:[%s5517_s20 + $0x20] sm:$0xff] }
 0x1b3   : > { %v2638_v49 = vmax.f32 %v2606_v59, %v2622_v7  ;;  %v2925_v2 = vsub.f32 %v5133_v24, %v2876_v14  ;;  %v2871_v32 = vpop.permute.xlu0 %2870  ;;  %3699 = vperm.xlu1 %4616, %v386_v61  }
 0x1b4   : > { %v2637_v43 = vmax.f32 %v2605_v44, %v2621_v23  ;;  %v2924_v3 = vsub.f32 %v5137_v39, %v2871_v32  ;;  %1160 = vperm.xlu0 %4615, %v478_v13   ;;  %4451 = vmatprep.subr.bf16.mxu0 %v2968_v5  ;;  %v391_v23 = vld [vmem:[%s5517_s20 + $0x38] sm:$0xff] }
 0x1b5   : > { %v2941_v4 = vmul.f32 0.1, %v2925_v2  ;;  %4412 = vmatmul.mubr.bf16.gmra.mrb[44].mxu0 %v5554_v8 }
 0x1b6   : > { %v2940_v16 = vmul.f32 0.1, %v2924_v3  ;;  %4452 = vmatpush3.bf16.msra.mxu0 %v2968_v5  ;;  %v2575_v27 = vpop.permute.xlu1 %2574  ;;  %v2649_v47 = vpack.c.bf16 %v2638_v49, %v2637_v43  ;;  %4463 = vmatprep.mubr.bf16.mxu0 %v5390_v0  ;;  %v390_v5 = vld [vmem:[%s5517_s20 + $0x30] sm:$0xff] }
 0x1b7   : > { %v2957_v28 = vmax.f32 %v2925_v2, %v2941_v4  ;;  %v2608_v6 = vsub.f32 %v5161_v29, %v2575_v27  ;;  %v2570_v62 = vpop.permute.xlu0 %2569  ;;  %1165 = vperm.xlu1 %4616, %v479_v11  }
 0x1b8   : > { %v2956_v56 = vmax.f32 %v2924_v3, %v2940_v16  ;;  %v2607_v17 = vsub.f32 %v5165_v48, %v2570_v62  ;;  %3702 = vperm.xlu0 %4615, %v387_v51   ;;  %4423 = vmatprep.subr.bf16.mxu1 %v2649_v47  ;;  %v393_v16 = vld [vmem:[%s5517_s20 + $0x48] sm:$0xff] }
 0x1b9   : > { %v2624_v53 = vmul.f32 0.1, %v2608_v6  ;;  %4424 = vmatpush3.bf16.msra.mxu1 %v2649_v47  ;;  %v392_v47 = vld [vmem:[%s5517_s20 + $0x40] sm:$0xff] }
 0x1ba   : > { %v2623_v59 = vmul.f32 0.1, %v2607_v17  ;;  %v2886_v21 = vpop.permute.xlu1 %2885  ;;  %v2969_v63 = vpack.c.bf16 %v2957_v28, %v2956_v56 }
 0x1bb   : > { %v2640_v0 = vmax.f32 %v2608_v6, %v2624_v53  ;;  %v2927_v44 = vsub.f32 %v5147_v60, %v2886_v21  ;;  %v2881_v61 = vpop.permute.xlu0 %2880  ;;  %3708 = vperm.xlu1 %4616, %v389_v12  }
 0x1bc   : > { %v2639_v7 = vmax.f32 %v2607_v17, %v2623_v59  ;;  %v2926_v13 = vsub.f32 %v5151_v18, %v2881_v61  ;;  %3705 = vperm.xlu0 %4615, %v388_v31   ;;  %4453 = vmatprep.subr.bf16.mxu0 %v2969_v63  ;;  %v394_v59 = vld [vmem:[%s5517_s20 + $0x50] sm:$0xff] }
 0x1bd   : > { %v2943_v14 = vmul.f32 0.1, %v2927_v44  ;;  %4454 = vmatpush3.bf16.msra.mxu0 %v2969_v63  ;;  %v480_v63 = vld [vmem:[#allocation3] sm:$0x1] }
 0x1be   : > { %v2942_v49 = vmul.f32 0.1, %v2926_v13  ;;  %v2585_v2 = vpop.permute.xlu1 %2584  ;;  %v2650_v32 = vpack.c.bf16 %v2640_v0, %v2639_v7 }
 0x1bf   : > { %v2959_v43 = vmax.f32 %v2927_v44, %v2943_v14  ;;  %v2610_v3 = vsub.f32 %v5177_v25, %v2585_v2  ;;  %v2580_v11 = vpop.permute.xlu0 %2579  ;;  %3714 = vperm.xlu1 %4616, %v391_v23  }
 0x1c0   : > { %v2958_v4 = vmax.f32 %v2926_v13, %v2942_v49  ;;  %v2609_v51 = vsub.f32 %v5179_v58, %v2580_v11  ;;  %3711 = vperm.xlu0 %4615, %v390_v5   ;;  %4425 = vmatprep.subr.bf16.mxu1 %v2650_v32  ;;  %v396_v49 = vld [vmem:[%s5517_s20 + $0x60] sm:$0xff] }
 0x1c1   : > { %v2626_v27 = vmul.f32 0.1, %v2610_v3  ;;  %4426 = vmatpush3.bf16.msra.mxu1 %v2650_v32  ;;  %v395_v32 = vld [vmem:[%s5517_s20 + $0x58] sm:$0xff] }
 0x1c2   : > { %v2625_v28 = vmul.f32 0.1, %v2609_v51  ;;  %v2896_v6 = vpop.permute.xlu1 %2895  ;;  %v2970_v62 = vpack.c.bf16 %v2959_v43, %v2958_v4  ;;  %v5580_v4 = vsub.f32 %v5099_v55, %v5006_v22 }
 0x1c3   : > { %v2642_v56 = vmax.f32 %v2610_v3, %v2626_v27  ;;  %v2929_v17 = vsub.f32 %v5161_v29, %v2896_v6  ;;  %v2891_v12 = vpop.permute.xlu0 %2890  ;;  %3720 = vperm.xlu1 %4616, %v393_v16  }
 0x1c4   : > { %v2641_v53 = vmax.f32 %v2609_v51, %v2625_v28  ;;  %v2928_v31 = vsub.f32 %v5165_v48, %v2891_v12  ;;  %3717 = vperm.xlu0 %4615, %v392_v47   ;;  %4455 = vmatprep.subr.bf16.mxu0 %v2970_v62  ;;  %v5584_v51 = vsub.f32 %v5097_v52, %v5012_v26  ;;  %v3480_v26 = vmul.f32 0.1, %v5580_v4 }
 0x1c5   : > { %v2945_v21 = vmul.f32 0.1, %v2929_v17  ;;  %4456 = vmatpush3.bf16.msra.mxu0 %v2970_v62  ;;  %v398_v62 = vld [vmem:[%s5517_s20 + $0x70] sm:$0xff] }
 0x1c6   : > { %v2944_v0 = vmul.f32 0.1, %v2928_v31  ;;  %v2595_v44 = vpop.permute.xlu1 %2594  ;;  %v2651_v61 = vpack.c.bf16 %v2642_v56, %v2641_v53 }
 0x1c7   : > { %v2961_v7 = vmax.f32 %v2929_v17, %v2945_v21  ;;  %v2612_v13 = vsub.f32 %v5191_v15, %v2595_v44  ;;  %v2590_v23 = vpop.permute.xlu0 %2589  ;;  %3723 = vperm.xlu1 %4616, %v394_v59   ;;  %v397_v17 = vld [vmem:[%s5517_s20 + $0x68] sm:$0xff] }
 0x1c8   : > { %v2960_v14 = vmax.f32 %v2928_v31, %v2944_v0  ;;  %v2611_v5 = vsub.f32 %v5193_v30, %v2590_v23  ;;  %1207 = vperm.xlu0 %4615, %v480_v63   ;;  %4427 = vmatprep.subr.bf16.mxu1 %v2651_v61  ;;  %v3481_v31 = vmul.f32 0.1, %v5584_v51  ;;  %v6368_v0 = vld [vmem:[#allocation7_spill] sm:$0xff] }
 0x1c9   : > { %v2628_v2 = vmul.f32 0.1, %v2612_v13  ;;  %4428 = vmatpush3.bf16.msra.mxu1 %v2651_v61  ;;  %v3466_v44 = vsub.f32 %v5111_v36, %v6368_v0  ;;  %v6369_v61 = vld [vmem:[#allocation8_spill] sm:$0xff] }
 0x1ca   : > { %v2627_v43 = vmul.f32 0.1, %v2611_v5  ;;  %v2906_v3 = vpop.permute.xlu1 %2905  ;;  %v2971_v11 = vpack.c.bf16 %v2961_v7, %v2960_v14  ;;  %v3467_v7 = vsub.f32 %v5109_v54, %v6369_v61 }
 0x1cb   : > { %v2644_v16 = vmax.f32 %v2612_v13, %v2628_v2  ;;  %v2931_v27 = vsub.f32 %v5177_v25, %v2906_v3  ;;  %v2901_v47 = vpop.permute.xlu0 %2900  ;;  %3729 = vperm.xlu1 %4616, %v396_v49   ;;  %v3497_v3 = vmax.f32 %v5584_v51, %v3481_v31 }
 0x1cc   : > { %v2643_v28 = vmax.f32 %v2611_v5, %v2627_v43  ;;  %v2930_v6 = vsub.f32 %v5179_v58, %v2901_v47  ;;  %3726 = vperm.xlu0 %4615, %v395_v32   ;;  %4457 = vmatprep.subr.bf16.mxu0 %v2971_v11  ;;  %v399_v5 = vld [vmem:[%s5517_s20 + $0x78] sm:$0xff]  ;;  %v3496_v43 = vmax.f32 %v5580_v4, %v3480_v26  ;;  %v3482_v47 = vmul.f32 0.1, %v3466_v44  ;;  %v6371_v4 = vld [vmem:[#allocation9_spill] sm:$0xff] }
 0x1cd   : > { %v2947_v56 = vmul.f32 0.1, %v2931_v27  ;;  %4458 = vmatpush3.bf16.msra.mxu0 %v2971_v11 }
 0x1ce   : > { %v2946_v22 = vmul.f32 0.1, %v2930_v6  ;;  %v2916_v12 = vpop.permute.xlu1 %2915  ;;  %v2652_v53 = vpack.c.bf16 %v2644_v16, %v2643_v28  ;;  %v3483_v28 = vmul.f32 0.1, %v3467_v7  ;;  %v3512_v61 = vpack.c.bf16 %v3497_v3, %v3496_v43 }
 0x1cf   : > { %v2963_v59 = vmax.f32 %v2931_v27, %v2947_v56  ;;  %v2933_v21 = vsub.f32 %v5191_v15, %v2916_v12  ;;  %v2911_v63 = vpop.permute.xlu0 %2910  ;;  %3735 = vperm.xlu1 %4616, %v398_v62   ;;  %v6370_v56 = vld [vmem:[#allocation10_spill] sm:$0xff] }
 0x1d0   : > { %v2962_v13 = vmax.f32 %v2930_v6, %v2946_v22  ;;  %v2932_v23 = vsub.f32 %v5193_v30, %v2911_v63  ;;  %3732 = vperm.xlu0 %4615, %v397_v17   ;;  %4429 = vmatprep.subr.bf16.mxu1 %v2652_v53  ;;  %v5606_v17 = vsub.f32 %v5123_v1, %v6370_v56 }
 0x1d1   : > { %v2949_v14 = vmul.f32 0.1, %v2933_v21  ;;  %4430 = vmatpush3.bf16.msra.mxu1 %v2652_v53 }
 0x1d2   : > { %v2948_v49 = vmul.f32 0.1, %v2932_v23  ;;  %v3167_v2 = vpop.permute.xlu1 %3166  ;;  %v2972_v32 = vpack.c.bf16 %v2963_v59, %v2962_v13  ;;  %v3498_v59 = vmax.f32 %v3466_v44, %v3482_v47  ;;  %v3484_v13 = vmul.f32 0.1, %v5606_v17 }
 0x1d3   : > { %v2965_v11 = vmax.f32 %v2933_v21, %v2949_v14  ;;  %v3240_v16 = vsub.f32 %v5097_v52, %v3167_v2  ;;  %v3162_v27 = vpop.permute.xlu0 %3161  ;;  %v3469_v52 = vsub.f32 %v5121_v19, %v6371_v4  ;;  %v3499_v21 = vmax.f32 %v3467_v7, %v3483_v28 }
 0x1d4   : > { %v2964_v6 = vmax.f32 %v2932_v23, %v2948_v49  ;;  %v3239_v62 = vsub.f32 %v5099_v55, %v3162_v27  ;;  %3738 = vperm.xlu0 %4615, %v399_v5   ;;  %4432 = vmatmul.mubr.bf16.vlgmr.msra.gmra.mrb[32].mxu1 %v5483_v35  ;;  %v5616_v5 = vsub.f32 %v5137_v39, %v5024_v34 }
 0x1d5   : > { %v3256_v22 = vmul.f32 0.1, %v3240_v16  ;;  %4459 = vmatprep.subr.bf16.mxu0 %v2972_v32  ;;  %4435 = vmatprep.mubr.bf16.mxu1 %v5491_v57  ;;  %v3485_v14 = vmul.f32 0.1, %v3469_v52  ;;  %v5620_v49 = vsub.f32 %v5133_v24, %v5022_v33  ;;  %v3513_v3 = vpack.c.bf16 %v3499_v21, %v3498_v59 }
 0x1d6   : > { %v3255_v51 = vmul.f32 0.1, %v3239_v62  ;;  %4460 = vmatpush3.bf16.msra.mxu0 %v2972_v32  ;;  %v3177_v12 = vpop.permute.xlu1 %3176  ;;  %v2973_v53 = vpack.c.bf16 %v2965_v11, %v2964_v6  ;;  %v5629_v34 = vsub.f32 %v5147_v60, %v5028_v37 }
 0x1d7   : > { %v3272_v26 = vmax.f32 %v3240_v16, %v3256_v22  ;;  %v3242_v55 = vsub.f32 %v5109_v54, %v3177_v12  ;;  %v3172_v31 = vpop.permute.xlu0 %3171  ;;  %v3500_v16 = vmax.f32 %v5606_v17, %v3484_v13  ;;  %v3501_v27 = vmax.f32 %v3469_v52, %v3485_v14 }
 0x1d8   : > { %v3271_v63 = vmax.f32 %v3239_v62, %v3255_v51  ;;  %v3241_v0 = vsub.f32 %v5111_v36, %v3172_v31  ;;  %4461 = vmatprep.subr.bf16.mxu0 %v2973_v53  ;;  %v5624_v36 = vsub.f32 %v5151_v18, %v5030_v38  ;;  %v3487_v47 = vmul.f32 0.1, %v5620_v49 }
 0x1d9   : > { %v3258_v23 = vmul.f32 0.1, %v3242_v55  ;;  %v5641_v62 = vsub.f32 %v5165_v48, %v5036_v42  ;;  %v3489_v4 = vmul.f32 0.1, %v5629_v34  ;;  %v3475_v52 = vsub.f32 %v5161_v29, %v5034_v41 }
 0x1da   : > { %v3257_v54 = vmul.f32 0.1, %v3241_v0  ;;  %4462 = vmatpush3.bf16.msra.mxu0 %v2973_v53  ;;  %v3187_v44 = vpop.permute.xlu1 %3186  ;;  %v3287_v7 = vpack.c.bf16 %v3272_v26, %v3271_v63  ;;  %v3514_v42 = vpack.c.bf16 %v3501_v27, %v3500_v16  ;;  %v6372_v27 = vld [vmem:[#allocation11_spill] sm:$0xff] }
 0x1db   : > { %v3274_v2 = vmax.f32 %v3242_v55, %v3258_v23  ;;  %4511 = vmatprep.subr.bf16.mxu0 %v3512_v61  ;;  %v3244_v32 = vsub.f32 %v5121_v19, %v3187_v44  ;;  %v3182_v43 = vpop.permute.xlu0 %3181  ;;  %v3486_v19 = vmul.f32 0.1, %v5616_v5  ;;  %v3503_v55 = vmax.f32 %v5620_v49, %v3487_v47 }
 0x1dc   : > { %v3273_v33 = vmax.f32 %v3241_v0, %v3257_v54  ;;  %v3243_v11 = vsub.f32 %v5123_v1, %v3182_v43  ;;  %4436 = vmatmul.mubr.bf16.gmra.mrb[36].mxu1 %v5508_v9  ;;  %4479 = vmatprep.subr.bf16.mxu1 %v3287_v7  ;;  %v3488_v1 = vmul.f32 0.1, %v5624_v36  ;;  %v3490_v63 = vmul.f32 0.1, %v5641_v62 }
 0x1dd   : > { %v3260_v38 = vmul.f32 0.1, %v3244_v32  ;;  %4464 = vmatmul.mubr.bf16.vlgmr.msra.gmra.mrb[48].mxu0 %v5483_v35  ;;  %4480 = vmatpush3.bf16.msra.mxu1 %v3287_v7  ;;  %v3502_v26 = vmax.f32 %v5616_v5, %v3486_v19  ;;  %v3491_v13 = vmul.f32 0.1, %v3475_v52  ;;  %v5659_v5 = vsub.f32 %v5179_v58, %v5042_v46 }
 0x1de   : > { %v3259_v28 = vmul.f32 0.1, %v3243_v11  ;;  %4512 = vmatpush3.bf16.msra.mxu0 %v3512_v61  ;;  %v3197_v37 = vpop.permute.xlu1 %3196  ;;  %v3288_v6 = vpack.c.bf16 %v3274_v2, %v3273_v33  ;;  %4439 = vmatprep.mubr.bf16.mxu1 %v5521_v10  ;;  %v3504_v21 = vmax.f32 %v5624_v36, %v3488_v1  ;;  %v3505_v61 = vmax.f32 %v5629_v34, %v3489_v4 }
 0x1df   : > { %v3276_v56 = vmax.f32 %v3244_v32, %v3260_v38  ;;  %4513 = vmatprep.subr.bf16.mxu0 %v3513_v3  ;;  %v3246_v17 = vsub.f32 %v5133_v24, %v3197_v37  ;;  %v3192_v22 = vpop.permute.xlu0 %3191  ;;  %4467 = vmatprep.mubr.bf16.mxu0 %v5491_v57  ;;  %v3515_v54 = vpack.c.bf16 %v3503_v55, %v3502_v26  ;;  %v3492_v33 = vmul.f32 0.1, %v5659_v5  ;;  %v4649_v26 = vld [vmem:[#allocation4] sm:$0xff]  }
 0x1e0   : > { %v3275_v51 = vmax.f32 %v3243_v11, %v3259_v28  ;;  %v3245_v12 = vsub.f32 %v5137_v39, %v3192_v22  ;;  %4481 = vmatprep.subr.bf16.mxu1 %v3288_v6  ;;  %v3507_v43 = vmax.f32 %v3475_v52, %v3491_v13  ;;  %v3478_v38 = vsub.f32 %v5193_v30, %v5048_v50 }
 0x1e1   : > { %v3262_v53 = vmul.f32 0.1, %v3246_v17  ;;  %4482 = vmatpush3.bf16.msra.mxu1 %v3288_v6  ;;  %v3508_v50 = vmax.f32 %v5659_v5, %v3492_v33 }
 0x1e2   : > { %v3261_v24 = vmul.f32 0.1, %v3245_v12  ;;  %4514 = vmatpush3.bf16.msra.mxu0 %v3513_v3  ;;  %v3207_v31 = vpop.permute.xlu1 %3206  ;;  %v3289_v59 = vpack.c.bf16 %v3276_v56, %v3275_v51  ;;  %v3494_v4 = vmul.f32 0.1, %v3478_v38 }
 0x1e3   : > { %v3278_v41 = vmax.f32 %v3246_v17, %v3262_v53  ;;  %4515 = vmatprep.subr.bf16.mxu0 %v3514_v42  ;;  %v3248_v39 = vsub.f32 %v5147_v60, %v3207_v31  ;;  %v3202_v0 = vpop.permute.xlu0 %3201  ;;  %v3477_v60 = vsub.f32 %v5177_v25, %v5040_v45  ;;  %v3516_v45 = vpack.c.bf16 %v3505_v61, %v3504_v21 }
 0x1e4   : > { %v3277_v23 = vmax.f32 %v3245_v12, %v3261_v24  ;;  %v3247_v14 = vsub.f32 %v5151_v18, %v3202_v0  ;;  %4440 = vmatmul.mubr.bf16.gmra.mrb[40].mxu1 %v5535_v40  ;;  %4483 = vmatprep.subr.bf16.mxu1 %v3289_v59  ;;  %v3506_v18 = vmax.f32 %v5641_v62, %v3490_v63 }
 0x1e5   : > { %v3264_v49 = vmul.f32 0.1, %v3248_v39  ;;  %4468 = vmatmul.mubr.bf16.gmra.mrb[52].mxu0 %v5508_v9  ;;  %4484 = vmatpush3.bf16.msra.mxu1 %v3289_v59  ;;  %v3493_v16 = vmul.f32 0.1, %v3477_v60 }
 0x1e6   : > { %v3263_v44 = vmul.f32 0.1, %v3247_v14  ;;  %4516 = vmatpush3.bf16.msra.mxu0 %v3514_v42  ;;  %v3217_v7 = vpop.permute.xlu1 %3216  ;;  %v3290_v36 = vpack.c.bf16 %v3278_v41, %v3277_v23  ;;  %4443 = vmatprep.mubr.bf16.mxu1 %v5539_v20  ;;  %v3517_v1 = vpack.c.bf16 %v3507_v43, %v3506_v18  ;;  %v3510_v41 = vmax.f32 %v3478_v38, %v3494_v4 }
 0x1e7   : > { %v3280_v2 = vmax.f32 %v3248_v39, %v3264_v49  ;;  %4517 = vmatprep.subr.bf16.mxu0 %v3515_v54  ;;  %v3250_v46 = vsub.f32 %v5161_v29, %v3217_v7  ;;  %v3212_v32 = vpop.permute.xlu0 %3211  ;;  %4471 = vmatprep.mubr.bf16.mxu0 %v5521_v10  ;;  %v3479_v29 = vsub.f32 %v5191_v15, %v6372_v27 }
 0x1e8   : > { %v3279_v3 = vmax.f32 %v3247_v14, %v3263_v44  ;;  %v3249_v34 = vsub.f32 %v5165_v48, %v3212_v32  ;;  %4485 = vmatprep.subr.bf16.mxu1 %v3290_v36  ;;  %v3509_v22 = vmax.f32 %v3477_v60, %v3493_v16 }
 0x1e9   : > { %v3266_v11 = vmul.f32 0.1, %v3250_v46  ;;  %4486 = vmatpush3.bf16.msra.mxu1 %v3290_v36  ;;  %v3495_v52 = vmul.f32 0.1, %v3479_v29 }
 0x1ea   : > { %v3265_v19 = vmul.f32 0.1, %v3249_v34  ;;  %4518 = vmatpush3.bf16.msra.mxu0 %v3515_v54  ;;  %v3227_v47 = vpop.permute.xlu1 %3226  ;;  %v3291_v28 = vpack.c.bf16 %v3280_v2, %v3279_v3  ;;  %v3518_v63 = vpack.c.bf16 %v3509_v22, %v3508_v50 }
 0x1eb   : > { %v3282_v37 = vmax.f32 %v3250_v46, %v3266_v11  ;;  %4519 = vmatprep.subr.bf16.mxu0 %v3516_v45  ;;  %v3252_v48 = vsub.f32 %v5177_v25, %v3227_v47  ;;  %v3222_v6 = vpop.permute.xlu0 %3221  ;;  %v3511_v39 = vmax.f32 %v3479_v29, %v3495_v52 }
 0x1ec   : > { %v3281_v62 = vmax.f32 %v3249_v34, %v3265_v19  ;;  %v3251_v56 = vsub.f32 %v5179_v58, %v3222_v6  ;;  %4444 = vmatmul.mubr.bf16.gmra.mrb[44].mxu1 %v5554_v8  ;;  %4487 = vmatprep.subr.bf16.mxu1 %v3291_v28 }
 0x1ed   : > { %v3268_v17 = vmul.f32 0.1, %v3252_v48  ;;  %4472 = vmatmul.mubr.bf16.gmra.mrb[56].mxu0 %v5535_v40  ;;  %4488 = vmatpush3.bf16.msra.mxu1 %v3291_v28  ;;  %v3519_v49 = vpack.c.bf16 %v3511_v39, %v3510_v41 }
 0x1ee   : > { %v3267_v51 = vmul.f32 0.1, %v3251_v56  ;;  %4520 = vmatpush3.bf16.msra.mxu0 %v3516_v45  ;;  %v3237_v25 = vpop.permute.xlu1 %3236  ;;  %v3292_v12 = vpack.c.bf16 %v3282_v37, %v3281_v62  ;;  %4475 = vmatprep.mubr.bf16.mxu0 %v5539_v20 }
 0x1ef   : > { %v3284_v53 = vmax.f32 %v3252_v48, %v3268_v17  ;;  %4521 = vmatprep.subr.bf16.mxu0 %v3517_v1  ;;  %v3254_v58 = vsub.f32 %v5191_v15, %v3237_v25  ;;  %v3232_v42 = vpop.permute.xlu0 %3231  ;;  %4495 = vmatprep.mubr.bf16.mxu1 %v4649_v26 }
 0x1f0   : > { %v3283_v55 = vmax.f32 %v3251_v56, %v3267_v51  ;;  %v3253_v24 = vsub.f32 %v5193_v30, %v3232_v42  ;;  %v4273_v31 = vpop.f32.mrb[0].mxu0  ;;  %4489 = vmatprep.subr.bf16.mxu1 %v3292_v12 }
 0x1f1   : > { %v3270_v59 = vmul.f32 0.1, %v3254_v58  ;;  %v993_v21 = vpop.f32.mrb[1].mxu0  ;;  %4490 = vmatpush3.bf16.msra.mxu1 %v3292_v12 }
 0x1f2   : > { %v3269_v0 = vmul.f32 0.1, %v3253_v24  ;;  %4522 = vmatpush3.bf16.msra.mxu0 %v3517_v1  ;;  %v4274_v61 = vpop.f32.mrb[2].mxu0  ;;  %v5682_v13 = vpop.permute.xlu1 %838  ;;  %v3293_v15 = vpack.c.bf16 %v3284_v53, %v3283_v55 }
 0x1f3   : > { %6373 = vst [vmem:[#allocation7_spill] sm:$0xff] %v5682_v13  ;;  %v3286_v23 = vmax.f32 %v3254_v58, %v3270_v59  ;;  %4523 = vmatprep.subr.bf16.mxu0 %v3518_v63  ;;  %v5684_v14 = vpop.permute.xlu0 %833  ;;  %v996_v5 = vpop.f32.mrb[3].mxu0 }
 0x1f4   : > { %6374 = vst [vmem:[#allocation8_spill] sm:$0xff] %v5684_v14  ;;  %v3285_v30 = vmax.f32 %v3253_v24, %v3269_v0  ;;  %4491 = vmatprep.subr.bf16.mxu1 %v3293_v15  ;;  %v994_v54 = vadd.f32 %v993_v21, %v5684_v14  ;;  %v997_v60 = vadd.f32 %v996_v5, %v5682_v13 }
 0x1f5   : > { %4476 = vmatmul.mubr.bf16.gmra.mrb[60].mxu0 %v5554_v8  ;;  %4492 = vmatpush3.bf16.msra.mxu1 %v3293_v15 }
 0x1f6   : > { %4524 = vmatpush3.bf16.msra.mxu0 %v3518_v63  ;;  %v5689_v44 = vpop.permute.xlu1 %848  ;;  %v3294_v7 = vpack.c.bf16 %v3286_v23, %v3285_v30  ;;  %4527 = vmatprep.mubr.bf16.mxu0 %v4649_v26  ;;  %v1056_v2 = vmul.f32 0.1, %v994_v54  ;;  %v1057_v46 = vmul.f32 0.1, %v997_v60 }
 0x1f7   : > { %6375 = vst [vmem:[#allocation10_spill] sm:$0xff] %v5689_v44  ;;  %4525 = vmatprep.subr.bf16.mxu0 %v3519_v49  ;;  %v5691_v36 = vpop.permute.xlu0 %843  ;;  %v1005_v16 = vadd.f32 %v4274_v61, %v5689_v44 }
 0x1f8   : > { %6376 = vst [vmem:[#allocation9_spill] sm:$0xff] %v5691_v36  ;;  %4493 = vmatprep.subr.bf16.mxu1 %v3294_v7  ;;  %v1002_v32 = vadd.f32 %v4273_v31, %v5691_v36  ;;  %v1073_v11 = vmax.f32 %v997_v60, %v1057_v46  ;;  %v1072_v27 = vmax.f32 %v994_v54, %v1056_v2 }
 0x1f9   : > { %4494 = vmatpush3.bf16.msra.mxu1 %v3294_v7  ;;  %v4277_v18 = vpop.f32.mrb[4].mxu0  ;;  %v1059_v48 = vmul.f32 0.1, %v1005_v16 }
 0x1fa   : > { %4526 = vmatpush3.bf16.msra.mxu0 %v3519_v49  ;;  %v5694_v43 = vpop.permute.xlu1 %1090  ;;  %v1009_v3 = vpop.f32.mrb[5].mxu0  ;;  %v1058_v38 = vmul.f32 0.1, %v1002_v32 }
 0x1fb   : > { %6377 = vst [vmem:[#allocation11_spill] sm:$0xff] %v5694_v43  ;;  %v5696_v34 = vpop.permute.xlu0 %853  ;;  %v4278_v45 = vpop.f32.mrb[6].mxu0  ;;  %v1168_v47 = vmul.f32 %v5694_v43, %v1072_v27  ;;  %v1075_v12 = vmax.f32 %v1005_v16, %v1059_v48 }
 0x1fc   : > { %6378 = vst [vmem:[#allocation13_spill] sm:$0xff] %v5696_v34  ;;  %4496 = vmatmul.mubr.bf16.vlgmr.msra.gmra.mrb[48].mxu1 %v5483_v35  ;;  %v1012_v33 = vpop.f32.mrb[7].mxu0  ;;  %v1074_v62 = vmax.f32 %v1002_v32, %v1058_v38 }
 0x1fd   : > { %4528 = vmatmul.mubr.bf16.vlgmr.msra.gmra.mrb[64].mxu0 %v5483_v35  ;;  %4499 = vmatprep.mubr.bf16.mxu1 %v5491_v57  ;;  %v1010_v35 = vadd.f32 %v1009_v3, %v5696_v34 }
 0x1fe   : > { %v5702_v29 = vpop.permute.xlu1 %858  ;;  %4531 = vmatprep.mubr.bf16.mxu0 %v5491_v57 }
 0x1ff   : > { %v5705_v19 = vpop.permute.xlu0 %1095  ;;  %v1060_v4 = vmul.f32 0.1, %v1010_v35  ;;  %v1013_v52 = vadd.f32 %v1012_v33, %v5702_v29 }
 0x200   : > { %6379 = vst [vmem:[#allocation14_spill] sm:$0xff] %v5705_v19  ;;  %v1169_v28 = vmul.f32 %v5705_v19, %v1073_v11 }
 0x201   : > { %v4281_v37 = vpop.f32.mrb[8].mxu0  ;;  %v1076_v26 = vmax.f32 %v1010_v35, %v1060_v4  ;;  %v1061_v55 = vmul.f32 0.1, %v1013_v52 }
 0x202   : > { %v1184_v6 = vadd.f32 %v1169_v28, %v1168_v47  ;;  %v5710_v1 = vpop.permute.xlu1 %863  ;;  %v1025_v56 = vpop.f32.mrb[9].mxu0 }
 0x203   : > { %6380 = vst [vmem:[#allocation15_spill] sm:$0xff] %v5710_v1  ;;  %v5712_v50 = vpop.permute.xlu0 %1100  ;;  %v4282_v17 = vpop.f32.mrb[10].mxu0  ;;  %v1077_v39 = vmax.f32 %v1013_v52, %v1061_v55 }
 0x204   : > { %6381 = vst [vmem:[#allocation16_spill] sm:$0xff] %v5712_v50  ;;  %v1170_v57 = vmul.f32 %v5712_v50, %v1074_v62  ;;  %4500 = vmatmul.mubr.bf16.gmra.mrb[52].mxu1 %v5508_v9  ;;  %v1028_v22 = vpop.f32.mrb[11].mxu0 }
 0x205   : > { %4532 = vmatmul.mubr.bf16.gmra.mrb[68].mxu0 %v5508_v9  ;;  %4503 = vmatprep.mubr.bf16.mxu1 %v5521_v10  ;;  %v1018_v9 = vadd.f32 %v4277_v18, %v5710_v1 }
 0x206   : > { %v1185_v51 = vadd.f32 %v1184_v6, %v1170_v57  ;;  %v5719_v25 = vpop.permute.xlu1 %868  ;;  %4535 = vmatprep.mubr.bf16.mxu0 %v5521_v10 }
 0x207   : > { %6382 = vst [vmem:[#allocation17_spill] sm:$0xff] %v5719_v25  ;;  %v5722_v53 = vpop.permute.xlu0 %1105  ;;  %v1062_v0 = vmul.f32 0.1, %v1018_v9  ;;  %v1021_v61 = vadd.f32 %v4278_v45, %v5719_v25 }
 0x208   : > { %6383 = vst [vmem:[#allocation18_spill] sm:$0xff] %v5722_v53  ;;  %v1171_v58 = vmul.f32 %v5722_v53, %v1075_v12 }
 0x209   : > { %v4285_v42 = vpop.f32.mrb[12].mxu0  ;;  %v1063_v49 = vmul.f32 0.1, %v1021_v61  ;;  %v1078_v7 = vmax.f32 %v1018_v9, %v1062_v0 }
 0x20a   : > { %v1186_v24 = vadd.f32 %v1185_v51, %v1171_v58  ;;  %v5726_v31 = vpop.permute.xlu1 %873  ;;  %v1041_v59 = vpop.f32.mrb[13].mxu0 }
 0x20b   : > { %6384 = vst [vmem:[#allocation19_spill] sm:$0xff] %v5726_v31  ;;  %v5728_v21 = vpop.permute.xlu0 %1110  ;;  %v5730_v63 = vpop.f32.mrb[14].mxu0  ;;  %v1026_v54 = vadd.f32 %v1025_v56, %v5726_v31  ;;  %v1079_v45 = vmax.f32 %v1021_v61, %v1063_v49 }
 0x20c   : > { %v1172_v41 = vmul.f32 %v5728_v21, %v1076_v26  ;;  %4504 = vmatmul.mubr.bf16.gmra.mrb[56].mxu1 %v5535_v40  ;;  %v1044_v10 = vpop.f32.mrb[15].mxu0 }
 0x20d   : > { %4536 = vmatmul.mubr.bf16.gmra.mrb[72].mxu0 %v5535_v40  ;;  %4507 = vmatprep.mubr.bf16.mxu1 %v5539_v20 }
 0x20e   : > { %v1187_v15 = vadd.f32 %v1186_v24, %v1172_v41  ;;  %v5737_v23 = vpop.permute.xlu1 %878  ;;  %4539 = vmatprep.mubr.bf16.mxu0 %v5539_v20  ;;  %v1064_v20 = vmul.f32 0.1, %v1026_v54 }
 0x20f   : > { %6385 = vst [vmem:[#allocation20_spill] sm:$0xff] %v5737_v23  ;;  %v5740_v5 = vpop.permute.xlu0 %1115  ;;  %v1029_v46 = vadd.f32 %v1028_v22, %v5737_v23 }
 0x210   : > { %v1173_v30 = vmul.f32 %v5740_v5, %v1077_v39  ;;  %v1080_v16 = vmax.f32 %v1026_v54, %v1064_v20 }
 0x211   : > { %v1065_v38 = vmul.f32 0.1, %v1029_v46 }
 0x212   : > { %v1188_v60 = vadd.f32 %v1187_v15, %v1173_v30  ;;  %v5744_v40 = vpop.permute.xlu1 %883  ;;  %v6389_v15 = vlaneseq }
 0x213   : > { %6386 = vst [vmem:[#allocation21_spill] sm:$0xff] %v5744_v40  ;;  %v5746_v18 = vpop.permute.xlu0 %1120  ;;  %v1034_v27 = vadd.f32 %v4281_v37, %v5744_v40  ;;  %v1081_v35 = vmax.f32 %v1029_v46, %v1065_v38 }
 0x214   : > { %6387 = vst [vmem:[#allocation22_spill] sm:$0xff] %v5746_v18  ;;  %v1174_v2 = vmul.f32 %v5746_v18, %v1078_v7  ;;  %4508 = vmatmul.mubr.bf16.gmra.mrb[60].mxu1 %v5554_v8  ;;  %v5784_v30 = vand.u32 127, %v6389_v15 }
 0x215   : > { %4540 = vmatmul.mubr.bf16.gmra.mrb[76].mxu0 %v5554_v8  ;;  %v1066_v6 = vmul.f32 0.1, %v1034_v27 }
 0x216   : > { %v1189_v32 = vadd.f32 %v1188_v60, %v1174_v2  ;;  %v5752_v3 = vpop.permute.xlu1 %888 }
 0x217   : > { %6388 = vst [vmem:[#allocation23_spill] sm:$0xff] %v5752_v3  ;;  %v5754_v33 = vpop.permute.xlu0 %1125  ;;  %v1037_v62 = vadd.f32 %v4282_v17, %v5752_v3  ;;  %v1082_v58 = vmax.f32 %v1034_v27, %v1066_v6 }
 0x218   : > { %v1175_v11 = vmul.f32 %v5754_v33, %v1079_v45 }
 0x219   : > { %v1067_v52 = vmul.f32 0.1, %v1037_v62 }
 0x21a   : > { %v1190_v47 = vadd.f32 %v1189_v32, %v1175_v11  ;;  %v5758_v28 = vpop.permute.xlu1 %893 }
 0x21b   : > { %v5760_v48 = vpop.permute.xlu0 %1130  ;;  %v1042_v37 = vadd.f32 %v1041_v59, %v5758_v28  ;;  %v1083_v0 = vmax.f32 %v1037_v62, %v1067_v52 }
 0x21c   : > { %v1176_v8 = vmul.f32 %v5760_v48, %v1080_v16 }
 0x21d   : > { %v1068_v9 = vmul.f32 0.1, %v1042_v37 }
 0x21e   : > { %v1191_v56 = vadd.f32 %v1190_v47, %v1176_v8  ;;  %v5764_v57 = vpop.permute.xlu1 %898 }
 0x21f   : > { %v5766_v22 = vpop.permute.xlu0 %1135  ;;  %v1045_v17 = vadd.f32 %v1044_v10, %v5764_v57  ;;  %v1084_v7 = vmax.f32 %v1042_v37, %v1068_v9 }
 0x220   : > { %v1177_v4 = vmul.f32 %v5766_v22, %v1081_v35  ;;  %v5801_v35 = vadd.s32 128, %v5784_v30 }
 0x221   : > { %v1069_v10 = vmul.f32 0.1, %v1045_v17 }
 0x222   : > { %v1192_v51 = vadd.f32 %v1191_v56, %v1177_v4  ;;  %v5770_v12 = vpop.permute.xlu1 %903 }
 0x223   : > { %v5772_v26 = vpop.permute.xlu0 %1140  ;;  %v5777_v24 = vadd.f32 %v4285_v42, %v5770_v12  ;;  %v1085_v56 = vmax.f32 %v1045_v17, %v1069_v10 }
 0x224   : > { %v1178_v55 = vmul.f32 %v5772_v26, %v1082_v58 }
 0x225   : > { %v5789_v42 = vmul.f32 0.1, %v5777_v24 }
 0x226   : > { %v1193_v41 = vadd.f32 %v1192_v51, %v1178_v55  ;;  %v5779_v39 = vpop.permute.xlu1 %908 }
 0x227   : > { %v5781_v59 = vpop.permute.xlu0 %1145  ;;  %v4305_v61 = vpop.f32.mrb[0].mxu1  ;;  %v5794_v46 = vadd.f32 %v5730_v63, %v5779_v39 }
 0x228   : > { %v1179_v49 = vmul.f32 %v5781_v59, %v1083_v0  ;;  %v1412_v54 = vadd.f32 %v4305_v61, %v5691_v36  ;;  %v1403_v60 = vpop.f32.mrb[1].mxu1 }
 0x229   : > { %v1404_v2 = vadd.f32 %v1403_v60, %v5684_v14  ;;  %v4306_v20 = vpop.f32.mrb[2].mxu1  ;;  %v5807_v52 = vmul.f32 0.1, %v5794_v46 }
 0x22a   : > { %v1194_v32 = vadd.f32 %v1193_v41, %v1179_v49  ;;  %v1468_v45 = vmul.f32 0.1, %v1412_v54  ;;  %v1415_v11 = vadd.f32 %v4306_v20, %v5689_v44  ;;  %v1406_v16 = vpop.f32.mrb[3].mxu1  ;;  %v3694_v38 = vpop.permute.xlu1 %3693 }
 0x22b   : > { %v1466_v27 = vmul.f32 0.1, %v1404_v2  ;;  %v1407_v47 = vadd.f32 %v1406_v16, %v5682_v13  ;;  %v5798_v8 = vpop.permute.xlu0 %1150  ;;  %vm3740_vm0 = vcmp.eq.s32.totalorder %v3694_v38, %v5784_v30  ;;  %vm3741_vm1 = vcmp.eq.s32.totalorder %v3694_v38, %v5801_v35 }
 0x22c   : > { %v1469_v6 = vmul.f32 0.1, %v1415_v11  ;;  %v1180_v62 = vmul.f32 %v5798_v8, %v1084_v7  ;;  %v1484_v51 = vmax.f32 %v1412_v54, %v1468_v45 }
 0x22d   : > { %v1482_v63 = vmax.f32 %v1404_v2, %v1466_v27  ;;  %v1467_v4 = vmul.f32 0.1, %v1407_v47 }
 0x22e   : > { %v1195_v58 = vadd.f32 %v1194_v32, %v1180_v62  ;;  %v5810_v55 = vpop.permute.xlu1 %1155  ;;  %v1485_v9 = vmax.f32 %v1415_v11, %v1469_v6  ;;  %v1500_v11 = vmul.f32 %v1484_v51, %v5712_v50 }
 0x22f   : > { %6390 = vst [vmem:[#allocation24_spill] sm:$0xff] %v5810_v55  ;;  %v1483_v41 = vmax.f32 %v1407_v47, %v1467_v4  ;;  %v3697_v0 = vpop.permute.xlu0 %3696  ;;  %v1181_v17 = vmul.f32 %v5810_v55, %v1085_v56  ;;  %v4309_v61 = vpop.f32.mrb[4].mxu1  ;;  %v1498_v15 = vmul.f32 %v1482_v63, %v5694_v43  ;;  %v6315_v56 = vmov 1.0|1.0  }
 0x230   : > { %vm3742_vm2 = vcmp.eq.s32.totalorder %v3697_v0, %v5784_v30  ;;  %vm3743_vm3 = vcmp.eq.s32.totalorder %v3697_v0, %v5801_v35  ;;  %v1428_v49 = vadd.f32 %v4309_v61, %v5710_v1  ;;  %v4337_v54 = vpop.f32.mrb[16].mxu0  ;;  %v1419_v60 = vpop.f32.mrb[5].mxu1 }
 0x231   : > { %v1499_v7 = vmul.f32 %v1483_v41, %v5705_v19  ;;  %vm4543_vm4 = vmpackc.low %vm3743_vm3, %vm3741_vm1  ;;  %v1196_v10 = vadd.f32 %v1195_v58, %v1181_v17  ;;  %v5820_v2 = vadd.f32 %v4337_v54, %v5691_v36  ;;  %v1420_v20 = vadd.f32 %v1419_v60, %v5696_v34  ;;  %v1724_v32 = vpop.f32.mrb[17].mxu0  ;;  %v4310_v45 = vpop.f32.mrb[6].mxu1 }
 0x232   : > { %vm4545_vm5 = vmpackc.low %vm3742_vm2, %vm3740_vm0  ;;  %v1472_v16 = vmul.f32 0.1, %v1428_v49  ;;  %v1725_v27 = vadd.f32 %v1724_v32, %v5684_v14  ;;  %v1431_v47 = vadd.f32 %v4310_v45, %v5719_v25  ;;  %v4338_v6 = vpop.f32.mrb[18].mxu0  ;;  %v1422_v62 = vpop.f32.mrb[7].mxu1  ;;  %4544 = vmatprep.subr.msk.bf16.mxu1 %vm4543_vm4, %v6315_v56  ;;  %v1087_v14 = vmax.f32 %v5794_v46, %v5807_v52 }
 0x233   : > { %v1514_v63 = vadd.f32 %v1499_v7, %v1498_v15  ;;  %v5830_v4 = vmul.f32 0.1, %v5820_v2  ;;  %v1470_v58 = vmul.f32 0.1, %v1420_v20  ;;  %v5833_v51 = vadd.f32 %v4338_v6, %v5689_v44  ;;  %v1727_v38 = vpop.f32.mrb[19].mxu0  ;;  %v5835_v41 = vpop.permute.xlu0 %1160  ;;  %4546 = vmatpush1.bf16.msk.msra.mxu1 %vm4545_vm5, %v6315_v56 }
 0x234   : > { %v1488_v0 = vmax.f32 %v1428_v49, %v1472_v16  ;;  %v1787_v17 = vmul.f32 0.1, %v1725_v27  ;;  %v1473_v61 = vmul.f32 0.1, %v1431_v47  ;;  %v1423_v54 = vadd.f32 %v1422_v62, %v5702_v29  ;;  %v3700_v60 = vpop.permute.xlu1 %3699 }
 0x235   : > { %v1501_v15 = vmul.f32 %v1485_v9, %v5722_v53  ;;  %v1515_v7 = vadd.f32 %v1514_v63, %v1500_v11  ;;  %v1486_v32 = vmax.f32 %v1420_v20, %v1470_v58  ;;  %v5841_v45 = vmul.f32 0.1, %v5833_v51 }
 0x236   : > { %v1803_v6 = vmax.f32 %v1725_v27, %v1787_v17  ;;  %v1489_v37 = vmax.f32 %v1431_v47, %v1473_v61  ;;  %v1471_v44 = vmul.f32 0.1, %v1423_v54  ;;  %v1504_v49 = vmul.f32 %v1488_v0, %v5746_v18 }
 0x237   : > { %v1805_v16 = vmax.f32 %v5820_v2, %v5830_v4  ;;  %v1502_v62 = vmul.f32 %v1486_v32, %v5728_v21  ;;  %v1516_v56 = vadd.f32 %v1515_v7, %v1501_v15  ;;  %v3703_v9 = vpop.permute.xlu0 %3702  ;;  %v4313_v11 = vpop.f32.mrb[8].mxu1  ;;  %v1806_v27 = vmax.f32 %v5833_v51, %v5841_v45 }
 0x238   : > { %v1819_v20 = vmul.f32 %v1803_v6, %v5694_v43  ;;  %v1487_v47 = vmax.f32 %v1423_v54, %v1471_v44  ;;  %v1728_v63 = vadd.f32 %v1727_v38, %v5682_v13  ;;  %v5853_v58 = vpop.permute.xlu1 %1165  ;;  %v4341_v46 = vpop.f32.mrb[20].mxu0  ;;  %v1505_v0 = vmul.f32 %v1489_v37, %v5754_v33 }
 0x239   : > { %6391 = vst [vmem:[#allocation25_spill] sm:$0xff] %v5853_v58  ;;  %v1517_v52 = vadd.f32 %v1516_v56, %v1502_v62  ;;  %v6392_v2 = vmax.f32 %v5777_v24, %v5789_v42  ;;  %vm3744_vm6 = vcmp.eq.s32.totalorder %v3700_v60, %v5784_v30  ;;  %v1435_v17 = vpop.f32.mrb[9].mxu1  ;;  %v1740_v61 = vpop.f32.mrb[21].mxu0  ;;  %vm3745_vm7 = vcmp.eq.s32.totalorder %v3700_v60, %v5801_v35 }
 0x23a   : > { %v1503_v51 = vmul.f32 %v1487_v47, %v5740_v5  ;;  %v1788_v44 = vmul.f32 0.1, %v1728_v63  ;;  %vm3746_vm8 = vcmp.eq.s32.totalorder %v3703_v9, %v5784_v30  ;;  %v4314_v38 = vpop.f32.mrb[10].mxu1  ;;  %v4342_v56 = vpop.f32.mrb[22].mxu0  ;;  %vm3747_vm9 = vcmp.eq.s32.totalorder %v3703_v9, %v5801_v35 }
 0x23b   : > { %v1182_v4 = vmul.f32 %v5835_v41, %v6392_v2  ;;  %vm5865_vm10 = vmpackc.low %vm3746_vm8, %vm3744_vm6  ;;  %v1183_v42 = vmul.f32 %v5853_v58, %v1087_v14  ;;  %v1444_v37 = vadd.f32 %v4313_v11, %v5744_v40  ;;  %v1438_v15 = vpop.f32.mrb[11].mxu1  ;;  %v1743_v7 = vpop.f32.mrb[23].mxu0  ;;  %v1749_v60 = vadd.f32 %v4341_v46, %v5710_v1 }
 0x23c   : > { %v1518_v32 = vadd.f32 %v1517_v52, %v1503_v51  ;;  %v1804_v45 = vmax.f32 %v1728_v63, %v1788_v44  ;;  %vm4547_vm11 = vmpackc.low %vm3747_vm9, %vm3745_vm7  ;;  %v1436_v6 = vadd.f32 %v1435_v17, %v5726_v31  ;;  %v3709_v62 = vpop.permute.xlu1 %3708  ;;  %v1741_v2 = vadd.f32 %v1740_v61, %v5696_v34 }
 0x23d   : > { %v1197_v54 = vadd.f32 %v1196_v10, %v1182_v4  ;;  %v3706_v10 = vpop.permute.xlu0 %3705  ;;  %v1476_v47 = vmul.f32 0.1, %v1444_v37  ;;  %v1447_v4 = vadd.f32 %v4314_v38, %v5752_v3  ;;  %v6395_v14 = vmov 1.0|1.0  }
 0x23e   : > { %4548 = vmatprep.subr.msk.bf16.mxu1 %vm4547_vm11, %v6395_v14  ;;  %v1519_v11 = vadd.f32 %v1518_v32, %v1504_v49  ;;  %v1820_v43 = vmul.f32 %v1804_v45, %v5705_v19  ;;  %v1793_v52 = vmul.f32 0.1, %v1749_v60  ;;  %v1474_v63 = vmul.f32 0.1, %v1436_v6 }
 0x23f   : > { %v1198_v9 = vadd.f32 %v1197_v54, %v1183_v42  ;;  %4550 = vmatpush1.bf16.msk.msra.mxu1 %vm5865_vm10, %v6395_v14  ;;  %v1821_v46 = vmul.f32 %v1805_v16, %v5712_v50  ;;  %v1791_v51 = vmul.f32 0.1, %v1741_v2  ;;  %v1477_v44 = vmul.f32 0.1, %v1447_v4  ;;  %v4317_v54 = vpop.f32.mrb[12].mxu1 }
 0x240   : > { %v1835_v61 = vadd.f32 %v1820_v43, %v1819_v20  ;;  %v1492_v42 = vmax.f32 %v1444_v37, %v1476_v47  ;;  %v1490_v38 = vmax.f32 %v1436_v6, %v1474_v63  ;;  %v1520_v34 = vadd.f32 %v1519_v11, %v1505_v0  ;;  %v3715_v49 = vpop.permute.xlu1 %3714  ;;  %v4345_v13 = vpop.f32.mrb[24].mxu0 }
 0x241   : > { %v1199_v17 = vrot.slane %v1198_v9, 4  ;;  %v3712_v1 = vpop.permute.xlu0 %3711  ;;  %v1822_v32 = vmul.f32 %v1806_v27, %v5722_v53  ;;  %v1807_v19 = vmax.f32 %v1741_v2, %v1791_v51  ;;  %v1451_v36 = vpop.f32.mrb[13].mxu1  ;;  %v1809_v55 = vmax.f32 %v1749_v60, %v1793_v52 }
 0x242   : > { %v1836_v24 = vadd.f32 %v1835_v61, %v1821_v46  ;;  %v1506_v16 = vmul.f32 %v1490_v38, %v5760_v48  ;;  %v5884_v50 = vadd.f32 %v4342_v56, %v5719_v25  ;;  %v1756_v58 = vpop.f32.mrb[25].mxu0  ;;  %v4318_v43 = vpop.f32.mrb[14].mxu1  ;;  %v1493_v37 = vmax.f32 %v1447_v4, %v1477_v44 }
 0x243   : > { %v1200_v45 = vadd.f32 %v1199_v17, %v1198_v9  ;;  %v1823_v0 = vmul.f32 %v1807_v19, %v5728_v21  ;;  %v1439_v6 = vadd.f32 %v1438_v15, %v5737_v23  ;;  %v4346_v27 = vpop.f32.mrb[26].mxu0  ;;  %v5888_v9 = vpop.f32.mrb[15].mxu1  ;;  %v1508_v47 = vmul.f32 %v1492_v42, %v5772_v26 }
 0x244   : > { %v1521_v2 = vadd.f32 %v1520_v34, %v1506_v16  ;;  %v1837_v60 = vadd.f32 %v1836_v24, %v1822_v32  ;;  %v1744_v11 = vadd.f32 %v1743_v7, %v5702_v29  ;;  %v5892_v52 = vpop.f32.mrb[27].mxu0  ;;  %v1794_v63 = vmul.f32 0.1, %v5884_v50  ;;  %v5907_v44 = vpop.permute.xlu1 %3720 }
 0x245   : > { %v1201_v20 = vrot.slane %v1200_v45, 2  ;;  %v5894_v56 = vpop.permute.xlu0 %3717  ;;  %v1475_v46 = vmul.f32 0.1, %v1439_v6  ;;  %vm3748_vm12 = vcmp.eq.s32.totalorder %v3706_v10, %v5784_v30  ;;  %vm3749_vm13 = vcmp.eq.s32.totalorder %v3706_v10, %v5801_v35 }
 0x246   : > { %v1825_v19 = vmul.f32 %v1809_v55, %v5746_v18  ;;  %v1838_v15 = vadd.f32 %v1837_v60, %v1823_v0  ;;  %v1792_v4 = vmul.f32 0.1, %v1744_v11  ;;  %vm3750_vm14 = vcmp.eq.s32.totalorder %v3709_v62, %v5784_v30 }
 0x247   : > { %v1202_v34 = vadd.f32 %v1201_v20, %v1200_v45  ;;  %v1509_v7 = vmul.f32 %v1493_v37, %v5781_v59  ;;  %v1491_v17 = vmax.f32 %v1439_v6, %v1475_v46  ;;  %vm3751_vm15 = vcmp.eq.s32.totalorder %v3709_v62, %v5801_v35  ;;  %vm5903_vm0 = vmpackc.low %vm3750_vm14, %vm3748_vm12 }
 0x248   : > { %v1808_v61 = vmax.f32 %v1744_v11, %v1792_v4  ;;  %vm4551_vm1 = vmpackc.low %vm3751_vm15, %vm3749_vm13  ;;  %vm3752_vm2 = vcmp.eq.s32.totalorder %v3712_v1, %v5784_v30  ;;  %vm3753_vm3 = vcmp.eq.s32.totalorder %v3712_v1, %v5801_v35  ;;  %vm3754_vm4 = vcmp.eq.s32.totalorder %v3715_v49, %v5784_v30  ;;  %v4349_v10 = vpop.f32.mrb[28].mxu0  ;;  %v3724_v4 = vpop.permute.xlu1 %3723 }
 0x249   : > { %v5912_v55 = vpop.permute.xlu0 %1207  ;;  %v1810_v42 = vmax.f32 %v5884_v50, %v1794_v63  ;;  %v1507_v62 = vmul.f32 %v1491_v17, %v5766_v22  ;;  %4552 = vmatprep.subr.msk.bf16.mxu1 %vm4551_vm1, %v6395_v14  ;;  %vm3755_vm5 = vcmp.eq.s32.totalorder %v3715_v49, %v5801_v35  ;;  %v1460_v38 = vadd.f32 %v4317_v54, %v5770_v12  ;;  %v1772_v32 = vpop.f32.mrb[29].mxu0  ;;  %vm5930_vm7 = vmpackc.low %vm3754_vm4, %vm3752_vm2 }
 0x24a   : > { %v1824_v45 = vmul.f32 %v1808_v61, %v5740_v5  ;;  %vm4555_vm6 = vmpackc.low %vm3755_vm5, %vm3753_vm3  ;;  %v1765_v24 = vadd.f32 %v4345_v13, %v5744_v40  ;;  %4554 = vmatpush1.bf16.msk.msra.mxu1 %vm5903_vm0, %v6395_v14  ;;  %v1452_v50 = vadd.f32 %v1451_v36, %v5758_v28  ;;  %v1757_v16 = vadd.f32 %v1756_v58, %v5726_v31  ;;  %v4350_v20 = vpop.f32.mrb[30].mxu0 }
 0x24b   : > { %v1522_v0 = vadd.f32 %v1521_v2, %v1507_v62  ;;  %v1480_v37 = vmul.f32 0.1, %v1460_v38  ;;  %v1463_v13 = vadd.f32 %v4318_v43, %v5779_v39  ;;  %v1768_v6 = vadd.f32 %v4346_v27, %v5752_v3  ;;  %4556 = vmatprep.subr.msk.bf16.mxu1 %vm4555_vm6, %v6395_v14  ;;  %v1775_v36 = vpop.f32.mrb[31].mxu0 }
 0x24c   : > { %v1839_v60 = vadd.f32 %v1838_v15, %v1824_v45  ;;  %v1797_v58 = vmul.f32 0.1, %v1765_v24  ;;  %v1478_v11 = vmul.f32 0.1, %v1452_v50  ;;  %v1795_v2 = vmul.f32 0.1, %v1757_v16 }
 0x24d   : > { %v1203_v63 = vrot.slane %v1202_v34, 1  ;;  %v1523_v1 = vadd.f32 %v1522_v0, %v1508_v47  ;;  %v1496_v46 = vmax.f32 %v1460_v38, %v1480_v37  ;;  %v1481_v49 = vmul.f32 0.1, %v1463_v13  ;;  %v3727_v43 = vpop.permute.xlu0 %3726 }
 0x24e   : > { %v1826_v17 = vmul.f32 %v1810_v42, %v5754_v33  ;;  %v1840_v51 = vadd.f32 %v1839_v60, %v1825_v19  ;;  %v1494_v61 = vmax.f32 %v1452_v50, %v1478_v11  ;;  %v1811_v62 = vmax.f32 %v1757_v16, %v1795_v2  ;;  %4558 = vmatpush1.bf16.msk.msra.mxu1 %vm5930_vm7, %v6395_v14 }
 0x24f   : > { %v1813_v27 = vmax.f32 %v1765_v24, %v1797_v58  ;;  %v1524_v15 = vadd.f32 %v1523_v1, %v1509_v7  ;;  %v1798_v45 = vmul.f32 0.1, %v1768_v6  ;;  %v1497_v0 = vmax.f32 %v1463_v13, %v1481_v49 }
 0x250   : > { %v1510_v18 = vmul.f32 %v1494_v61, %v5798_v8  ;;  %v1827_v47 = vmul.f32 %v1811_v62, %v5760_v48  ;;  %v1841_v38 = vadd.f32 %v1840_v51, %v1826_v17  ;;  %v1204_v37 = vadd.f32 %v1203_v63, %v1202_v34 }
 0x251   : > { %v1512_v42 = vmul.f32 %v1496_v46, %v5835_v41  ;;  %v1455_v19 = vadd.f32 %v5888_v9, %v5764_v57  ;;  %v1760_v50 = vadd.f32 %v5892_v52, %v5737_v23  ;;  %vm3756_vm8 = vcmp.eq.s32.totalorder %v5894_v56, %v5784_v30  ;;  %v3730_v9 = vpop.permute.xlu1 %3729  ;;  %v6400_v52 = vld [vmem:[#allocation25_spill] sm:$0xff]  ;;  %v3733_v58 = vpop.permute.xlu0 %3732 }
 0x252   : > { %v1525_v16 = vadd.f32 %v1524_v15, %v1510_v18  ;;  %v1842_v54 = vadd.f32 %v1841_v38, %v1827_v47  ;;  %vm3757_vm9 = vcmp.eq.s32.totalorder %v5894_v56, %v5801_v35  ;;  %vm3758_vm10 = vcmp.eq.s32.totalorder %v5907_v44, %v5784_v30  ;;  %v6404_v56 = vld [vmem:[#allocation24_spill] sm:$0xff] }
 0x253   : > { %v1479_v7 = vmul.f32 0.1, %v1455_v19  ;;  %v1796_v24 = vmul.f32 0.1, %v1760_v50  ;;  %vm3759_vm11 = vcmp.eq.s32.totalorder %v5907_v44, %v5801_v35  ;;  %v1829_v34 = vmul.f32 %v1813_v27, %v5772_v26  ;;  %vm4561_vm13 = vmpackc.low %vm3758_vm10, %vm3756_vm8  ;;  %v6401_v44 = vld [vmem:[#allocation12_spill] sm:$0xff] }
 0x254   : > { %v1513_v18 = vmul.f32 %v1497_v0, %v6400_v52  ;;  %v1814_v13 = vmax.f32 %v1768_v6, %v1798_v45  ;;  %vm4559_vm12 = vmpackc.low %vm3759_vm11, %vm3757_vm9  ;;  %v5959_v60 = vadd.f32 %v4349_v10, %v5770_v12  ;;  %v6402_v63 = vsub.s32 0, %v6401_v44 }
 0x255   : > { %v1495_v11 = vmax.f32 %v1455_v19, %v1479_v7  ;;  %v1812_v2 = vmax.f32 %v1760_v50, %v1796_v24  ;;  %4560 = vmatprep.subr.msk.bf16.mxu1 %vm4559_vm12, %v6395_v14  ;;  %v1773_v6 = vadd.f32 %v1772_v32, %v5758_v28  ;;  %v1784_v10 = vadd.f32 %v4350_v20, %v5779_v39  ;;  %v3736_v45 = vpop.permute.xlu1 %3735 }
 0x256   : > { %v5968_v1 = vrot.slane %v5912_v55, %v6402_v63  ;;  %v1801_v46 = vmul.f32 0.1, %v5959_v60  ;;  %4562 = vmatpush1.bf16.msk.msra.mxu1 %vm4561_vm13, %v6395_v14  ;;  %v1776_v49 = vadd.f32 %v1775_v36, %v5764_v57  ;;  %vm3762_vm14 = vcmp.eq.s32.totalorder %v3727_v43, %v5784_v30 }
 0x257   : > { %v1511_v17 = vmul.f32 %v1495_v11, %v6404_v56  ;;  %v1828_v51 = vmul.f32 %v1812_v2, %v5766_v22  ;;  %vm3760_vm15 = vcmp.eq.s32.totalorder %v3724_v4, %v5784_v30  ;;  %v1799_v55 = vmul.f32 0.1, %v1773_v6 }
 0x258   : > { %6403 = vst [vmem:[#allocation25_spill] sm:$0xff] %v5968_v1  ;;  %v1830_v61 = vmul.f32 %v1814_v13, %v5781_v59  ;;  %vm3761_vm0 = vcmp.eq.s32.totalorder %v3724_v4, %v5801_v35  ;;  %v1800_v32 = vmul.f32 0.1, %v1776_v49  ;;  %vm3763_vm1 = vcmp.eq.s32.totalorder %v3727_v43, %v5801_v35  ;;  %vm5982_vm2 = vmpackc.low %vm3762_vm14, %vm3760_vm15  ;;  %v3739_v4 = vpop.permute.xlu0 %3738 }
 0x259   : > { %v1526_v36 = vadd.f32 %v1525_v16, %v1511_v17  ;;  %v1843_v62 = vadd.f32 %v1842_v54, %v1828_v51  ;;  %v1214_v27 = vadd.f32 %v5968_v1, %v1204_v37  ;;  %v1815_v15 = vmax.f32 %v1773_v6, %v1799_v55  ;;  %vm4563_vm3 = vmpackc.low %vm3763_vm1, %vm3761_vm0  ;;  %v6003_v54 = vld [vmem:[%s5069_s18] sm:$0x1] }
 0x25a   : > { %v1817_v47 = vmax.f32 %v5959_v60, %v1801_v46  ;;  %v1802_v38 = vmul.f32 0.1, %v1784_v10  ;;  %v1816_v0 = vmax.f32 %v1776_v49, %v1800_v32  ;;  %4564 = vmatprep.subr.msk.bf16.mxu1 %vm4563_vm3, %v6395_v14  ;;  %vm3766_vm4 = vcmp.eq.s32.totalorder %v3733_v58, %v5784_v30  ;;  %v6407_v46 = vld [vmem:[#allocation9_spill] sm:$0xff]  ;;  %v6408_v55 = vld [vmem:[#allocation8_spill] sm:$0xff] }
 0x25b   : > { %v1527_v43 = vadd.f32 %v1526_v36, %v1512_v42  ;;  %v1844_v19 = vadd.f32 %v1843_v62, %v1829_v34  ;;  %v1831_v50 = vmul.f32 %v1815_v15, %v5798_v8  ;;  %vm3764_vm5 = vcmp.eq.s32.totalorder %v3730_v9, %v5784_v30  ;;  %4566 = vmatpush1.bf16.msk.msra.mxu1 %vm5982_vm2, %v6395_v14  ;;  %v6409_v36 = vld [vmem:[#allocation10_spill] sm:$0xff] }
 0x25c   : > { %v1832_v37 = vmul.f32 %v1816_v0, %v6404_v56  ;;  %vm3765_vm6 = vcmp.eq.s32.totalorder %v3730_v9, %v5801_v35  ;;  %vm3767_vm7 = vcmp.eq.s32.totalorder %v3733_v58, %v5801_v35  ;;  %vm4569_vm8 = vmpackc.low %vm3766_vm4, %vm3764_vm5  ;;  %vm3769_vm9 = vcmp.eq.s32.totalorder %v3736_v45, %v5801_v35 }
 0x25d   : > { %v1528_v42 = vadd.f32 %v1527_v43, %v1513_v18  ;;  %v1845_v16 = vadd.f32 %v1844_v19, %v1830_v61  ;;  %vm4567_vm10 = vmpackc.low %vm3767_vm7, %vm3765_vm6  ;;  %vm3770_vm11 = vcmp.eq.s32.totalorder %v3739_v4, %v5784_v30  ;;  %vm3771_vm12 = vcmp.eq.s32.totalorder %v3739_v4, %v5801_v35 }
 0x25e   : > { %4568 = vmatprep.subr.msk.bf16.mxu1 %vm4567_vm10, %v6395_v14  ;;  %vm4571_vm13 = vmpackc.low %vm3771_vm12, %vm3769_vm9  ;;  %v1215_v7 = vmul.f32 %v6003_v54, %v1214_v27  ;;  %v1818_v34 = vmax.f32 %v1784_v10, %v1802_v38  ;;  %vm3768_vm14 = vcmp.eq.s32.totalorder %v3736_v45, %v5784_v30  ;;  %v1833_v35 = vmul.f32 %v1817_v47, %v5835_v41  ;;  %v6410_v47 = vld [vmem:[#allocation7_spill] sm:$0xff] }
 0x25f   : > { %v1529_v24 = vrot.slane %v1528_v42, 4  ;;  %v1846_v9 = vadd.f32 %v1845_v16, %v1831_v50  ;;  %4570 = vmatpush1.bf16.msk.msra.mxu1 %vm4569_vm8, %v6395_v14  ;;  %vm4573_vm15 = vmpackc.low %vm3770_vm11, %vm3768_vm14 }
 0x260   : > { %4572 = vmatprep.subr.msk.bf16.mxu1 %vm4571_vm13, %v6395_v14  ;;  %1216 = vst [vmem:[#allocation2] sm:$0x1] %v1215_v7  ;;  %v1834_v58 = vmul.f32 %v1818_v34, %v6400_v52 }
 0x261   : > { %v1530_v18 = vadd.f32 %v1529_v24, %v1528_v42  ;;  %v1847_v13 = vadd.f32 %v1846_v9, %v1832_v37  ;;  %v6411_v24 = vld [vmem:[#allocation11_spill] sm:$0xff] }
 0x263   : > { %v1531_v60 = vrot.slane %v1530_v18, 2  ;;  %v1848_v11 = vadd.f32 %v1847_v13, %v1833_v35  ;;  %4574 = vmatpush1.bf16.msk.msra.mxu1 %vm4573_vm15, %v6395_v14 }
 0x265   : > { %v1532_v2 = vadd.f32 %v1531_v60, %v1530_v18  ;;  %v1849_v44 = vadd.f32 %v1848_v11, %v1834_v58  ;;  %v6412_v18 = vld [vmem:[#allocation15_spill] sm:$0xff]  ;;  %v6413_v11 = vld [vmem:[#allocation14_spill] sm:$0xff] }
 0x267   : > { %v1533_v63 = vrot.slane %v1532_v2, 1  ;;  %v1850_v30 = vrot.slane %v1849_v44, 4  ;;  %v4369_v6 = vpop.f32.mrb[16].mxu1 }
 0x268   : > { %v2054_v10 = vadd.f32 %v4369_v6, %v6407_v46  ;;  %v2045_v49 = vpop.f32.mrb[17].mxu1 }
 0x269   : > { %v1534_v17 = vadd.f32 %v1533_v63, %v1532_v2  ;;  %v1851_v51 = vadd.f32 %v1850_v30, %v1849_v44  ;;  %v2046_v61 = vadd.f32 %v2045_v49, %v6408_v55  ;;  %v4370_v32 = vpop.f32.mrb[18].mxu1  ;;  %v6414_v63 = vld [vmem:[#allocation13_spill] sm:$0xff]  ;;  %v6415_v49 = vld [vmem:[#allocation16_spill] sm:$0xff] }
 0x26a   : > { %v2110_v20 = vmul.f32 0.1, %v2054_v10  ;;  %v2057_v62 = vadd.f32 %v4370_v32, %v6409_v36  ;;  %v2048_v27 = vpop.f32.mrb[19].mxu1 }
 0x26b   : > { %v1535_v15 = vadd.f32 %v1534_v17, %v5968_v1  ;;  %v1852_v14 = vrot.slane %v1851_v51, 2  ;;  %v2108_v45 = vmul.f32 0.1, %v2046_v61  ;;  %v2049_v38 = vadd.f32 %v2048_v27, %v6410_v47 }
 0x26c   : > { %v2111_v0 = vmul.f32 0.1, %v2057_v62  ;;  %v2126_v37 = vmax.f32 %v2054_v10, %v2110_v20 }
 0x26d   : > { %v1853_v4 = vadd.f32 %v1852_v14, %v1851_v51  ;;  %v2124_v43 = vmax.f32 %v2046_v61, %v2108_v45  ;;  %v2109_v19 = vmul.f32 0.1, %v2049_v38  ;;  %v1536_v50 = vmul.f32 %v6003_v54, %v1535_v15 }
 0x26e   : > { %v2127_v34 = vmax.f32 %v2057_v62, %v2111_v0  ;;  %v2142_v17 = vmul.f32 %v2126_v37, %v6415_v49 }
 0x26f   : > { %v1854_v42 = vrot.slane %v1853_v4, 1  ;;  %v2125_v16 = vmax.f32 %v2049_v38, %v2109_v19  ;;  %v4373_v7 = vpop.f32.mrb[20].mxu1  ;;  %1537 = vst [vmem:[#allocation2 + $0x1] sm:$0x1] %v1536_v50  ;;  %v2140_v9 = vmul.f32 %v2124_v43, %v6411_v24 }
 0x270   : > { %v6020_v35 = vadd.f32 %v4373_v7, %v6412_v18  ;;  %v4401_v13 = vpop.f32.mrb[32].mxu0  ;;  %v2061_v60 = vpop.f32.mrb[21].mxu1  ;;  %v2143_v50 = vmul.f32 %v2127_v34, %v5722_v53 }
 0x271   : > { %v1855_v58 = vadd.f32 %v1854_v42, %v1853_v4  ;;  %v2141_v2 = vmul.f32 %v2125_v16, %v6413_v11  ;;  %v6024_v44 = vadd.f32 %v4401_v13, %v6407_v46  ;;  %v2062_v30 = vadd.f32 %v2061_v60, %v6414_v63  ;;  %v2366_v6 = vpop.f32.mrb[33].mxu0  ;;  %v4374_v10 = vpop.f32.mrb[22].mxu1 }
 0x272   : > { %v2367_v51 = vadd.f32 %v2366_v6, %v6408_v55  ;;  %v2073_v61 = vadd.f32 %v4374_v10, %v5719_v25  ;;  %v4402_v32 = vpop.f32.mrb[34].mxu0  ;;  %v2064_v20 = vpop.f32.mrb[23].mxu1  ;;  %v2114_v15 = vmul.f32 0.1, %v6020_v35 }
 0x273   : > { %v1856_v62 = vadd.f32 %v1855_v58, %v5968_v1  ;;  %v2156_v27 = vadd.f32 %v2141_v2, %v2140_v9  ;;  %v2112_v14 = vmul.f32 0.1, %v2062_v30  ;;  %v2369_v45 = vpop.f32.mrb[35].mxu0  ;;  %v2431_v38 = vmul.f32 0.1, %v6024_v44 }
 0x274   : > { %v2429_v0 = vmul.f32 0.1, %v2367_v51  ;;  %v2115_v4 = vmul.f32 0.1, %v2073_v61  ;;  %v2378_v43 = vadd.f32 %v4402_v32, %v6409_v36  ;;  %v2130_v7 = vmax.f32 %v6020_v35, %v2114_v15 }
 0x275   : > { %v1857_v19 = vmul.f32 %v6003_v54, %v1856_v62  ;;  %v2157_v37 = vadd.f32 %v2156_v27, %v2142_v17  ;;  %v2128_v42 = vmax.f32 %v2062_v30, %v2112_v14  ;;  %v2065_v60 = vadd.f32 %v2064_v20, %v5702_v29 }
 0x276   : > { %v2432_v16 = vmul.f32 0.1, %v2378_v43  ;;  %v2447_v2 = vmax.f32 %v6024_v44, %v2431_v38  ;;  %v2445_v6 = vmax.f32 %v2367_v51, %v2429_v0  ;;  %v2131_v10 = vmax.f32 %v2073_v61, %v2115_v4 }
 0x277   : > { %1858 = vst [vmem:[#allocation2 + $0x2] sm:$0x1] %v1857_v19  ;;  %v2144_v9 = vmul.f32 %v2128_v42, %v5728_v21  ;;  %v2158_v13 = vadd.f32 %v2157_v37, %v2143_v50  ;;  %v4377_v58 = vpop.f32.mrb[24].mxu1  ;;  %v2370_v32 = vadd.f32 %v2369_v45, %v6410_v47  ;;  %v2113_v30 = vmul.f32 0.1, %v2065_v60 }
 0x278   : > { %v4405_v62 = vpop.f32.mrb[36].mxu0  ;;  %v2077_v34 = vpop.f32.mrb[25].mxu1  ;;  %v2086_v27 = vadd.f32 %v4377_v58, %v5744_v40  ;;  %v2448_v19 = vmax.f32 %v2378_v43, %v2432_v16  ;;  %v2461_v43 = vmul.f32 %v2445_v6, %v6411_v24 }
 0x279   : > { %v2159_v17 = vadd.f32 %v2158_v13, %v2144_v9  ;;  %v2391_v35 = vadd.f32 %v4405_v62, %v6412_v18  ;;  %v2382_v15 = vpop.f32.mrb[37].mxu0  ;;  %v4378_v14 = vpop.f32.mrb[26].mxu1  ;;  %v2430_v50 = vmul.f32 0.1, %v2370_v32  ;;  %v2078_v20 = vadd.f32 %v2077_v34, %v5726_v31 }
 0x27a   : > { %v2383_v44 = vadd.f32 %v2382_v15, %v6414_v63  ;;  %v4406_v51 = vpop.f32.mrb[38].mxu0  ;;  %v2080_v61 = vpop.f32.mrb[27].mxu1  ;;  %v2129_v38 = vmax.f32 %v2065_v60, %v2113_v30  ;;  %v2118_v45 = vmul.f32 0.1, %v2086_v27  ;;  %v2089_v4 = vadd.f32 %v4378_v14, %v5752_v3  ;;  %v6416_v63 = vld [vmem:[#allocation22_spill] sm:$0xff] }
 0x27b   : > { %v2435_v0 = vmul.f32 0.1, %v2391_v35  ;;  %v2385_v37 = vpop.f32.mrb[39].mxu0  ;;  %v2446_v42 = vmax.f32 %v2370_v32, %v2430_v50  ;;  %v2116_v9 = vmul.f32 0.1, %v2078_v20  ;;  %v6047_v58 = vadd.f32 %v4406_v51, %v5719_v25 }
 0x27c   : > { %v2433_v13 = vmul.f32 0.1, %v2383_v44  ;;  %v2145_v16 = vmul.f32 %v2129_v38, %v5740_v5  ;;  %v2134_v62 = vmax.f32 %v2086_v27, %v2118_v45  ;;  %v2119_v30 = vmul.f32 0.1, %v2089_v4 }
 0x27d   : > { %v2462_v34 = vmul.f32 %v2446_v42, %v6413_v11  ;;  %v2132_v15 = vmax.f32 %v2078_v20, %v2116_v9  ;;  %v2146_v18 = vmul.f32 %v2130_v7, %v6416_v63  ;;  %v2463_v14 = vmul.f32 %v2447_v2, %v6415_v49 }
 0x27e   : > { %v2449_v60 = vmax.f32 %v2383_v44, %v2433_v13  ;;  %v2147_v32 = vmul.f32 %v2131_v10, %v5754_v33  ;;  %v2160_v50 = vadd.f32 %v2159_v17, %v2145_v16  ;;  %v2464_v51 = vmul.f32 %v2448_v19, %v5722_v53 }
 0x27f   : > { %v4381_v47 = vpop.f32.mrb[28].mxu1  ;;  %v2477_v25 = vadd.f32 %v2462_v34, %v2461_v43  ;;  %v2451_v6 = vmax.f32 %v2391_v35, %v2435_v0  ;;  %v2436_v38 = vmul.f32 0.1, %v6047_v58  ;;  %v2148_v20 = vmul.f32 %v2132_v15, %v5760_v48 }
 0x280   : > { %v4409_v27 = vpop.f32.mrb[40].mxu0  ;;  %v2093_v45 = vpop.f32.mrb[29].mxu1  ;;  %v2161_v42 = vadd.f32 %v2160_v50, %v2146_v18  ;;  %v2081_v44 = vadd.f32 %v2080_v61, %v5737_v23  ;;  %v2386_v7 = vadd.f32 %v2385_v37, %v5702_v29  ;;  %v2150_v17 = vmul.f32 %v2134_v62, %v5772_v26 }
 0x281   : > { %v2398_v2 = vpop.f32.mrb[41].mxu0  ;;  %v4382_v9 = vpop.f32.mrb[30].mxu1  ;;  %v2478_v10 = vadd.f32 %v2477_v25, %v2463_v14  ;;  %v2465_v19 = vmul.f32 %v2449_v60, %v5728_v21  ;;  %v2135_v13 = vmax.f32 %v2089_v4, %v2119_v30  ;;  %v2094_v18 = vadd.f32 %v2093_v45, %v5758_v28 }
 0x282   : > { %v4410_v35 = vpop.f32.mrb[42].mxu0  ;;  %v2096_v0 = vpop.f32.mrb[31].mxu1  ;;  %v2162_v43 = vadd.f32 %v2161_v42, %v2147_v32  ;;  %v2117_v16 = vmul.f32 0.1, %v2081_v44  ;;  %v2434_v34 = vmul.f32 0.1, %v2386_v7  ;;  %v2102_v61 = vadd.f32 %v4381_v47, %v5770_v12 }
 0x283   : > { %v2401_v15 = vpop.f32.mrb[43].mxu0  ;;  %v2479_v50 = vadd.f32 %v2478_v10, %v2464_v51  ;;  %v2407_v37 = vadd.f32 %v4409_v27, %v5744_v40  ;;  %v2399_v25 = vadd.f32 %v2398_v2, %v5726_v31  ;;  %v2120_v60 = vmul.f32 0.1, %v2094_v18 }
 0x284   : > { %v2163_v14 = vadd.f32 %v2162_v43, %v2148_v20  ;;  %v2133_v62 = vmax.f32 %v2081_v44, %v2117_v16  ;;  %v2450_v53 = vmax.f32 %v2386_v7, %v2434_v34  ;;  %v2467_v4 = vmul.f32 %v2451_v6, %v6416_v63 }
 0x285   : > { %v2480_v30 = vadd.f32 %v2479_v50, %v2465_v19  ;;  %v2452_v32 = vmax.f32 %v6047_v58, %v2436_v38  ;;  %v2437_v42 = vmul.f32 0.1, %v2399_v25  ;;  %v2136_v10 = vmax.f32 %v2094_v18, %v2120_v60 }
 0x286   : > { %v2149_v45 = vmul.f32 %v2133_v62, %v5766_v22  ;;  %v2466_v51 = vmul.f32 %v2450_v53, %v5740_v5  ;;  %v2105_v47 = vadd.f32 %v4382_v9, %v5779_v39  ;;  %v2151_v27 = vmul.f32 %v2135_v13, %v5781_v59 }
 0x287   : > { %v2122_v2 = vmul.f32 0.1, %v2102_v61  ;;  %v2453_v20 = vmax.f32 %v2399_v25, %v2437_v42  ;;  %v2410_v44 = vadd.f32 %v4410_v35, %v5752_v3  ;;  %v2439_v19 = vmul.f32 0.1, %v2407_v37 }
 0x288   : > { %v4413_v7 = vpop.f32.mrb[44].mxu0  ;;  %v2164_v43 = vadd.f32 %v2163_v14, %v2149_v45  ;;  %v2481_v6 = vadd.f32 %v2480_v30, %v2466_v51  ;;  %v2123_v16 = vmul.f32 0.1, %v2105_v47  ;;  %v2468_v38 = vmul.f32 %v2452_v32, %v5754_v33 }
 0x289   : > { %v2414_v58 = vpop.f32.mrb[45].mxu0  ;;  %v2152_v34 = vmul.f32 %v2136_v10, %v5798_v8  ;;  %v2097_v53 = vadd.f32 %v2096_v0, %v5764_v57  ;;  %v2402_v9 = vadd.f32 %v2401_v15, %v5737_v23  ;;  %v2469_v25 = vmul.f32 %v2453_v20, %v5760_v48 }
 0x28a   : > { %v4414_v18 = vpop.f32.mrb[46].mxu0  ;;  %v2165_v13 = vadd.f32 %v2164_v43, %v2150_v17  ;;  %v2482_v50 = vadd.f32 %v2481_v6, %v2467_v4  ;;  %v2440_v35 = vmul.f32 0.1, %v2410_v44  ;;  %v2138_v14 = vmax.f32 %v2102_v61, %v2122_v2 }
 0x28b   : > { %v2417_v62 = vpop.f32.mrb[47].mxu0  ;;  %v2121_v60 = vmul.f32 0.1, %v2097_v53  ;;  %v2438_v30 = vmul.f32 0.1, %v2402_v9  ;;  %v2415_v42 = vadd.f32 %v2414_v58, %v5758_v28  ;;  %v2455_v45 = vmax.f32 %v2407_v37, %v2439_v19 }
 0x28c   : > { %v2166_v32 = vadd.f32 %v2165_v13, %v2151_v27  ;;  %v2483_v51 = vadd.f32 %v2482_v50, %v2468_v38  ;;  %v2139_v10 = vmax.f32 %v2105_v47, %v2123_v16  ;;  %v2423_v15 = vadd.f32 %v4413_v7, %v5770_v12 }
 0x28d   : > { %v2137_v3 = vmax.f32 %v2097_v53, %v2121_v60  ;;  %v2454_v0 = vmax.f32 %v2402_v9, %v2438_v30  ;;  %v2441_v23 = vmul.f32 0.1, %v2415_v42  ;;  %v2456_v43 = vmax.f32 %v2410_v44, %v2440_v35 }
 0x28e   : > { %v2167_v17 = vadd.f32 %v2166_v32, %v2152_v34  ;;  %v2484_v4 = vadd.f32 %v2483_v51, %v2469_v25  ;;  %v2426_v20 = vadd.f32 %v4414_v18, %v5779_v39  ;;  %v2418_v37 = vadd.f32 %v2417_v62, %v5764_v57 }
 0x28f   : > { %v2153_v61 = vmul.f32 %v2137_v3, %v6404_v56  ;;  %v2470_v2 = vmul.f32 %v2454_v0, %v5766_v22  ;;  %v2457_v6 = vmax.f32 %v2415_v42, %v2441_v23  ;;  %v2154_v27 = vmul.f32 %v2138_v14, %v5835_v41 }
 0x290   : > { %v2471_v47 = vmul.f32 %v2455_v45, %v5772_v26  ;;  %v2443_v7 = vmul.f32 0.1, %v2423_v15  ;;  %v2442_v58 = vmul.f32 0.1, %v2418_v37  ;;  %v2155_v38 = vmul.f32 %v2139_v10, %v6400_v52 }
 0x291   : > { %v2168_v19 = vadd.f32 %v2167_v17, %v2153_v61  ;;  %v2485_v16 = vadd.f32 %v2484_v4, %v2470_v2  ;;  %v2472_v44 = vmul.f32 %v2456_v43, %v5781_v59  ;;  %v2444_v34 = vmul.f32 0.1, %v2426_v20 }
 0x292   : > { %v2473_v9 = vmul.f32 %v2457_v6, %v5798_v8  ;;  %v2458_v23 = vmax.f32 %v2418_v37, %v2442_v58  ;;  %v2459_v13 = vmax.f32 %v2423_v15, %v2443_v7  ;;  %v6348_v45 = vmov 0.0  }
 0x293   : > { %v2169_v53 = vadd.f32 %v2168_v19, %v2154_v27  ;;  %v2486_v3 = vadd.f32 %v2485_v16, %v2471_v47  ;;  %v2460_v14 = vmax.f32 %v2426_v20, %v2444_v34  ;;  %3906 = vmatprep.mubr.f32.mxu1 %v6348_v45  ;;  %381 = vst [vmem:[%s6098_s11 + $0x10] sm:$0x1] %v6348_v45  ;;  %382 = vst [vmem:[%s6098_s11 + $0x18] sm:$0x1] %v6348_v45 }
 0x294   : > { %v2474_v25 = vmul.f32 %v2458_v23, %v6404_v56  ;;  %v2475_v30 = vmul.f32 %v2459_v13, %v5835_v41 }
 0x295   : > { %v2170_v18 = vadd.f32 %v2169_v53, %v2155_v38  ;;  %v2487_v50 = vadd.f32 %v2486_v3, %v2472_v44  ;;  %v2476_v51 = vmul.f32 %v2460_v14, %v6400_v52 }
 0x297   : > { %v2171_v35 = vrot.slane %v2170_v18, 4  ;;  %v2488_v62 = vadd.f32 %v2487_v50, %v2473_v9  ;;  %v6417_v9 = vld [vmem:[#allocation7_spill] sm:$0xff] }
 0x299   : > { %v2172_v60 = vadd.f32 %v2171_v35, %v2170_v18  ;;  %v2489_v42 = vadd.f32 %v2488_v62, %v2474_v25 }
 0x29b   : > { %v2173_v32 = vrot.slane %v2172_v60, 2  ;;  %v2490_v10 = vadd.f32 %v2489_v42, %v2475_v30  ;;  %v6418_v42 = vld [vmem:[#allocation15_spill] sm:$0xff] }
 0x29d   : > { %v2174_v0 = vadd.f32 %v2173_v32, %v2172_v60  ;;  %v2491_v15 = vadd.f32 %v2490_v10, %v2476_v51 }
 0x29f   : > { %v2175_v17 = vrot.slane %v2174_v0, 1  ;;  %v2492_v4 = vrot.slane %v2491_v15, 4 }
 0x2a1   : > { %v2176_v43 = vadd.f32 %v2175_v17, %v2174_v0  ;;  %v2493_v61 = vadd.f32 %v2492_v4, %v2491_v15  ;;  %v6419_v4 = vld [vmem:[#allocation13_spill] sm:$0xff] }
 0x2a3   : > { %v2177_v20 = vadd.f32 %v2176_v43, %v5968_v1  ;;  %v2494_v2 = vrot.slane %v2493_v61, 2 }
 0x2a5   : > { %v2178_v6 = vmul.f32 %v6003_v54, %v2177_v20  ;;  %v2495_v37 = vadd.f32 %v2494_v2, %v2493_v61 }
 0x2a7   : > { %v4433_v27 = vpop.f32.mrb[32].mxu1  ;;  %2179 = vst [vmem:[#allocation2 + $0x3] sm:$0x1] %v2178_v6  ;;  %v2496_v47 = vrot.slane %v2495_v37, 1 }
 0x2a8   : > { %v2696_v19 = vadd.f32 %v4433_v27, %v6407_v46  ;;  %v2687_v16 = vpop.f32.mrb[33].mxu1 }
 0x2a9   : > { %v2688_v7 = vadd.f32 %v2687_v16, %v6408_v55  ;;  %v4434_v58 = vpop.f32.mrb[34].mxu1  ;;  %v2497_v38 = vadd.f32 %v2496_v47, %v2495_v37  ;;  %v6420_v37 = vld [vmem:[#allocation17_spill] sm:$0xff] }
 0x2aa   : > { %v2752_v44 = vmul.f32 0.1, %v2696_v19  ;;  %v2699_v34 = vadd.f32 %v4434_v58, %v6409_v36  ;;  %v2690_v53 = vpop.f32.mrb[35].mxu1 }
 0x2ab   : > { %v2750_v3 = vmul.f32 0.1, %v2688_v7  ;;  %v2691_v23 = vadd.f32 %v2690_v53, %v6417_v9  ;;  %v2498_v18 = vadd.f32 %v2497_v38, %v5968_v1 }
 0x2ac   : > { %v2753_v13 = vmul.f32 0.1, %v2699_v34  ;;  %v2768_v62 = vmax.f32 %v2696_v19, %v2752_v44 }
 0x2ad   : > { %v2766_v50 = vmax.f32 %v2688_v7, %v2750_v3  ;;  %v2751_v25 = vmul.f32 0.1, %v2691_v23  ;;  %v2499_v35 = vmul.f32 %v6003_v54, %v2498_v18  ;;  %v6421_v18 = vld [vmem:[#allocation18_spill] sm:$0xff] }
 0x2ae   : > { %v2769_v30 = vmax.f32 %v2699_v34, %v2753_v13  ;;  %v2784_v20 = vmul.f32 %v2768_v62, %v6415_v49 }
 0x2af   : > { %v2767_v14 = vmax.f32 %v2691_v23, %v2751_v25  ;;  %v4437_v60 = vpop.f32.mrb[36].mxu1  ;;  %2500 = vst [vmem:[#allocation2 + $0x4] sm:$0x1] %v2499_v35  ;;  %v2782_v0 = vmul.f32 %v2766_v50, %v6411_v24 }
 0x2b0   : > { %v2712_v32 = vadd.f32 %v4437_v60, %v6418_v42  ;;  %v4465_v51 = vpop.f32.mrb[48].mxu0  ;;  %v2703_v10 = vpop.f32.mrb[37].mxu1  ;;  %v2785_v13 = vmul.f32 %v2769_v30, %v6421_v18 }
 0x2b1   : > { %v2783_v15 = vmul.f32 %v2767_v14, %v6413_v11  ;;  %v6115_v17 = vadd.f32 %v4465_v51, %v6407_v46  ;;  %v2704_v43 = vadd.f32 %v2703_v10, %v6419_v4  ;;  %v3008_v61 = vpop.f32.mrb[49].mxu0  ;;  %v4438_v54 = vpop.f32.mrb[38].mxu1 }
 0x2b2   : > { %v2756_v2 = vmul.f32 0.1, %v2712_v32  ;;  %v3009_v6 = vadd.f32 %v3008_v61, %v6408_v55  ;;  %v2715_v27 = vadd.f32 %v4438_v54, %v6420_v37  ;;  %v4466_v47 = vpop.f32.mrb[50].mxu0  ;;  %v2706_v19 = vpop.f32.mrb[39].mxu1 }
 0x2b3   : > { %v2798_v16 = vadd.f32 %v2783_v15, %v2782_v0  ;;  %v3073_v7 = vmul.f32 0.1, %v6115_v17  ;;  %v2754_v58 = vmul.f32 0.1, %v2704_v43  ;;  %v3020_v38 = vadd.f32 %v4466_v47, %v6409_v36  ;;  %v3011_v44 = vpop.f32.mrb[51].mxu0 }
 0x2b4   : > { %v2772_v34 = vmax.f32 %v2712_v32, %v2756_v2  ;;  %v3071_v53 = vmul.f32 0.1, %v3009_v6  ;;  %v2757_v3 = vmul.f32 0.1, %v2715_v27  ;;  %v2707_v23 = vadd.f32 %v2706_v19, %v5702_v29 }
 0x2b5   : > { %v2799_v50 = vadd.f32 %v2798_v16, %v2784_v20  ;;  %v2770_v25 = vmax.f32 %v2704_v43, %v2754_v58  ;;  %v3074_v35 = vmul.f32 0.1, %v3020_v38  ;;  %v3089_v10 = vmax.f32 %v6115_v17, %v3073_v7 }
 0x2b6   : > { %v3087_v62 = vmax.f32 %v3009_v6, %v3071_v53  ;;  %v2773_v14 = vmax.f32 %v2715_v27, %v2757_v3  ;;  %v2755_v60 = vmul.f32 0.1, %v2707_v23  ;;  %v2788_v51 = vmul.f32 %v2772_v34, %v6416_v63 }
 0x2b7   : > { %v2786_v0 = vmul.f32 %v2770_v25, %v5728_v21  ;;  %v2800_v15 = vadd.f32 %v2799_v50, %v2785_v13  ;;  %v4441_v32 = vpop.f32.mrb[40].mxu1  ;;  %v3090_v54 = vmax.f32 %v3020_v38, %v3074_v35  ;;  %v3012_v30 = vadd.f32 %v3011_v44, %v6417_v9  ;;  %v6422_v13 = vld [vmem:[#allocation23_spill] sm:$0xff] }
 0x2b8   : > { %v3103_v61 = vmul.f32 %v3087_v62, %v6411_v24  ;;  %v2771_v2 = vmax.f32 %v2707_v23, %v2755_v60  ;;  %v4469_v20 = vpop.f32.mrb[52].mxu0  ;;  %v2719_v43 = vpop.f32.mrb[41].mxu1  ;;  %v2789_v6 = vmul.f32 %v2773_v14, %v5754_v33  ;;  %v2728_v27 = vadd.f32 %v4441_v32, %v5744_v40 }
 0x2b9   : > { %v2801_v47 = vadd.f32 %v2800_v15, %v2786_v0  ;;  %v3033_v19 = vadd.f32 %v4469_v20, %v6418_v42  ;;  %v3024_v17 = vpop.f32.mrb[53].mxu0  ;;  %v4442_v16 = vpop.f32.mrb[42].mxu1  ;;  %v3072_v58 = vmul.f32 0.1, %v3012_v30  ;;  %v2720_v34 = vadd.f32 %v2719_v43, %v5726_v31 }
 0x2ba   : > { %v2787_v7 = vmul.f32 %v2771_v2, %v5740_v5  ;;  %v3025_v38 = vadd.f32 %v3024_v17, %v6419_v4  ;;  %v4470_v53 = vpop.f32.mrb[54].mxu0  ;;  %v2722_v44 = vpop.f32.mrb[43].mxu1  ;;  %v2760_v3 = vmul.f32 0.1, %v2728_v27  ;;  %v2731_v50 = vadd.f32 %v4442_v16, %v6422_v13 }
 0x2bb   : > { %v3077_v23 = vmul.f32 0.1, %v3033_v19  ;;  %v3036_v25 = vadd.f32 %v4470_v53, %v6420_v37  ;;  %v3027_v35 = vpop.f32.mrb[55].mxu0  ;;  %v3088_v14 = vmax.f32 %v3012_v30, %v3072_v58  ;;  %v2758_v60 = vmul.f32 0.1, %v2720_v34 }
 0x2bc   : > { %v2802_v62 = vadd.f32 %v2801_v47, %v2787_v7  ;;  %v3075_v0 = vmul.f32 0.1, %v3025_v38  ;;  %v2776_v15 = vmax.f32 %v2728_v27, %v2760_v3  ;;  %v2761_v2 = vmul.f32 0.1, %v2731_v50 }
 0x2bd   : > { %v3093_v32 = vmax.f32 %v3033_v19, %v3077_v23  ;;  %v3078_v20 = vmul.f32 0.1, %v3036_v25  ;;  %v3104_v17 = vmul.f32 %v3088_v14, %v6413_v11  ;;  %v2774_v45 = vmax.f32 %v2720_v34, %v2758_v60 }
 0x2be   : > { %v2803_v43 = vadd.f32 %v2802_v62, %v2788_v51  ;;  %v3091_v1 = vmax.f32 %v3025_v38, %v3075_v0  ;;  %v3105_v4 = vmul.f32 %v3089_v10, %v6415_v49  ;;  %v3106_v16 = vmul.f32 %v3090_v54, %v6421_v18  ;;  %v6423_v38 = vld [vmem:[#allocation20_spill] sm:$0xff] }
 0x2bf   : > { %v2792_v53 = vmul.f32 %v2776_v15, %v5772_v26  ;;  %v3109_v47 = vmul.f32 %v3093_v32, %v6416_v63  ;;  %v4445_v30 = vpop.f32.mrb[44].mxu1  ;;  %v3119_v7 = vadd.f32 %v3104_v17, %v3103_v61  ;;  %v2790_v27 = vmul.f32 %v2774_v45, %v5760_v48 }
 0x2c0   : > { %v2804_v19 = vadd.f32 %v2803_v43, %v2789_v6  ;;  %v2777_v58 = vmax.f32 %v2731_v50, %v2761_v2  ;;  %v4473_v3 = vpop.f32.mrb[56].mxu0  ;;  %v2735_v51 = vpop.f32.mrb[45].mxu1  ;;  %v3107_v23 = vmul.f32 %v3091_v1, %v5728_v21  ;;  %v3094_v34 = vmax.f32 %v3036_v25, %v3078_v20 }
 0x2c1   : > { %v2723_v62 = vadd.f32 %v2722_v44, %v6423_v38  ;;  %v3028_v10 = vadd.f32 %v3027_v35, %v5702_v29  ;;  %v3040_v54 = vpop.f32.mrb[57].mxu0  ;;  %v4446_v14 = vpop.f32.mrb[46].mxu1  ;;  %v3120_v60 = vadd.f32 %v3119_v7, %v3105_v4  ;;  %v2744_v15 = vadd.f32 %v4445_v30, %v5770_v12 }
 0x2c2   : > { %v2805_v0 = vadd.f32 %v2804_v19, %v2790_v27  ;;  %v3049_v61 = vadd.f32 %v4473_v3, %v5744_v40  ;;  %v4474_v45 = vpop.f32.mrb[58].mxu0  ;;  %v2738_v6 = vpop.f32.mrb[47].mxu1  ;;  %v2736_v2 = vadd.f32 %v2735_v51, %v5758_v28  ;;  %v3041_v1 = vadd.f32 %v3040_v54, %v5726_v31 }
 0x2c3   : > { %v2759_v50 = vmul.f32 0.1, %v2723_v62  ;;  %v3076_v32 = vmul.f32 0.1, %v3028_v10  ;;  %v3043_v25 = vpop.f32.mrb[59].mxu0  ;;  %v3121_v44 = vadd.f32 %v3120_v60, %v3106_v16  ;;  %v2747_v43 = vadd.f32 %v4446_v14, %v5779_v39 }
 0x2c4   : > { %v2764_v20 = vmul.f32 0.1, %v2744_v15  ;;  %v3081_v35 = vmul.f32 0.1, %v3049_v61  ;;  %v2762_v7 = vmul.f32 0.1, %v2736_v2  ;;  %v2793_v19 = vmul.f32 %v2777_v58, %v5781_v59 }
 0x2c5   : > { %v2775_v4 = vmax.f32 %v2723_v62, %v2759_v50  ;;  %v3092_v17 = vmax.f32 %v3028_v10, %v3076_v32  ;;  %v3079_v30 = vmul.f32 0.1, %v3041_v1  ;;  %v3122_v27 = vadd.f32 %v3121_v44, %v3107_v23 }
 0x2c6   : > { %v2780_v3 = vmax.f32 %v2744_v15, %v2764_v20  ;;  %v2765_v40 = vmul.f32 0.1, %v2747_v43  ;;  %v2778_v54 = vmax.f32 %v2736_v2, %v2762_v7  ;;  %v3110_v16 = vmul.f32 %v3094_v34, %v5754_v33 }
 0x2c7   : > { %v2791_v63 = vmul.f32 %v2775_v4, %v5766_v22  ;;  %v3108_v51 = vmul.f32 %v3092_v17, %v5740_v5  ;;  %v3095_v31 = vmax.f32 %v3041_v1, %v3079_v30  ;;  %v3097_v14 = vmax.f32 %v3049_v61, %v3081_v35 }
 0x2c8   : > { %v2796_v60 = vmul.f32 %v2780_v3, %v5835_v41  ;;  %v3052_v62 = vadd.f32 %v4474_v45, %v6422_v13  ;;  %v4477_v10 = vpop.f32.mrb[60].mxu0  ;;  %v2794_v58 = vmul.f32 %v2778_v54, %v5798_v8  ;;  %v2781_v15 = vmax.f32 %v2747_v43, %v2765_v40 }
 0x2c9   : > { %v2806_v50 = vadd.f32 %v2805_v0, %v2791_v63  ;;  %v3123_v23 = vadd.f32 %v3122_v27, %v3108_v51  ;;  %v3056_v32 = vpop.f32.mrb[61].mxu0  ;;  %v3111_v44 = vmul.f32 %v3095_v31, %v5760_v48  ;;  %v2739_v2 = vadd.f32 %v2738_v6, %v5764_v57 }
 0x2ca   : > { %v3082_v20 = vmul.f32 0.1, %v3052_v62  ;;  %v3044_v1 = vadd.f32 %v3043_v25, %v6423_v38  ;;  %v4478_v34 = vpop.f32.mrb[62].mxu0  ;;  %v3065_v61 = vadd.f32 %v4477_v10, %v5770_v12  ;;  %v3057_v45 = vadd.f32 %v3056_v32, %v5758_v28 }
 0x2cb   : > { %v2807_v4 = vadd.f32 %v2806_v50, %v2792_v53  ;;  %v3124_v17 = vadd.f32 %v3123_v23, %v3109_v47  ;;  %v3059_v63 = vpop.f32.mrb[63].mxu0  ;;  %v2763_v35 = vmul.f32 0.1, %v2739_v2  ;;  %v3068_v40 = vadd.f32 %v4478_v34, %v5779_v39 }
 0x2cc   : > { %v3098_v0 = vmax.f32 %v3052_v62, %v3082_v20  ;;  %v3080_v7 = vmul.f32 0.1, %v3044_v1  ;;  %v3085_v30 = vmul.f32 0.1, %v3065_v61  ;;  %v3083_v27 = vmul.f32 0.1, %v3057_v45 }
 0x2cd   : > { %v2808_v43 = vadd.f32 %v2807_v4, %v2793_v19  ;;  %v3125_v31 = vadd.f32 %v3124_v17, %v3110_v16  ;;  %v3113_v6 = vmul.f32 %v3097_v14, %v5772_v26  ;;  %v2779_v25 = vmax.f32 %v2739_v2, %v2763_v35 }
 0x2ce   : > { %v3096_v3 = vmax.f32 %v3044_v1, %v3080_v7  ;;  %v3086_v53 = vmul.f32 0.1, %v3068_v40  ;;  %v2797_v54 = vmul.f32 %v2781_v15, %v6400_v52  ;;  %v3099_v10 = vmax.f32 %v3057_v45, %v3083_v27 }
 0x2cf   : > { %v2809_v47 = vadd.f32 %v2808_v43, %v2794_v58  ;;  %v3126_v51 = vadd.f32 %v3125_v31, %v3111_v44  ;;  %v4497_v50 = vpop.f32.mrb[48].mxu1  ;;  %v3114_v62 = vmul.f32 %v3098_v0, %v5781_v59  ;;  %v2795_v23 = vmul.f32 %v2779_v25, %v6404_v56 }
 0x2d0   : > { %v3112_v19 = vmul.f32 %v3096_v3, %v5766_v22  ;;  %v3060_v16 = vadd.f32 %v3059_v63, %v5764_v57  ;;  %v4529_v32 = vpop.f32.mrb[64].mxu0  ;;  %v3329_v20 = vpop.f32.mrb[49].mxu1  ;;  %v3101_v14 = vmax.f32 %v3065_v61, %v3085_v30  ;;  %v3102_v2 = vmax.f32 %v3068_v40, %v3086_v53 }
 0x2d1   : > { %v3338_v1 = vadd.f32 %v4497_v50, %v6407_v46  ;;  %v3563_v58 = vadd.f32 %v4529_v32, %v6407_v46  ;;  %v3554_v44 = vpop.f32.mrb[65].mxu0  ;;  %v4498_v15 = vpop.f32.mrb[50].mxu1  ;;  %v2810_v34 = vadd.f32 %v2809_v47, %v2795_v23  ;;  %v3115_v17 = vmul.f32 %v3099_v10, %v5798_v8 }
 0x2d2   : > { %v3127_v4 = vadd.f32 %v3126_v51, %v3112_v19  ;;  %v3084_v45 = vmul.f32 0.1, %v3060_v16  ;;  %v4530_v0 = vpop.f32.mrb[66].mxu0  ;;  %v3332_v35 = vpop.f32.mrb[51].mxu1  ;;  %v3330_v63 = vadd.f32 %v3329_v20, %v6408_v55  ;;  %v3555_v61 = vadd.f32 %v3554_v44, %v6408_v55 }
 0x2d3   : > { %v3394_v7 = vmul.f32 0.1, %v3338_v1  ;;  %v3619_v43 = vmul.f32 0.1, %v3563_v58  ;;  %v3557_v40 = vpop.f32.mrb[67].mxu0  ;;  %v2811_v31 = vadd.f32 %v2810_v34, %v2796_v60  ;;  %v3341_v46 = vadd.f32 %v4498_v15, %v6409_v36 }
 0x2d4   : > { %v3128_v30 = vadd.f32 %v3127_v4, %v3113_v6  ;;  %v3100_v27 = vmax.f32 %v3060_v16, %v3084_v45  ;;  %v3392_v53 = vmul.f32 0.1, %v3330_v63  ;;  %v3617_v50 = vmul.f32 0.1, %v3555_v61 }
 0x2d5   : > { %v3410_v25 = vmax.f32 %v3338_v1, %v3394_v7  ;;  %v3635_v3 = vmax.f32 %v3563_v58, %v3619_v43  ;;  %v2812_v47 = vadd.f32 %v2811_v31, %v2797_v54  ;;  %v3117_v23 = vmul.f32 %v3101_v14, %v5835_v41 }
 0x2d6   : > { %v3129_v51 = vadd.f32 %v3128_v30, %v3114_v62  ;;  %v3116_v10 = vmul.f32 %v3100_v27, %v6404_v56  ;;  %v3118_v19 = vmul.f32 %v3102_v2, %v6400_v52  ;;  %v3395_v32 = vmul.f32 0.1, %v3341_v46 }
 0x2d7   : > { %v4501_v55 = vpop.f32.mrb[52].mxu1  ;;  %v2813_v20 = vrot.slane %v2812_v47, 4  ;;  %v3408_v6 = vmax.f32 %v3330_v63, %v3392_v53  ;;  %v3566_v16 = vadd.f32 %v4530_v0, %v6409_v36  ;;  %v3426_v58 = vmul.f32 %v3410_v25, %v6415_v49 }
 0x2d8   : > { %v3130_v60 = vadd.f32 %v3129_v51, %v3115_v17  ;;  %v4533_v44 = vpop.f32.mrb[68].mxu0  ;;  %v3345_v1 = vpop.f32.mrb[53].mxu1  ;;  %v3651_v54 = vmul.f32 %v3635_v3, %v6415_v49  ;;  %v3333_v62 = vadd.f32 %v3332_v35, %v6417_v9  ;;  %v3558_v15 = vadd.f32 %v3557_v40, %v6417_v9  ;;  %v6424_v9 = vld [vmem:[#allocation13_spill] sm:$0xff] }
 0x2d9   : > { %v3570_v14 = vpop.f32.mrb[69].mxu0  ;;  %v4502_v34 = vpop.f32.mrb[54].mxu1  ;;  %v2814_v2 = vadd.f32 %v2813_v20, %v2812_v47  ;;  %v3633_v45 = vmax.f32 %v3555_v61, %v3617_v50  ;;  %v3620_v7 = vmul.f32 0.1, %v3566_v16  ;;  %v3411_v63 = vmax.f32 %v3341_v46, %v3395_v32 }
 0x2da   : > { %v3131_v4 = vadd.f32 %v3130_v60, %v3116_v10  ;;  %v4534_v17 = vpop.f32.mrb[70].mxu0  ;;  %v3348_v43 = vpop.f32.mrb[55].mxu1  ;;  %v3393_v36 = vmul.f32 0.1, %v3333_v62  ;;  %v3618_v0 = vmul.f32 0.1, %v3558_v15  ;;  %v6186_v31 = vadd.f32 %v4501_v55, %v6418_v42 }
 0x2db   : > { %v3573_v30 = vpop.f32.mrb[71].mxu0  ;;  %v2815_v49 = vrot.slane %v2814_v2, 2  ;;  %v3424_v35 = vmul.f32 %v3408_v6, %v6411_v24  ;;  %v3346_v40 = vadd.f32 %v3345_v1, %v6424_v9  ;;  %v3636_v25 = vmax.f32 %v3566_v16, %v3620_v7 }
 0x2dc   : > { %v3132_v27 = vadd.f32 %v3131_v4, %v3117_v23  ;;  %v3409_v3 = vmax.f32 %v3333_v62, %v3393_v36  ;;  %v3634_v53 = vmax.f32 %v3558_v15, %v3618_v0  ;;  %v6191_v61 = vadd.f32 %v4533_v44, %v6418_v42 }
 0x2dd   : > { %v2816_v47 = vadd.f32 %v2815_v49, %v2814_v2  ;;  %v3398_v51 = vmul.f32 0.1, %v6186_v31  ;;  %v3396_v10 = vmul.f32 0.1, %v3346_v40  ;;  %v3649_v50 = vmul.f32 %v3633_v45, %v6411_v24 }
 0x2de   : > { %v3133_v46 = vadd.f32 %v3132_v27, %v3118_v19  ;;  %v3427_v32 = vmul.f32 %v3411_v63, %v6421_v18  ;;  %v3425_v23 = vmul.f32 %v3409_v3, %v6413_v11  ;;  %v3650_v55 = vmul.f32 %v3634_v53, %v6413_v11 }
 0x2df   : > { %v4505_v20 = vpop.f32.mrb[56].mxu1  ;;  %v2817_v60 = vrot.slane %v2816_v47, 1  ;;  %v3412_v16 = vmax.f32 %v3346_v40, %v3396_v10  ;;  %v3571_v42 = vadd.f32 %v3570_v14, %v6424_v9  ;;  %v3652_v19 = vmul.f32 %v3636_v25, %v6421_v18  ;;  %v6425_v9 = vld [vmem:[#allocation25_spill] sm:$0xff]  ;;  %v6214_v10 = vld [vmem:[%s5069_s18] sm:$0x1] }
 0x2e0   : > { %v3134_v6 = vrot.slane %v3133_v46, 4  ;;  %v4537_v44 = vpop.f32.mrb[72].mxu0  ;;  %v3361_v1 = vpop.f32.mrb[57].mxu1  ;;  %v3440_v62 = vadd.f32 %v3425_v23, %v3424_v35  ;;  %v3665_v15 = vadd.f32 %v3650_v55, %v3649_v50  ;;  %v3623_v24 = vmul.f32 0.1, %v6191_v61 }
 0x2e1   : > { %v3586_v2 = vpop.f32.mrb[73].mxu0  ;;  %v4506_v4 = vpop.f32.mrb[58].mxu1  ;;  %v2818_v45 = vadd.f32 %v2817_v60, %v2816_v47  ;;  %v3414_v11 = vmax.f32 %v6186_v31, %v3398_v51  ;;  %v3621_v63 = vmul.f32 0.1, %v3571_v42  ;;  %v3428_v18 = vmul.f32 %v3412_v16, %v5728_v21 }
 0x2e2   : > { %v3135_v7 = vadd.f32 %v3134_v6, %v3133_v46  ;;  %v6202_v36 = vpop.f32.mrb[74].mxu0  ;;  %v6204_v0 = vpop.f32.mrb[59].mxu1  ;;  %v3441_v14 = vadd.f32 %v3440_v62, %v3426_v58  ;;  %v3666_v49 = vadd.f32 %v3665_v15, %v3651_v54  ;;  %v3357_v27 = vadd.f32 %v4502_v34, %v6420_v37 }
 0x2e3   : > { %v6208_v35 = vpop.f32.mrb[75].mxu0  ;;  %v2819_v40 = vadd.f32 %v2818_v45, %v6425_v9  ;;  %v3637_v3 = vmax.f32 %v3571_v42, %v3621_v63  ;;  %v3349_v31 = vadd.f32 %v3348_v43, %v5702_v29  ;;  %v3582_v51 = vadd.f32 %v4534_v17, %v6420_v37  ;;  %v6426_v42 = vld [vmem:[#allocation22_spill] sm:$0xff] }
 0x2e4   : > { %v3136_v25 = vrot.slane %v3135_v7, 2  ;;  %v3442_v53 = vadd.f32 %v3441_v14, %v3427_v32  ;;  %v3667_v47 = vadd.f32 %v3666_v49, %v3652_v19  ;;  %v3399_v46 = vmul.f32 0.1, %v3357_v27  ;;  %v6428_v49 = vld [vmem:[#allocation19_spill] sm:$0xff] }
 0x2e5   : > { %v2820_v58 = vmul.f32 %v6214_v10, %v2819_v40  ;;  %v3653_v34 = vmul.f32 %v3637_v3, %v5728_v21  ;;  %v3397_v50 = vmul.f32 0.1, %v3349_v31  ;;  %v3574_v55 = vadd.f32 %v3573_v30, %v5702_v29  ;;  %v6427_v30 = vld [vmem:[#allocation21_spill] sm:$0xff] }
 0x2e6   : > { %v3137_v54 = vadd.f32 %v3136_v25, %v3135_v7  ;;  %v3443_v23 = vadd.f32 %v3442_v53, %v3428_v18  ;;  %v3639_v32 = vmax.f32 %v6191_v61, %v3623_v24  ;;  %v3430_v19 = vmul.f32 %v3414_v11, %v6426_v42 }
 0x2e7   : > { %v6219_v60 = vpop.f32.mrb[60].mxu1  ;;  %2821 = vst [vmem:[#allocation2 + $0x5] sm:$0x1] %v2820_v58  ;;  %v3668_v6 = vadd.f32 %v3667_v47, %v3653_v34  ;;  %v3413_v16 = vmax.f32 %v3349_v31, %v3397_v50  ;;  %v3415_v62 = vmax.f32 %v3357_v27, %v3399_v46  ;;  %v3624_v15 = vmul.f32 0.1, %v3582_v51 }
 0x2e8   : > { %v3138_v43 = vrot.slane %v3137_v54, 1  ;;  %v4541_v37 = vpop.f32.mrb[76].mxu0  ;;  %v3377_v17 = vpop.f32.mrb[61].mxu1  ;;  %v3622_v45 = vmul.f32 0.1, %v3574_v55  ;;  %v3370_v14 = vadd.f32 %v4505_v20, %v6427_v30  ;;  %v3362_v18 = vadd.f32 %v3361_v1, %v6428_v49 }
 0x2e9   : > { %v3602_v21 = vpop.f32.mrb[77].mxu0  ;;  %v4510_v7 = vpop.f32.mrb[62].mxu1  ;;  %v3429_v29 = vmul.f32 %v3413_v16, %v5740_v5  ;;  %v3595_v25 = vadd.f32 %v4537_v44, %v6427_v30  ;;  %v3587_v11 = vadd.f32 %v3586_v2, %v6428_v49  ;;  %v3373_v27 = vadd.f32 %v4506_v4, %v6422_v13 }
 0x2ea   : > { %v3139_v63 = vadd.f32 %v3138_v43, %v3137_v54  ;;  %v4542_v40 = vpop.f32.mrb[78].mxu0  ;;  %v6226_v61 = vpop.f32.mrb[63].mxu1  ;;  %v3638_v24 = vmax.f32 %v3574_v55, %v3622_v45  ;;  %v3655_v53 = vmul.f32 %v3639_v32, %v6426_v42  ;;  %v3400_v20 = vmul.f32 0.1, %v3362_v18 }
 0x2eb   : > { %v6231_v3 = vpop.f32.mrb[79].mxu0  ;;  %v3444_v47 = vadd.f32 %v3443_v23, %v3429_v29  ;;  %v3431_v1 = vmul.f32 %v3415_v62, %v5754_v33  ;;  %v3640_v46 = vmax.f32 %v3582_v51, %v3624_v15  ;;  %v3625_v54 = vmul.f32 0.1, %v3587_v11 }
 0x2ec   : > { %v3140_v31 = vadd.f32 %v3139_v63, %v6425_v9  ;;  %v3654_v58 = vmul.f32 %v3638_v24, %v5740_v5  ;;  %v3402_v2 = vmul.f32 0.1, %v3370_v14  ;;  %v3416_v50 = vmax.f32 %v3362_v18, %v3400_v20 }
 0x2ed   : > { %v3445_v34 = vadd.f32 %v3444_v47, %v3430_v19  ;;  %v3627_v55 = vmul.f32 0.1, %v3595_v25  ;;  %v3641_v43 = vmax.f32 %v3587_v11, %v3625_v54  ;;  %v3403_v16 = vmul.f32 0.1, %v3373_v27 }
 0x2ee   : > { %v3141_v44 = vmul.f32 %v6214_v10, %v3140_v31  ;;  %v3669_v4 = vadd.f32 %v3668_v6, %v3654_v58  ;;  %v3432_v32 = vmul.f32 %v3416_v50, %v5760_v48  ;;  %v3598_v42 = vadd.f32 %v6202_v36, %v6422_v13 }
 0x2ef   : > { %v3446_v23 = vadd.f32 %v3445_v34, %v3431_v1  ;;  %v3365_v5 = vadd.f32 %v6204_v0, %v6423_v38  ;;  %v3656_v51 = vmul.f32 %v3640_v46, %v5754_v33  ;;  %v3657_v19 = vmul.f32 %v3641_v43, %v5760_v48 }
 0x2f0   : > { %3142 = vst [vmem:[#allocation2 + $0x6] sm:$0x1] %v3141_v44  ;;  %v3670_v62 = vadd.f32 %v3669_v4, %v3655_v53  ;;  %v3590_v6 = vadd.f32 %v6208_v35, %v6423_v38  ;;  %v3418_v15 = vmax.f32 %v3370_v14, %v3402_v2  ;;  %v3628_v30 = vmul.f32 0.1, %v3598_v42 }
 0x2f1   : > { %v3447_v45 = vadd.f32 %v3446_v23, %v3432_v32  ;;  %v3401_v63 = vmul.f32 0.1, %v3365_v5  ;;  %v3378_v18 = vadd.f32 %v3377_v17, %v5758_v28  ;;  %v3643_v13 = vmax.f32 %v3595_v25, %v3627_v55 }
 0x2f2   : > { %v3671_v29 = vadd.f32 %v3670_v62, %v3656_v51  ;;  %v3626_v49 = vmul.f32 0.1, %v3590_v6  ;;  %v3419_v36 = vmax.f32 %v3373_v27, %v3403_v16  ;;  %v3603_v0 = vadd.f32 %v3602_v21, %v5758_v28 }
 0x2f3   : > { %v3417_v24 = vmax.f32 %v3365_v5, %v3401_v63  ;;  %v3386_v48 = vadd.f32 %v6219_v60, %v5770_v12  ;;  %v3404_v31 = vmul.f32 0.1, %v3378_v18  ;;  %v3611_v35 = vadd.f32 %v4541_v37, %v5770_v12 }
 0x2f4   : > { %v3672_v33 = vadd.f32 %v3671_v29, %v3657_v19  ;;  %v3642_v11 = vmax.f32 %v3590_v6, %v3626_v49  ;;  %v3629_v14 = vmul.f32 0.1, %v3603_v0  ;;  %v3434_v53 = vmul.f32 %v3418_v15, %v5772_v26 }
 0x2f5   : > { %v3433_v38 = vmul.f32 %v3417_v24, %v5766_v22  ;;  %v3644_v47 = vmax.f32 %v3598_v42, %v3628_v30  ;;  %v3420_v25 = vmax.f32 %v3378_v18, %v3404_v31  ;;  %v3659_v27 = vmul.f32 %v3643_v13, %v5772_v26 }
 0x2f6   : > { %v3658_v17 = vmul.f32 %v3642_v11, %v5766_v22  ;;  %v3645_v21 = vmax.f32 %v3603_v0, %v3629_v14  ;;  %v3389_v20 = vadd.f32 %v4510_v7, %v5779_v39  ;;  %v3435_v60 = vmul.f32 %v3419_v36, %v5781_v59 }
 0x2f7   : > { %v3448_v28 = vadd.f32 %v3447_v45, %v3433_v38  ;;  %v3406_v46 = vmul.f32 0.1, %v3386_v48  ;;  %v3614_v58 = vadd.f32 %v4542_v40, %v5779_v39  ;;  %v3631_v37 = vmul.f32 0.1, %v3611_v35 }
 0x2f8   : > { %v3673_v1 = vadd.f32 %v3672_v33, %v3658_v17  ;;  %v3436_v54 = vmul.f32 %v3420_v25, %v5798_v8  ;;  %v3381_v22 = vadd.f32 %v6226_v61, %v5764_v57  ;;  %v3660_v44 = vmul.f32 %v3644_v47, %v5781_v59 }
 0x2f9   : > { %v3449_v12 = vadd.f32 %v3448_v28, %v3434_v53  ;;  %v3661_v34 = vmul.f32 %v3645_v21, %v5798_v8  ;;  %v3606_v7 = vadd.f32 %v6231_v3, %v5764_v57  ;;  %v3407_v50 = vmul.f32 0.1, %v3389_v20  ;;  %v3838_v28 = vld [vmem:[%s6098_s11 + $0x10] sm:$0x1]  ;;  %v3839_v21 = vld [vmem:[%s6098_s11 + $0x18] sm:$0x1] }
 0x2fa   : > { %v3674_v26 = vadd.f32 %v3673_v1, %v3659_v27  ;;  %v3405_v4 = vmul.f32 0.1, %v3381_v22  ;;  %v3632_v39 = vmul.f32 0.1, %v3614_v58  ;;  %v3422_v43 = vmax.f32 %v3386_v48, %v3406_v46 }
 0x2fb   : > { %v3450_v2 = vadd.f32 %v3449_v12, %v3435_v60  ;;  %v3630_v40 = vmul.f32 0.1, %v3606_v7  ;;  %v3647_v23 = vmax.f32 %v3611_v35, %v3631_v37  ;;  %v3423_v5 = vmax.f32 %v3389_v20, %v3407_v50 }
 0x2fc   : > { %v3675_v55 = vadd.f32 %v3674_v26, %v3660_v44  ;;  %v3421_v32 = vmax.f32 %v3381_v22, %v3405_v4  ;;  %v3648_v51 = vmax.f32 %v3614_v58, %v3632_v39  ;;  %v3438_v57 = vmul.f32 %v3422_v43, %v5835_v41 }
 0x2fd   : > { %v3451_v16 = vadd.f32 %v3450_v2, %v3436_v54  ;;  %v3646_v61 = vmax.f32 %v3606_v7, %v3630_v40  ;;  %v3663_v62 = vmul.f32 %v3647_v23, %v5835_v41  ;;  %v3439_v6 = vmul.f32 %v3423_v5, %v6400_v52 }
 0x2fe   : > { %v3676_v42 = vadd.f32 %v3675_v55, %v3661_v34  ;;  %v3437_v59 = vmul.f32 %v3421_v32, %v6404_v56  ;;  %v3664_v45 = vmul.f32 %v3648_v51, %v6400_v52  ;;  %v6429_v47 = vmov 0.0  }
 0x2ff   : > { %v3662_v8 = vmul.f32 %v3646_v61, %v6404_v56 }
 0x300   : > { %v3452_v3 = vadd.f32 %v3451_v16, %v3437_v59 }
 0x301   : > { %v3677_v19 = vadd.f32 %v3676_v42, %v3662_v8 }
 0x302   : > { %v3453_v15 = vadd.f32 %v3452_v3, %v3438_v57 }
 0x303   : > { %v3678_v63 = vadd.f32 %v3677_v19, %v3663_v62 }
 0x304   : > { %v3454_v29 = vadd.f32 %v3453_v15, %v3439_v6 }
 0x305   : > { %v3679_v30 = vadd.f32 %v3678_v63, %v3664_v45 }
 0x306   : > { %v3455_v49 = vrot.slane %v3454_v29, 4 }
 0x307   : > { %v3680_v18 = vrot.slane %v3679_v30, 4 }
 0x308   : > { %v3456_v13 = vadd.f32 %v3455_v49, %v3454_v29 }
 0x309   : > { %v3681_v36 = vadd.f32 %v3680_v18, %v3679_v30 }
 0x30a   : > { %v3457_v24 = vrot.slane %v3456_v13, 2 }
 0x30b   : > { %v3682_v56 = vrot.slane %v3681_v36, 2 }
 0x30c   : > { %v3458_v0 = vadd.f32 %v3457_v24, %v3456_v13 }
 0x30d   : > { %v3683_v33 = vadd.f32 %v3682_v56, %v3681_v36 }
 0x30e   : > { %v3459_v11 = vrot.slane %v3458_v0, 1 }
 0x30f   : > { %v3684_v48 = vrot.slane %v3683_v33, 1 }
 0x310   : > { %v3460_v41 = vadd.f32 %v3459_v11, %v3458_v0 }
 0x311   : > { %v3685_v31 = vadd.f32 %v3684_v48, %v3683_v33 }
 0x312   : > { %v3461_v52 = vadd.f32 %v3460_v41, %v6425_v9 }
 0x313   : > { %v3686_v38 = vadd.f32 %v3685_v31, %v6425_v9 }
 0x314   : > { %v3462_v35 = vmul.f32 %v6214_v10, %v3461_v52 }
 0x315   : > { %v3687_v14 = vmul.f32 %v6214_v10, %v3686_v38 }
 0x316   : > { %3463 = vst [vmem:[#allocation2 + $0x7] sm:$0x1] %v3462_v35 }
 0x317   : > { %3688 = vst [vmem:[#allocation2 + $0x8] sm:$0x1] %v3687_v14 }
 0x31d   : > { %v3840_v53 = vld [vmem:[#allocation2] sm:$0xff] }
 0x31e   : > { %3907 = vmatmul.mubr.f32.vlgmr.msra.gmra.mrb[64].mxu1 %v3840_v53  ;;  %v3841_v17 = vld [vmem:[#allocation2 + $0x8] sm:$0x1] }
 0x31f   : > { %3912 = vmatprep.mubr.f32.mxu1 %v6429_v47 }
 0x322   : > { %3913 = vmatmul.mubr.f32.gmra.mrb[66].mxu1 %v3841_v17 }
 0x3f1   : > { %v3908_v25 = vpop.f32.mrb[64].mxu1 }
 0x3f2   : > { %v3910_v27 = vpop.f32.mrb[65].mxu1  ;;  %3923 = vst [vmem:[%s6098_s11] sm:$0xff] %v3908_v25 }
 0x3f3   : > { %3924 = vst [vmem:[%s6098_s11 + $0x8] sm:$0xff] %v3910_v27 }
 0x3f5   : > { %v3914_v9 = vpop.f32.mrb[66].mxu1 }
 0x3f6   : > { %v3921_v20 = vadd.f32 %v3914_v9, %v3838_v28  ;;  %v3916_v60 = vpop.f32.mrb[67].mxu1 }
 0x3f7   : > { %v3922_v10 = vadd.f32 %v3916_v60, %v3839_v21 }
 0x3f8   : > { %3925 = vst [vmem:[%s6098_s11 + $0x10] sm:$0x1] %v3921_v20 }
 0x3f9   : > { %3926 = vst [vmem:[%s6098_s11 + $0x18] sm:$0x1] %v3922_v10 }
 0x3fa PF: > { %s21_s9 = sadd.s32 1, %s4707_s9   ;;  %s6430_s29 = smov %s4703_s30 }
 0x3fb   : > { %p18_p4 = scmp.ge.s32.totalorder %s21_s9, 4   ;;  %s6431_s30 = smov %s6433_s10 }
 0x3fd   :  { %20 = sbr.rel (!%p18_p4) target bundleno = 5 (0x5), region = 94 }
 0x404   :  { %3948 = vsyncpa [#allocation5], 1 }
 0x405   :  { %3950 = vsyncpa [#allocation5 + $0x1], 1 }

</bundles_post_ra>
